<compile_context>
chip_gen: v7x
topology: tpu7x:2x2x1
jax: 0.10.0
libtpu: 0.0.40
codegen_flags: <defaults>
</compile_context>

<pallas_src>
import numpy as np

import jax
import jax.numpy as jnp
from jax.experimental import pallas as pl
from jax.experimental.pallas import tpu as pltpu

_BN_EPS = 1e-5
_LRELU_SLOPE = 0.01


def _round_up(x, m):
    return (x + m - 1) // m * m


# ------------------------------ fused kernel --------------------------------

def _make_fused_kernel(num_conv_layers, num_fc_spatial):
    """Kernel arg order:
       p0, w0, [g_l, w_l for l=1..L-1], gfc, wfc, bfc, gammas, betas, out."""
    L = num_conv_layers
    S = num_fc_spatial

    def kernel(*refs):
        p0_ref, w0_ref = refs[0], refs[1]
        gw = refs[2:2 + 2 * (L - 1)]
        gfc_ref, wfc_ref, bfc_ref, gam_ref, bet_ref = refs[2 + 2 * (L - 1):-1]
        out_ref = refs[-1]

        def bn_lrelu(acc, layer):
            # acc: (M, CP) f32. Training-mode BatchNorm over the M = N*H*W rows
            # (biased variance, one-pass moments), then LeakyReLU(0.01).
            m_rows = acc.shape[0]
            s = jnp.sum(acc, axis=0, keepdims=True)
            ss = jnp.sum(acc * acc, axis=0, keepdims=True)
            mean = s * (1.0 / m_rows)
            var = ss * (1.0 / m_rows) - mean * mean
            gamma = gam_ref[pl.ds(layer, 1), :]
            beta = bet_ref[pl.ds(layer, 1), :]
            z = (acc - mean) * (jax.lax.rsqrt(var + _BN_EPS) * gamma) + beta
            return jnp.where(z > 0, z, _LRELU_SLOPE * z)

        # ---- layer 0: wrapper-side im2col patches (M0, 9) @ (9, CP) ----------
        acc = jnp.dot(p0_ref[...], w0_ref[...],
                      preferred_element_type=jnp.float32)
        a = bn_lrelu(acc, 0).astype(jnp.bfloat16)

        # ---- layers 1..L-1: 9 accumulated (gather @ act) @ weight matmuls ----
        for l in range(1, L):
            g_ref = gw[2 * (l - 1)]
            w_ref = gw[2 * (l - 1) + 1]
            acc = None
            for t in range(9):
                tap = jnp.dot(g_ref[t], a,
                              preferred_element_type=jnp.float32)
                tap = tap.astype(jnp.bfloat16)  # exact: pure row-gather of bf16
                contrib = jnp.dot(tap, w_ref[t],
                                  preferred_element_type=jnp.float32)
                acc = contrib if acc is None else acc + contrib
            a = bn_lrelu(acc, l).astype(jnp.bfloat16)

        # ---- FC: NCHW flatten folded into per-spatial-position weight slices -
        out = None
        for s in range(S):
            sel = jnp.dot(gfc_ref[s], a,
                          preferred_element_type=jnp.float32).astype(jnp.bfloat16)
            contrib = jnp.dot(sel, wfc_ref[s],
                              preferred_element_type=jnp.float32)
            out = contrib if out is None else out + contrib
        out_ref[...] = out + bfc_ref[...]

    return kernel


# ------------------------------ host-side prep ------------------------------

def _im2col_3x3_s2(x_nhwc):
    """3x3 / stride 2 / pad 1 patches.  Returns (N*Ho*Wo, 9*C), Ho, Wo."""
    N, H, W, C = x_nhwc.shape
    xp = jnp.pad(x_nhwc, ((0, 0), (1, 1), (1, 1), (0, 0)))
    Ho, Wo = H // 2, W // 2
    cols = []
    for kh in range(3):
        for kw in range(3):
            cols.append(xp[:, kh:kh + 2 * Ho:2, kw:kw + 2 * Wo:2, :])
    patches = jnp.stack(cols, axis=3)  # (N, Ho, Wo, 9, C), tap-major
    return patches.reshape(N * Ho * Wo, 9 * C), Ho, Wo


def _build_gather_mats(N, H, W):
    """0/1 gather matrices G[t], t = kh*3+kw, shape (9, N*P*Q, N*H*W), mapping
    flattened (n,h,w) input rows to the 3x3/stride-2/pad-1 tap rows of each
    output position; out-of-bounds taps are all-zero rows (zero padding)."""
    P, Q = H // 2, W // 2
    G = np.zeros((9, N * P * Q, N * H * W), np.float32)
    for n in range(N):
        for p in range(P):
            for q in range(Q):
                m = (n * P + p) * Q + q
                for kh in range(3):
                    h = 2 * p + kh - 1
                    if not (0 <= h < H):
                        continue
                    for kw in range(3):
                        w = 2 * q + kw - 1
                        if not (0 <= w < W):
                            continue
                        G[kh * 3 + kw, m, (n * H + h) * W + w] = 1.0
    return G


def _pack_operands(params, hidden_dims, latent_dim, N, H, W, CP, LP):
    L = len(hidden_dims)

    def pad2(a, rows, cols):
        out = np.zeros((rows, cols), np.float32)
        a = np.asarray(a, np.float32)
        out[:a.shape[0], :a.shape[1]] = a
        return out

    # layer 0 weight: (9*1, C0) -> (9, CP)
    w0 = pad2(params["conv0"]["w"], 9, CP)

    gw = []
    h, w = H, W
    in_c = hidden_dims[0]
    for l in range(1, L):
        h, w = h // 2, w // 2  # spatial size of layer-l *input*
        G = _build_gather_mats(N, h, w)
        gw.append(jnp.asarray(G, jnp.bfloat16))
        wl = np.asarray(params[f"conv{l}"]["w"], np.float32).reshape(
            9, in_c, hidden_dims[l])
        wl_pad = np.zeros((9, CP, CP), np.float32)
        wl_pad[:, :in_c, :hidden_dims[l]] = wl
        gw.append(jnp.asarray(wl_pad, jnp.bfloat16))
        in_c = hidden_dims[l]

    h, w = h // 2, w // 2  # final spatial size
    S = h * w
    c_last = hidden_dims[-1]
    wfc = np.asarray(params["fc"]["w"], np.float32)  # (c_last*S, latent), row = c*S + s
    wfc_stack = np.zeros((S, CP, LP), np.float32)
    for s in range(S):
        wfc_stack[s, :c_last, :latent_dim] = wfc[s::S]
    gfc = np.zeros((S, N, N * S), np.float32)
    for s in range(S):
        for n in range(N):
            gfc[s, n, n * S + s] = 1.0
    bfc = pad2(np.asarray(params["fc"]["b"]).reshape(1, -1), 1, LP)

    gammas = np.zeros((L, CP), np.float32)
    betas = np.zeros((L, CP), np.float32)
    for l in range(L):
        gammas[l, :hidden_dims[l]] = np.asarray(params[f"conv{l}"]["gamma"])
        betas[l, :hidden_dims[l]] = np.asarray(params[f"conv{l}"]["beta"])

    return dict(
        w0=jnp.asarray(w0, jnp.bfloat16),
        gw=gw,
        gfc=jnp.asarray(gfc, jnp.bfloat16),
        wfc=jnp.asarray(wfc_stack, jnp.bfloat16),
        bfc=jnp.asarray(bfc, jnp.float32),
        gammas=jnp.asarray(gammas, jnp.float32),
        betas=jnp.asarray(betas, jnp.float32),
    )


# ------------------------------ forward wrapper ------------------------------

def conv_head_forward(x_nchw, params, hidden_dims, latent_dim):
    N, c_in, H, W = x_nchw.shape
    L = len(hidden_dims)
    assert c_in == 1
    assert H % (2 ** L) == 0 and W % (2 ** L) == 0

    CP = _round_up(max(hidden_dims), 128)   # padded channel (lane) width
    LP = _round_up(latent_dim, 128)         # padded FC output width
    S = (H >> L) * (W >> L)                 # final spatial positions (=2 here)

    x = jnp.transpose(x_nchw, (0, 2, 3, 1)).astype(jnp.float32)  # NCHW -> NHWC
    p0, _, _ = _im2col_3x3_s2(x)            # (N*Ho*Wo, 9): tiny since Cin == 1
    p0 = p0.astype(jnp.bfloat16)

    packed = _pack_operands(params, hidden_dims, latent_dim, N, H, W, CP, LP)
    operands = [p0, packed["w0"], *packed["gw"],
                packed["gfc"], packed["wfc"], packed["bfc"],
                packed["gammas"], packed["betas"]]

    kernel = _make_fused_kernel(L, S)
    in_specs = [pl.BlockSpec(op.shape, lambda i, nd=op.ndim: (0,) * nd)
                for op in operands]
    out_spec = pl.BlockSpec((N, LP), lambda i: (0, 0))

    # Advisory cost estimate (gather + weight matmuls per tap, plus FC).
    flops = 2 * p0.shape[0] * p0.shape[1] * CP
    m_prev = p0.shape[0]
    for l in range(1, L):
        m_l = packed["gw"][2 * (l - 1)].shape[1]
        flops += 9 * 2 * m_l * CP * (m_prev + CP)
        m_prev = m_l
    flops += S * 2 * N * (m_prev * CP + CP * LP)
    bytes_accessed = sum(int(np.prod(o.shape)) * o.dtype.itemsize for o in operands)
    bytes_accessed += N * LP * 4

    out = pl.pallas_call(
        kernel,
        out_shape=jax.ShapeDtypeStruct((N, LP), jnp.float32),
        grid=(1,),
        in_specs=in_specs,
        out_specs=out_spec,
        compiler_params=pltpu.CompilerParams(
            dimension_semantics=("arbitrary",),
            vmem_limit_bytes=32 * 1024 * 1024,
        ),
        cost_estimate=pl.CostEstimate(
            flops=int(flops), transcendentals=0,
            bytes_accessed=int(bytes_accessed)),
    )(*operands)
    return out[:, :latent_dim]


# ------------------------------ params / reference ---------------------------

def init_params(key, hidden_dims, latent_dim, final_spatial):
    params = {}
    in_c = 1
    for li, h_dim in enumerate(hidden_dims):
        key, kw_, kg_, kb_ = jax.random.split(key, 4)
        fan_in = 9 * in_c
        params[f"conv{li}"] = {
            # (kh*kw*Cin, Cout), tap-major / channel-minor rows.
            # No conv bias: it cancels exactly under training-mode BatchNorm.
            "w": jax.random.normal(kw_, (fan_in, h_dim), jnp.float32)
                 / np.sqrt(fan_in),
            "gamma": 1.0 + 0.1 * jax.random.normal(kg_, (h_dim,), jnp.float32),
            "beta": 0.1 * jax.random.normal(kb_, (h_dim,), jnp.float32),
        }
        in_c = h_dim
    fc_in = hidden_dims[-1] * final_spatial
    key, kw_, kb_ = jax.random.split(key, 3)
    params["fc"] = {
        # (fc_in, latent); row index = c * final_spatial + s (PyTorch flatten order)
        "w": jax.random.normal(kw_, (fc_in, latent_dim), jnp.float32)
             / np.sqrt(fc_in),
        "b": 0.1 * jax.random.normal(kb_, (latent_dim,), jnp.float32),
    }
    return params


def _reference_forward(x_nchw, params, hidden_dims, latent_dim):
    """Straightforward f32 per-layer reference (im2col + matmul + BN + LReLU)."""
    N = x_nchw.shape[0]
    x = jnp.transpose(x_nchw, (0, 2, 3, 1)).astype(jnp.float32)
    for li, h_dim in enumerate(hidden_dims):
        patches, Ho, Wo = _im2col_3x3_s2(x)
        p = params[f"conv{li}"]
        y = patches @ p["w"]
        mean = jnp.mean(y, axis=0, keepdims=True)
        var = jnp.var(y, axis=0, keepdims=True)
        z = (y - mean) * jax.lax.rsqrt(var + _BN_EPS) * p["gamma"] + p["beta"]
        z = jnp.where(z > 0, z, _LRELU_SLOPE * z)
        x = z.reshape(N, Ho, Wo, h_dim)
    feat = jnp.transpose(x, (0, 3, 1, 2)).reshape(N, -1)  # NCHW flatten order
    return feat @ params["fc"]["w"] + params["fc"]["b"]


# ----------------------------------- main ------------------------------------

if __name__ == "__main__":
    # fc expects hidden_dims[-1] * 2 features, so the encoder must end at 1x2
    # spatial: with 4 stride-2 layers, 16x32 -> 8x16 -> 4x8 -> 2x4 -> 1x2.
    hidden_dims = [16, 32, 64, 128]
    latent_dim = 32
    N, C, H, W = 2, 1, 16, 32
    final_spatial = (H >> len(hidden_dims)) * (W >> len(hidden_dims))  # = 2

    key = jax.random.PRNGKey(0)
    key, kx = jax.random.split(key)
    x = jax.random.normal(kx, (N, C, H, W), jnp.float32)
    params = init_params(key, hidden_dims, latent_dim, final_spatial)

    out = conv_head_forward(x, params, hidden_dims, latent_dim)
    out = jax.block_until_ready(out)
    assert out.shape == (N, latent_dim), out.shape
    assert bool(jnp.all(jnp.isfinite(out)))

    # Cross-check against a plain-JAX f32 reference (tolerance covers the bf16
    # MXU operands used inside the fused kernel).
    ref = _reference_forward(x, params, hidden_dims, latent_dim)
    max_err = float(jnp.max(jnp.abs(out - ref)))
    assert max_err < 0.35, max_err

    print("KERNEL_OK")
</pallas_src>

<mosaic_0001>
module attributes {stable_mosaic.version = 11 : i64} {
  func.func @kernel(%arg0: i32, %arg1: memref<256x9xbf16, #tpu.memory_space<vmem>>, %arg2: memref<9x128xbf16, #tpu.memory_space<vmem>>, %arg3: memref<9x64x256xbf16, #tpu.memory_space<vmem>>, %arg4: memref<9x128x128xbf16, #tpu.memory_space<vmem>>, %arg5: memref<9x16x64xbf16, #tpu.memory_space<vmem>>, %arg6: memref<9x128x128xbf16, #tpu.memory_space<vmem>>, %arg7: memref<9x4x16xbf16, #tpu.memory_space<vmem>>, %arg8: memref<9x128x128xbf16, #tpu.memory_space<vmem>>, %arg9: memref<2x2x4xbf16, #tpu.memory_space<vmem>>, %arg10: memref<2x128x128xbf16, #tpu.memory_space<vmem>>, %arg11: memref<1x128xf32, #tpu.memory_space<vmem>>, %arg12: memref<4x128xf32, #tpu.memory_space<vmem>>, %arg13: memref<4x128xf32, #tpu.memory_space<vmem>>, %arg14: memref<2x128xf32, #tpu.memory_space<vmem>>) attributes {dimension_semantics = [#tpu.dimension_semantics<arbitrary>], iteration_bounds = array<i64: 1>, scalar_prefetch = 0 : i64, scratch_operands = 0 : i64, tpu.core_type = #tpu.core_type<tc>, window_params = [{pipeline_mode = #tpu.pipeline_mode<synchronous>, transform_indices = @transform_0, window_bounds = array<i64: 256, 9>}, {pipeline_mode = #tpu.pipeline_mode<synchronous>, transform_indices = @transform_1, window_bounds = array<i64: 9, 128>}, {pipeline_mode = #tpu.pipeline_mode<synchronous>, transform_indices = @transform_2, window_bounds = array<i64: 9, 64, 256>}, {pipeline_mode = #tpu.pipeline_mode<synchronous>, transform_indices = @transform_3, window_bounds = array<i64: 9, 128, 128>}, {pipeline_mode = #tpu.pipeline_mode<synchronous>, transform_indices = @transform_4, window_bounds = array<i64: 9, 16, 64>}, {pipeline_mode = #tpu.pipeline_mode<synchronous>, transform_indices = @transform_5, window_bounds = array<i64: 9, 128, 128>}, {pipeline_mode = #tpu.pipeline_mode<synchronous>, transform_indices = @transform_6, window_bounds = array<i64: 9, 4, 16>}, {pipeline_mode = #tpu.pipeline_mode<synchronous>, transform_indices = @transform_7, window_bounds = array<i64: 9, 128, 128>}, {pipeline_mode = #tpu.pipeline_mode<synchronous>, transform_indices = @transform_8, window_bounds = array<i64: 2, 2, 4>}, {pipeline_mode = #tpu.pipeline_mode<synchronous>, transform_indices = @transform_9, window_bounds = array<i64: 2, 128, 128>}, {pipeline_mode = #tpu.pipeline_mode<synchronous>, transform_indices = @transform_10, window_bounds = array<i64: 1, 128>}, {pipeline_mode = #tpu.pipeline_mode<synchronous>, transform_indices = @transform_11, window_bounds = array<i64: 4, 128>}, {pipeline_mode = #tpu.pipeline_mode<synchronous>, transform_indices = @transform_12, window_bounds = array<i64: 4, 128>}, {pipeline_mode = #tpu.pipeline_mode<synchronous>, transform_indices = @transform_13, window_bounds = array<i64: 2, 128>}]} {
    %c0 = arith.constant 0 : index
    %c0_0 = arith.constant 0 : index
    %0 = vector.load %arg1[%c0, %c0_0] : memref<256x9xbf16, #tpu.memory_space<vmem>>, vector<256x9xbf16>
    %c0_1 = arith.constant 0 : index
    %c0_2 = arith.constant 0 : index
    %1 = vector.load %arg2[%c0_1, %c0_2] : memref<9x128xbf16, #tpu.memory_space<vmem>>, vector<9x128xbf16>
    %cst = arith.constant dense<0.000000e+00> : vector<256x128xf32>
    %2 = tpu.matmul %0, %1, %cst {dimension_numbers = #tpu.dot_dimension_numbers<[1], [0], [0], [1], [0, 0, 1, 1], [], []>} : vector<256x9xbf16>, vector<9x128xbf16>, vector<256x128xf32> -> vector<256x128xf32>
    %cst_3 = arith.constant dense<0.000000e+00> : vector<128xf32>
    %3 = vector.multi_reduction <add>, %2, %cst_3 [0] : vector<256x128xf32> to vector<128xf32>
    %4 = vector.shape_cast %3 : vector<128xf32> to vector<1x128xf32>
    %5 = arith.mulf %2, %2 : vector<256x128xf32>
    %cst_4 = arith.constant dense<0.000000e+00> : vector<128xf32>
    %6 = vector.multi_reduction <add>, %5, %cst_4 [0] : vector<256x128xf32> to vector<128xf32>
    %7 = vector.shape_cast %6 : vector<128xf32> to vector<1x128xf32>
    %cst_5 = arith.constant 3.906250e-03 : f32
    %8 = vector.broadcast %cst_5 : f32 to vector<1x128xf32>
    %9 = arith.mulf %4, %8 : vector<1x128xf32>
    %cst_6 = arith.constant 3.906250e-03 : f32
    %10 = vector.broadcast %cst_6 : f32 to vector<1x128xf32>
    %11 = arith.mulf %7, %10 : vector<1x128xf32>
    %12 = arith.mulf %9, %9 : vector<1x128xf32>
    %13 = arith.subf %11, %12 : vector<1x128xf32>
    %c0_7 = arith.constant 0 : index
    %c0_8 = arith.constant 0 : index
    %14 = vector.load %arg12[%c0_7, %c0_8] : memref<4x128xf32, #tpu.memory_space<vmem>>, vector<1x128xf32>
    %c0_9 = arith.constant 0 : index
    %c0_10 = arith.constant 0 : index
    %15 = vector.load %arg13[%c0_9, %c0_10] : memref<4x128xf32, #tpu.memory_space<vmem>>, vector<1x128xf32>
    %16 = vector.broadcast %9 : vector<1x128xf32> to vector<256x128xf32>
    %17 = arith.subf %2, %16 : vector<256x128xf32>
    %cst_11 = arith.constant 9.99999974E-6 : f32
    %18 = vector.broadcast %cst_11 : f32 to vector<1x128xf32>
    %19 = arith.addf %13, %18 : vector<1x128xf32>
    %20 = math.rsqrt %19 : vector<1x128xf32>
    %21 = arith.mulf %20, %14 : vector<1x128xf32>
    %22 = vector.broadcast %21 : vector<1x128xf32> to vector<256x128xf32>
    %23 = arith.mulf %17, %22 : vector<256x128xf32>
    %24 = vector.broadcast %15 : vector<1x128xf32> to vector<256x128xf32>
    %25 = arith.addf %23, %24 : vector<256x128xf32>
    %cst_12 = arith.constant 0.000000e+00 : f32
    %26 = vector.broadcast %cst_12 : f32 to vector<256x128xf32>
    %27 = arith.cmpf ogt, %25, %26 : vector<256x128xf32>
    %cst_13 = arith.constant 0.00999999977 : f32
    %28 = vector.broadcast %cst_13 : f32 to vector<256x128xf32>
    %29 = arith.mulf %28, %25 : vector<256x128xf32>
    %30 = arith.select %27, %25, %29 : vector<256x128xi1>, vector<256x128xf32>
    %31 = arith.truncf %30 : vector<256x128xf32> to vector<256x128xbf16>
    %c0_14 = arith.constant 0 : index
    %c0_15 = arith.constant 0 : index
    %c0_16 = arith.constant 0 : index
    %32 = vector.load %arg3[%c0_14, %c0_15, %c0_16] : memref<9x64x256xbf16, #tpu.memory_space<vmem>>, vector<1x64x256xbf16>
    %33 = vector.shape_cast %32 : vector<1x64x256xbf16> to vector<64x256xbf16>
    %cst_17 = arith.constant dense<0.000000e+00> : vector<64x128xf32>
    %34 = tpu.matmul %33, %31, %cst_17 {dimension_numbers = #tpu.dot_dimension_numbers<[1], [0], [0], [1], [0, 0, 1, 1], [], []>} : vector<64x256xbf16>, vector<256x128xbf16>, vector<64x128xf32> -> vector<64x128xf32>
    %35 = arith.truncf %34 : vector<64x128xf32> to vector<64x128xbf16>
    %c0_18 = arith.constant 0 : index
    %c0_19 = arith.constant 0 : index
    %c0_20 = arith.constant 0 : index
    %36 = vector.load %arg4[%c0_18, %c0_19, %c0_20] : memref<9x128x128xbf16, #tpu.memory_space<vmem>>, vector<1x128x128xbf16>
    %37 = vector.shape_cast %36 : vector<1x128x128xbf16> to vector<128x128xbf16>
    %cst_21 = arith.constant dense<0.000000e+00> : vector<64x128xf32>
    %38 = tpu.matmul %35, %37, %cst_21 {dimension_numbers = #tpu.dot_dimension_numbers<[1], [0], [0], [1], [0, 0, 1, 1], [], []>} : vector<64x128xbf16>, vector<128x128xbf16>, vector<64x128xf32> -> vector<64x128xf32>
    %c1 = arith.constant 1 : index
    %c0_22 = arith.constant 0 : index
    %c0_23 = arith.constant 0 : index
    %39 = vector.load %arg3[%c1, %c0_22, %c0_23] : memref<9x64x256xbf16, #tpu.memory_space<vmem>>, vector<1x64x256xbf16>
    %40 = vector.shape_cast %39 : vector<1x64x256xbf16> to vector<64x256xbf16>
    %cst_24 = arith.constant dense<0.000000e+00> : vector<64x128xf32>
    %41 = tpu.matmul %40, %31, %cst_24 {dimension_numbers = #tpu.dot_dimension_numbers<[1], [0], [0], [1], [0, 0, 1, 1], [], []>} : vector<64x256xbf16>, vector<256x128xbf16>, vector<64x128xf32> -> vector<64x128xf32>
    %42 = arith.truncf %41 : vector<64x128xf32> to vector<64x128xbf16>
    %c1_25 = arith.constant 1 : index
    %c0_26 = arith.constant 0 : index
    %c0_27 = arith.constant 0 : index
    %43 = vector.load %arg4[%c1_25, %c0_26, %c0_27] : memref<9x128x128xbf16, #tpu.memory_space<vmem>>, vector<1x128x128xbf16>
    %44 = vector.shape_cast %43 : vector<1x128x128xbf16> to vector<128x128xbf16>
    %cst_28 = arith.constant dense<0.000000e+00> : vector<64x128xf32>
    %45 = tpu.matmul %42, %44, %cst_28 {dimension_numbers = #tpu.dot_dimension_numbers<[1], [0], [0], [1], [0, 0, 1, 1], [], []>} : vector<64x128xbf16>, vector<128x128xbf16>, vector<64x128xf32> -> vector<64x128xf32>
    %46 = arith.addf %38, %45 : vector<64x128xf32>
    %c2 = arith.constant 2 : index
    %c0_29 = arith.constant 0 : index
    %c0_30 = arith.constant 0 : index
    %47 = vector.load %arg3[%c2, %c0_29, %c0_30] : memref<9x64x256xbf16, #tpu.memory_space<vmem>>, vector<1x64x256xbf16>
    %48 = vector.shape_cast %47 : vector<1x64x256xbf16> to vector<64x256xbf16>
    %cst_31 = arith.constant dense<0.000000e+00> : vector<64x128xf32>
    %49 = tpu.matmul %48, %31, %cst_31 {dimension_numbers = #tpu.dot_dimension_numbers<[1], [0], [0], [1], [0, 0, 1, 1], [], []>} : vector<64x256xbf16>, vector<256x128xbf16>, vector<64x128xf32> -> vector<64x128xf32>
    %50 = arith.truncf %49 : vector<64x128xf32> to vector<64x128xbf16>
    %c2_32 = arith.constant 2 : index
    %c0_33 = arith.constant 0 : index
    %c0_34 = arith.constant 0 : index
    %51 = vector.load %arg4[%c2_32, %c0_33, %c0_34] : memref<9x128x128xbf16, #tpu.memory_space<vmem>>, vector<1x128x128xbf16>
    %52 = vector.shape_cast %51 : vector<1x128x128xbf16> to vector<128x128xbf16>
    %cst_35 = arith.constant dense<0.000000e+00> : vector<64x128xf32>
    %53 = tpu.matmul %50, %52, %cst_35 {dimension_numbers = #tpu.dot_dimension_numbers<[1], [0], [0], [1], [0, 0, 1, 1], [], []>} : vector<64x128xbf16>, vector<128x128xbf16>, vector<64x128xf32> -> vector<64x128xf32>
    %54 = arith.addf %46, %53 : vector<64x128xf32>
    %c3 = arith.constant 3 : index
    %c0_36 = arith.constant 0 : index
    %c0_37 = arith.constant 0 : index
    %55 = vector.load %arg3[%c3, %c0_36, %c0_37] : memref<9x64x256xbf16, #tpu.memory_space<vmem>>, vector<1x64x256xbf16>
    %56 = vector.shape_cast %55 : vector<1x64x256xbf16> to vector<64x256xbf16>
    %cst_38 = arith.constant dense<0.000000e+00> : vector<64x128xf32>
    %57 = tpu.matmul %56, %31, %cst_38 {dimension_numbers = #tpu.dot_dimension_numbers<[1], [0], [0], [1], [0, 0, 1, 1], [], []>} : vector<64x256xbf16>, vector<256x128xbf16>, vector<64x128xf32> -> vector<64x128xf32>
    %58 = arith.truncf %57 : vector<64x128xf32> to vector<64x128xbf16>
    %c3_39 = arith.constant 3 : index
    %c0_40 = arith.constant 0 : index
    %c0_41 = arith.constant 0 : index
    %59 = vector.load %arg4[%c3_39, %c0_40, %c0_41] : memref<9x128x128xbf16, #tpu.memory_space<vmem>>, vector<1x128x128xbf16>
    %60 = vector.shape_cast %59 : vector<1x128x128xbf16> to vector<128x128xbf16>
    %cst_42 = arith.constant dense<0.000000e+00> : vector<64x128xf32>
    %61 = tpu.matmul %58, %60, %cst_42 {dimension_numbers = #tpu.dot_dimension_numbers<[1], [0], [0], [1], [0, 0, 1, 1], [], []>} : vector<64x128xbf16>, vector<128x128xbf16>, vector<64x128xf32> -> vector<64x128xf32>
    %62 = arith.addf %54, %61 : vector<64x128xf32>
    %c4 = arith.constant 4 : index
    %c0_43 = arith.constant 0 : index
    %c0_44 = arith.constant 0 : index
    %63 = vector.load %arg3[%c4, %c0_43, %c0_44] : memref<9x64x256xbf16, #tpu.memory_space<vmem>>, vector<1x64x256xbf16>
    %64 = vector.shape_cast %63 : vector<1x64x256xbf16> to vector<64x256xbf16>
    %cst_45 = arith.constant dense<0.000000e+00> : vector<64x128xf32>
    %65 = tpu.matmul %64, %31, %cst_45 {dimension_numbers = #tpu.dot_dimension_numbers<[1], [0], [0], [1], [0, 0, 1, 1], [], []>} : vector<64x256xbf16>, vector<256x128xbf16>, vector<64x128xf32> -> vector<64x128xf32>
    %66 = arith.truncf %65 : vector<64x128xf32> to vector<64x128xbf16>
    %c4_46 = arith.constant 4 : index
    %c0_47 = arith.constant 0 : index
    %c0_48 = arith.constant 0 : index
    %67 = vector.load %arg4[%c4_46, %c0_47, %c0_48] : memref<9x128x128xbf16, #tpu.memory_space<vmem>>, vector<1x128x128xbf16>
    %68 = vector.shape_cast %67 : vector<1x128x128xbf16> to vector<128x128xbf16>
    %cst_49 = arith.constant dense<0.000000e+00> : vector<64x128xf32>
    %69 = tpu.matmul %66, %68, %cst_49 {dimension_numbers = #tpu.dot_dimension_numbers<[1], [0], [0], [1], [0, 0, 1, 1], [], []>} : vector<64x128xbf16>, vector<128x128xbf16>, vector<64x128xf32> -> vector<64x128xf32>
    %70 = arith.addf %62, %69 : vector<64x128xf32>
    %c5 = arith.constant 5 : index
    %c0_50 = arith.constant 0 : index
    %c0_51 = arith.constant 0 : index
    %71 = vector.load %arg3[%c5, %c0_50, %c0_51] : memref<9x64x256xbf16, #tpu.memory_space<vmem>>, vector<1x64x256xbf16>
    %72 = vector.shape_cast %71 : vector<1x64x256xbf16> to vector<64x256xbf16>
    %cst_52 = arith.constant dense<0.000000e+00> : vector<64x128xf32>
    %73 = tpu.matmul %72, %31, %cst_52 {dimension_numbers = #tpu.dot_dimension_numbers<[1], [0], [0], [1], [0, 0, 1, 1], [], []>} : vector<64x256xbf16>, vector<256x128xbf16>, vector<64x128xf32> -> vector<64x128xf32>
    %74 = arith.truncf %73 : vector<64x128xf32> to vector<64x128xbf16>
    %c5_53 = arith.constant 5 : index
    %c0_54 = arith.constant 0 : index
    %c0_55 = arith.constant 0 : index
    %75 = vector.load %arg4[%c5_53, %c0_54, %c0_55] : memref<9x128x128xbf16, #tpu.memory_space<vmem>>, vector<1x128x128xbf16>
    %76 = vector.shape_cast %75 : vector<1x128x128xbf16> to vector<128x128xbf16>
    %cst_56 = arith.constant dense<0.000000e+00> : vector<64x128xf32>
    %77 = tpu.matmul %74, %76, %cst_56 {dimension_numbers = #tpu.dot_dimension_numbers<[1], [0], [0], [1], [0, 0, 1, 1], [], []>} : vector<64x128xbf16>, vector<128x128xbf16>, vector<64x128xf32> -> vector<64x128xf32>
    %78 = arith.addf %70, %77 : vector<64x128xf32>
    %c6 = arith.constant 6 : index
    %c0_57 = arith.constant 0 : index
    %c0_58 = arith.constant 0 : index
    %79 = vector.load %arg3[%c6, %c0_57, %c0_58] : memref<9x64x256xbf16, #tpu.memory_space<vmem>>, vector<1x64x256xbf16>
    %80 = vector.shape_cast %79 : vector<1x64x256xbf16> to vector<64x256xbf16>
    %cst_59 = arith.constant dense<0.000000e+00> : vector<64x128xf32>
    %81 = tpu.matmul %80, %31, %cst_59 {dimension_numbers = #tpu.dot_dimension_numbers<[1], [0], [0], [1], [0, 0, 1, 1], [], []>} : vector<64x256xbf16>, vector<256x128xbf16>, vector<64x128xf32> -> vector<64x128xf32>
    %82 = arith.truncf %81 : vector<64x128xf32> to vector<64x128xbf16>
    %c6_60 = arith.constant 6 : index
    %c0_61 = arith.constant 0 : index
    %c0_62 = arith.constant 0 : index
    %83 = vector.load %arg4[%c6_60, %c0_61, %c0_62] : memref<9x128x128xbf16, #tpu.memory_space<vmem>>, vector<1x128x128xbf16>
    %84 = vector.shape_cast %83 : vector<1x128x128xbf16> to vector<128x128xbf16>
    %cst_63 = arith.constant dense<0.000000e+00> : vector<64x128xf32>
    %85 = tpu.matmul %82, %84, %cst_63 {dimension_numbers = #tpu.dot_dimension_numbers<[1], [0], [0], [1], [0, 0, 1, 1], [], []>} : vector<64x128xbf16>, vector<128x128xbf16>, vector<64x128xf32> -> vector<64x128xf32>
    %86 = arith.addf %78, %85 : vector<64x128xf32>
    %c7 = arith.constant 7 : index
    %c0_64 = arith.constant 0 : index
    %c0_65 = arith.constant 0 : index
    %87 = vector.load %arg3[%c7, %c0_64, %c0_65] : memref<9x64x256xbf16, #tpu.memory_space<vmem>>, vector<1x64x256xbf16>
    %88 = vector.shape_cast %87 : vector<1x64x256xbf16> to vector<64x256xbf16>
    %cst_66 = arith.constant dense<0.000000e+00> : vector<64x128xf32>
    %89 = tpu.matmul %88, %31, %cst_66 {dimension_numbers = #tpu.dot_dimension_numbers<[1], [0], [0], [1], [0, 0, 1, 1], [], []>} : vector<64x256xbf16>, vector<256x128xbf16>, vector<64x128xf32> -> vector<64x128xf32>
    %90 = arith.truncf %89 : vector<64x128xf32> to vector<64x128xbf16>
    %c7_67 = arith.constant 7 : index
    %c0_68 = arith.constant 0 : index
    %c0_69 = arith.constant 0 : index
    %91 = vector.load %arg4[%c7_67, %c0_68, %c0_69] : memref<9x128x128xbf16, #tpu.memory_space<vmem>>, vector<1x128x128xbf16>
    %92 = vector.shape_cast %91 : vector<1x128x128xbf16> to vector<128x128xbf16>
    %cst_70 = arith.constant dense<0.000000e+00> : vector<64x128xf32>
    %93 = tpu.matmul %90, %92, %cst_70 {dimension_numbers = #tpu.dot_dimension_numbers<[1], [0], [0], [1], [0, 0, 1, 1], [], []>} : vector<64x128xbf16>, vector<128x128xbf16>, vector<64x128xf32> -> vector<64x128xf32>
    %94 = arith.addf %86, %93 : vector<64x128xf32>
    %c8 = arith.constant 8 : index
    %c0_71 = arith.constant 0 : index
    %c0_72 = arith.constant 0 : index
    %95 = vector.load %arg3[%c8, %c0_71, %c0_72] : memref<9x64x256xbf16, #tpu.memory_space<vmem>>, vector<1x64x256xbf16>
    %96 = vector.shape_cast %95 : vector<1x64x256xbf16> to vector<64x256xbf16>
    %cst_73 = arith.constant dense<0.000000e+00> : vector<64x128xf32>
    %97 = tpu.matmul %96, %31, %cst_73 {dimension_numbers = #tpu.dot_dimension_numbers<[1], [0], [0], [1], [0, 0, 1, 1], [], []>} : vector<64x256xbf16>, vector<256x128xbf16>, vector<64x128xf32> -> vector<64x128xf32>
    %98 = arith.truncf %97 : vector<64x128xf32> to vector<64x128xbf16>
    %c8_74 = arith.constant 8 : index
    %c0_75 = arith.constant 0 : index
    %c0_76 = arith.constant 0 : index
    %99 = vector.load %arg4[%c8_74, %c0_75, %c0_76] : memref<9x128x128xbf16, #tpu.memory_space<vmem>>, vector<1x128x128xbf16>
    %100 = vector.shape_cast %99 : vector<1x128x128xbf16> to vector<128x128xbf16>
    %cst_77 = arith.constant dense<0.000000e+00> : vector<64x128xf32>
    %101 = tpu.matmul %98, %100, %cst_77 {dimension_numbers = #tpu.dot_dimension_numbers<[1], [0], [0], [1], [0, 0, 1, 1], [], []>} : vector<64x128xbf16>, vector<128x128xbf16>, vector<64x128xf32> -> vector<64x128xf32>
    %102 = arith.addf %94, %101 : vector<64x128xf32>
    %cst_78 = arith.constant dense<0.000000e+00> : vector<128xf32>
    %103 = vector.multi_reduction <add>, %102, %cst_78 [0] : vector<64x128xf32> to vector<128xf32>
    %104 = vector.shape_cast %103 : vector<128xf32> to vector<1x128xf32>
    %105 = arith.mulf %102, %102 : vector<64x128xf32>
    %cst_79 = arith.constant dense<0.000000e+00> : vector<128xf32>
    %106 = vector.multi_reduction <add>, %105, %cst_79 [0] : vector<64x128xf32> to vector<128xf32>
    %107 = vector.shape_cast %106 : vector<128xf32> to vector<1x128xf32>
    %cst_80 = arith.constant 1.562500e-02 : f32
    %108 = vector.broadcast %cst_80 : f32 to vector<1x128xf32>
    %109 = arith.mulf %104, %108 : vector<1x128xf32>
    %cst_81 = arith.constant 1.562500e-02 : f32
    %110 = vector.broadcast %cst_81 : f32 to vector<1x128xf32>
    %111 = arith.mulf %107, %110 : vector<1x128xf32>
    %112 = arith.mulf %109, %109 : vector<1x128xf32>
    %113 = arith.subf %111, %112 : vector<1x128xf32>
    %c1_82 = arith.constant 1 : index
    %c0_83 = arith.constant 0 : index
    %114 = vector.load %arg12[%c1_82, %c0_83] : memref<4x128xf32, #tpu.memory_space<vmem>>, vector<1x128xf32>
    %c1_84 = arith.constant 1 : index
    %c0_85 = arith.constant 0 : index
    %115 = vector.load %arg13[%c1_84, %c0_85] : memref<4x128xf32, #tpu.memory_space<vmem>>, vector<1x128xf32>
    %116 = vector.broadcast %109 : vector<1x128xf32> to vector<64x128xf32>
    %117 = arith.subf %102, %116 : vector<64x128xf32>
    %cst_86 = arith.constant 9.99999974E-6 : f32
    %118 = vector.broadcast %cst_86 : f32 to vector<1x128xf32>
    %119 = arith.addf %113, %118 : vector<1x128xf32>
    %120 = math.rsqrt %119 : vector<1x128xf32>
    %121 = arith.mulf %120, %114 : vector<1x128xf32>
    %122 = vector.broadcast %121 : vector<1x128xf32> to vector<64x128xf32>
    %123 = arith.mulf %117, %122 : vector<64x128xf32>
    %124 = vector.broadcast %115 : vector<1x128xf32> to vector<64x128xf32>
    %125 = arith.addf %123, %124 : vector<64x128xf32>
    %cst_87 = arith.constant 0.000000e+00 : f32
    %126 = vector.broadcast %cst_87 : f32 to vector<64x128xf32>
    %127 = arith.cmpf ogt, %125, %126 : vector<64x128xf32>
    %cst_88 = arith.constant 0.00999999977 : f32
    %128 = vector.broadcast %cst_88 : f32 to vector<64x128xf32>
    %129 = arith.mulf %128, %125 : vector<64x128xf32>
    %130 = arith.select %127, %125, %129 : vector<64x128xi1>, vector<64x128xf32>
    %131 = arith.truncf %130 : vector<64x128xf32> to vector<64x128xbf16>
    %c0_89 = arith.constant 0 : index
    %c0_90 = arith.constant 0 : index
    %c0_91 = arith.constant 0 : index
    %132 = vector.load %arg5[%c0_89, %c0_90, %c0_91] : memref<9x16x64xbf16, #tpu.memory_space<vmem>>, vector<1x16x64xbf16>
    %133 = vector.shape_cast %132 : vector<1x16x64xbf16> to vector<16x64xbf16>
    %cst_92 = arith.constant dense<0.000000e+00> : vector<16x128xf32>
    %134 = tpu.matmul %133, %131, %cst_92 {dimension_numbers = #tpu.dot_dimension_numbers<[1], [0], [0], [1], [0, 0, 1, 1], [], []>} : vector<16x64xbf16>, vector<64x128xbf16>, vector<16x128xf32> -> vector<16x128xf32>
    %135 = arith.truncf %134 : vector<16x128xf32> to vector<16x128xbf16>
    %c0_93 = arith.constant 0 : index
    %c0_94 = arith.constant 0 : index
    %c0_95 = arith.constant 0 : index
    %136 = vector.load %arg6[%c0_93, %c0_94, %c0_95] : memref<9x128x128xbf16, #tpu.memory_space<vmem>>, vector<1x128x128xbf16>
    %137 = vector.shape_cast %136 : vector<1x128x128xbf16> to vector<128x128xbf16>
    %cst_96 = arith.constant dense<0.000000e+00> : vector<16x128xf32>
    %138 = tpu.matmul %135, %137, %cst_96 {dimension_numbers = #tpu.dot_dimension_numbers<[1], [0], [0], [1], [0, 0, 1, 1], [], []>} : vector<16x128xbf16>, vector<128x128xbf16>, vector<16x128xf32> -> vector<16x128xf32>
    %c1_97 = arith.constant 1 : index
    %c0_98 = arith.constant 0 : index
    %c0_99 = arith.constant 0 : index
    %139 = vector.load %arg5[%c1_97, %c0_98, %c0_99] : memref<9x16x64xbf16, #tpu.memory_space<vmem>>, vector<1x16x64xbf16>
    %140 = vector.shape_cast %139 : vector<1x16x64xbf16> to vector<16x64xbf16>
    %cst_100 = arith.constant dense<0.000000e+00> : vector<16x128xf32>
    %141 = tpu.matmul %140, %131, %cst_100 {dimension_numbers = #tpu.dot_dimension_numbers<[1], [0], [0], [1], [0, 0, 1, 1], [], []>} : vector<16x64xbf16>, vector<64x128xbf16>, vector<16x128xf32> -> vector<16x128xf32>
    %142 = arith.truncf %141 : vector<16x128xf32> to vector<16x128xbf16>
    %c1_101 = arith.constant 1 : index
    %c0_102 = arith.constant 0 : index
    %c0_103 = arith.constant 0 : index
    %143 = vector.load %arg6[%c1_101, %c0_102, %c0_103] : memref<9x128x128xbf16, #tpu.memory_space<vmem>>, vector<1x128x128xbf16>
    %144 = vector.shape_cast %143 : vector<1x128x128xbf16> to vector<128x128xbf16>
    %cst_104 = arith.constant dense<0.000000e+00> : vector<16x128xf32>
    %145 = tpu.matmul %142, %144, %cst_104 {dimension_numbers = #tpu.dot_dimension_numbers<[1], [0], [0], [1], [0, 0, 1, 1], [], []>} : vector<16x128xbf16>, vector<128x128xbf16>, vector<16x128xf32> -> vector<16x128xf32>
    %146 = arith.addf %138, %145 : vector<16x128xf32>
    %c2_105 = arith.constant 2 : index
    %c0_106 = arith.constant 0 : index
    %c0_107 = arith.constant 0 : index
    %147 = vector.load %arg5[%c2_105, %c0_106, %c0_107] : memref<9x16x64xbf16, #tpu.memory_space<vmem>>, vector<1x16x64xbf16>
    %148 = vector.shape_cast %147 : vector<1x16x64xbf16> to vector<16x64xbf16>
    %cst_108 = arith.constant dense<0.000000e+00> : vector<16x128xf32>
    %149 = tpu.matmul %148, %131, %cst_108 {dimension_numbers = #tpu.dot_dimension_numbers<[1], [0], [0], [1], [0, 0, 1, 1], [], []>} : vector<16x64xbf16>, vector<64x128xbf16>, vector<16x128xf32> -> vector<16x128xf32>
    %150 = arith.truncf %149 : vector<16x128xf32> to vector<16x128xbf16>
    %c2_109 = arith.constant 2 : index
    %c0_110 = arith.constant 0 : index
    %c0_111 = arith.constant 0 : index
    %151 = vector.load %arg6[%c2_109, %c0_110, %c0_111] : memref<9x128x128xbf16, #tpu.memory_space<vmem>>, vector<1x128x128xbf16>
    %152 = vector.shape_cast %151 : vector<1x128x128xbf16> to vector<128x128xbf16>
    %cst_112 = arith.constant dense<0.000000e+00> : vector<16x128xf32>
    %153 = tpu.matmul %150, %152, %cst_112 {dimension_numbers = #tpu.dot_dimension_numbers<[1], [0], [0], [1], [0, 0, 1, 1], [], []>} : vector<16x128xbf16>, vector<128x128xbf16>, vector<16x128xf32> -> vector<16x128xf32>
    %154 = arith.addf %146, %153 : vector<16x128xf32>
    %c3_113 = arith.constant 3 : index
    %c0_114 = arith.constant 0 : index
    %c0_115 = arith.constant 0 : index
    %155 = vector.load %arg5[%c3_113, %c0_114, %c0_115] : memref<9x16x64xbf16, #tpu.memory_space<vmem>>, vector<1x16x64xbf16>
    %156 = vector.shape_cast %155 : vector<1x16x64xbf16> to vector<16x64xbf16>
    %cst_116 = arith.constant dense<0.000000e+00> : vector<16x128xf32>
    %157 = tpu.matmul %156, %131, %cst_116 {dimension_numbers = #tpu.dot_dimension_numbers<[1], [0], [0], [1], [0, 0, 1, 1], [], []>} : vector<16x64xbf16>, vector<64x128xbf16>, vector<16x128xf32> -> vector<16x128xf32>
    %158 = arith.truncf %157 : vector<16x128xf32> to vector<16x128xbf16>
    %c3_117 = arith.constant 3 : index
    %c0_118 = arith.constant 0 : index
    %c0_119 = arith.constant 0 : index
    %159 = vector.load %arg6[%c3_117, %c0_118, %c0_119] : memref<9x128x128xbf16, #tpu.memory_space<vmem>>, vector<1x128x128xbf16>
    %160 = vector.shape_cast %159 : vector<1x128x128xbf16> to vector<128x128xbf16>
    %cst_120 = arith.constant dense<0.000000e+00> : vector<16x128xf32>
    %161 = tpu.matmul %158, %160, %cst_120 {dimension_numbers = #tpu.dot_dimension_numbers<[1], [0], [0], [1], [0, 0, 1, 1], [], []>} : vector<16x128xbf16>, vector<128x128xbf16>, vector<16x128xf32> -> vector<16x128xf32>
    %162 = arith.addf %154, %161 : vector<16x128xf32>
    %c4_121 = arith.constant 4 : index
    %c0_122 = arith.constant 0 : index
    %c0_123 = arith.constant 0 : index
    %163 = vector.load %arg5[%c4_121, %c0_122, %c0_123] : memref<9x16x64xbf16, #tpu.memory_space<vmem>>, vector<1x16x64xbf16>
    %164 = vector.shape_cast %163 : vector<1x16x64xbf16> to vector<16x64xbf16>
    %cst_124 = arith.constant dense<0.000000e+00> : vector<16x128xf32>
    %165 = tpu.matmul %164, %131, %cst_124 {dimension_numbers = #tpu.dot_dimension_numbers<[1], [0], [0], [1], [0, 0, 1, 1], [], []>} : vector<16x64xbf16>, vector<64x128xbf16>, vector<16x128xf32> -> vector<16x128xf32>
    %166 = arith.truncf %165 : vector<16x128xf32> to vector<16x128xbf16>
    %c4_125 = arith.constant 4 : index
    %c0_126 = arith.constant 0 : index
    %c0_127 = arith.constant 0 : index
    %167 = vector.load %arg6[%c4_125, %c0_126, %c0_127] : memref<9x128x128xbf16, #tpu.memory_space<vmem>>, vector<1x128x128xbf16>
    %168 = vector.shape_cast %167 : vector<1x128x128xbf16> to vector<128x128xbf16>
    %cst_128 = arith.constant dense<0.000000e+00> : vector<16x128xf32>
    %169 = tpu.matmul %166, %168, %cst_128 {dimension_numbers = #tpu.dot_dimension_numbers<[1], [0], [0], [1], [0, 0, 1, 1], [], []>} : vector<16x128xbf16>, vector<128x128xbf16>, vector<16x128xf32> -> vector<16x128xf32>
    %170 = arith.addf %162, %169 : vector<16x128xf32>
    %c5_129 = arith.constant 5 : index
    %c0_130 = arith.constant 0 : index
    %c0_131 = arith.constant 0 : index
    %171 = vector.load %arg5[%c5_129, %c0_130, %c0_131] : memref<9x16x64xbf16, #tpu.memory_space<vmem>>, vector<1x16x64xbf16>
    %172 = vector.shape_cast %171 : vector<1x16x64xbf16> to vector<16x64xbf16>
    %cst_132 = arith.constant dense<0.000000e+00> : vector<16x128xf32>
    %173 = tpu.matmul %172, %131, %cst_132 {dimension_numbers = #tpu.dot_dimension_numbers<[1], [0], [0], [1], [0, 0, 1, 1], [], []>} : vector<16x64xbf16>, vector<64x128xbf16>, vector<16x128xf32> -> vector<16x128xf32>
    %174 = arith.truncf %173 : vector<16x128xf32> to vector<16x128xbf16>
    %c5_133 = arith.constant 5 : index
    %c0_134 = arith.constant 0 : index
    %c0_135 = arith.constant 0 : index
    %175 = vector.load %arg6[%c5_133, %c0_134, %c0_135] : memref<9x128x128xbf16, #tpu.memory_space<vmem>>, vector<1x128x128xbf16>
    %176 = vector.shape_cast %175 : vector<1x128x128xbf16> to vector<128x128xbf16>
    %cst_136 = arith.constant dense<0.000000e+00> : vector<16x128xf32>
    %177 = tpu.matmul %174, %176, %cst_136 {dimension_numbers = #tpu.dot_dimension_numbers<[1], [0], [0], [1], [0, 0, 1, 1], [], []>} : vector<16x128xbf16>, vector<128x128xbf16>, vector<16x128xf32> -> vector<16x128xf32>
    %178 = arith.addf %170, %177 : vector<16x128xf32>
    %c6_137 = arith.constant 6 : index
    %c0_138 = arith.constant 0 : index
    %c0_139 = arith.constant 0 : index
    %179 = vector.load %arg5[%c6_137, %c0_138, %c0_139] : memref<9x16x64xbf16, #tpu.memory_space<vmem>>, vector<1x16x64xbf16>
    %180 = vector.shape_cast %179 : vector<1x16x64xbf16> to vector<16x64xbf16>
    %cst_140 = arith.constant dense<0.000000e+00> : vector<16x128xf32>
    %181 = tpu.matmul %180, %131, %cst_140 {dimension_numbers = #tpu.dot_dimension_numbers<[1], [0], [0], [1], [0, 0, 1, 1], [], []>} : vector<16x64xbf16>, vector<64x128xbf16>, vector<16x128xf32> -> vector<16x128xf32>
    %182 = arith.truncf %181 : vector<16x128xf32> to vector<16x128xbf16>
    %c6_141 = arith.constant 6 : index
    %c0_142 = arith.constant 0 : index
    %c0_143 = arith.constant 0 : index
    %183 = vector.load %arg6[%c6_141, %c0_142, %c0_143] : memref<9x128x128xbf16, #tpu.memory_space<vmem>>, vector<1x128x128xbf16>
    %184 = vector.shape_cast %183 : vector<1x128x128xbf16> to vector<128x128xbf16>
    %cst_144 = arith.constant dense<0.000000e+00> : vector<16x128xf32>
    %185 = tpu.matmul %182, %184, %cst_144 {dimension_numbers = #tpu.dot_dimension_numbers<[1], [0], [0], [1], [0, 0, 1, 1], [], []>} : vector<16x128xbf16>, vector<128x128xbf16>, vector<16x128xf32> -> vector<16x128xf32>
    %186 = arith.addf %178, %185 : vector<16x128xf32>
    %c7_145 = arith.constant 7 : index
    %c0_146 = arith.constant 0 : index
    %c0_147 = arith.constant 0 : index
    %187 = vector.load %arg5[%c7_145, %c0_146, %c0_147] : memref<9x16x64xbf16, #tpu.memory_space<vmem>>, vector<1x16x64xbf16>
    %188 = vector.shape_cast %187 : vector<1x16x64xbf16> to vector<16x64xbf16>
    %cst_148 = arith.constant dense<0.000000e+00> : vector<16x128xf32>
    %189 = tpu.matmul %188, %131, %cst_148 {dimension_numbers = #tpu.dot_dimension_numbers<[1], [0], [0], [1], [0, 0, 1, 1], [], []>} : vector<16x64xbf16>, vector<64x128xbf16>, vector<16x128xf32> -> vector<16x128xf32>
    %190 = arith.truncf %189 : vector<16x128xf32> to vector<16x128xbf16>
    %c7_149 = arith.constant 7 : index
    %c0_150 = arith.constant 0 : index
    %c0_151 = arith.constant 0 : index
    %191 = vector.load %arg6[%c7_149, %c0_150, %c0_151] : memref<9x128x128xbf16, #tpu.memory_space<vmem>>, vector<1x128x128xbf16>
    %192 = vector.shape_cast %191 : vector<1x128x128xbf16> to vector<128x128xbf16>
    %cst_152 = arith.constant dense<0.000000e+00> : vector<16x128xf32>
    %193 = tpu.matmul %190, %192, %cst_152 {dimension_numbers = #tpu.dot_dimension_numbers<[1], [0], [0], [1], [0, 0, 1, 1], [], []>} : vector<16x128xbf16>, vector<128x128xbf16>, vector<16x128xf32> -> vector<16x128xf32>
    %194 = arith.addf %186, %193 : vector<16x128xf32>
    %c8_153 = arith.constant 8 : index
    %c0_154 = arith.constant 0 : index
    %c0_155 = arith.constant 0 : index
    %195 = vector.load %arg5[%c8_153, %c0_154, %c0_155] : memref<9x16x64xbf16, #tpu.memory_space<vmem>>, vector<1x16x64xbf16>
    %196 = vector.shape_cast %195 : vector<1x16x64xbf16> to vector<16x64xbf16>
    %cst_156 = arith.constant dense<0.000000e+00> : vector<16x128xf32>
    %197 = tpu.matmul %196, %131, %cst_156 {dimension_numbers = #tpu.dot_dimension_numbers<[1], [0], [0], [1], [0, 0, 1, 1], [], []>} : vector<16x64xbf16>, vector<64x128xbf16>, vector<16x128xf32> -> vector<16x128xf32>
    %198 = arith.truncf %197 : vector<16x128xf32> to vector<16x128xbf16>
    %c8_157 = arith.constant 8 : index
    %c0_158 = arith.constant 0 : index
    %c0_159 = arith.constant 0 : index
    %199 = vector.load %arg6[%c8_157, %c0_158, %c0_159] : memref<9x128x128xbf16, #tpu.memory_space<vmem>>, vector<1x128x128xbf16>
    %200 = vector.shape_cast %199 : vector<1x128x128xbf16> to vector<128x128xbf16>
    %cst_160 = arith.constant dense<0.000000e+00> : vector<16x128xf32>
    %201 = tpu.matmul %198, %200, %cst_160 {dimension_numbers = #tpu.dot_dimension_numbers<[1], [0], [0], [1], [0, 0, 1, 1], [], []>} : vector<16x128xbf16>, vector<128x128xbf16>, vector<16x128xf32> -> vector<16x128xf32>
    %202 = arith.addf %194, %201 : vector<16x128xf32>
    %cst_161 = arith.constant dense<0.000000e+00> : vector<128xf32>
    %203 = vector.multi_reduction <add>, %202, %cst_161 [0] : vector<16x128xf32> to vector<128xf32>
    %204 = vector.shape_cast %203 : vector<128xf32> to vector<1x128xf32>
    %205 = arith.mulf %202, %202 : vector<16x128xf32>
    %cst_162 = arith.constant dense<0.000000e+00> : vector<128xf32>
    %206 = vector.multi_reduction <add>, %205, %cst_162 [0] : vector<16x128xf32> to vector<128xf32>
    %207 = vector.shape_cast %206 : vector<128xf32> to vector<1x128xf32>
    %cst_163 = arith.constant 6.250000e-02 : f32
    %208 = vector.broadcast %cst_163 : f32 to vector<1x128xf32>
    %209 = arith.mulf %204, %208 : vector<1x128xf32>
    %cst_164 = arith.constant 6.250000e-02 : f32
    %210 = vector.broadcast %cst_164 : f32 to vector<1x128xf32>
    %211 = arith.mulf %207, %210 : vector<1x128xf32>
    %212 = arith.mulf %209, %209 : vector<1x128xf32>
    %213 = arith.subf %211, %212 : vector<1x128xf32>
    %c2_165 = arith.constant 2 : index
    %c0_166 = arith.constant 0 : index
    %214 = vector.load %arg12[%c2_165, %c0_166] : memref<4x128xf32, #tpu.memory_space<vmem>>, vector<1x128xf32>
    %c2_167 = arith.constant 2 : index
    %c0_168 = arith.constant 0 : index
    %215 = vector.load %arg13[%c2_167, %c0_168] : memref<4x128xf32, #tpu.memory_space<vmem>>, vector<1x128xf32>
    %216 = vector.broadcast %209 : vector<1x128xf32> to vector<16x128xf32>
    %217 = arith.subf %202, %216 : vector<16x128xf32>
    %cst_169 = arith.constant 9.99999974E-6 : f32
    %218 = vector.broadcast %cst_169 : f32 to vector<1x128xf32>
    %219 = arith.addf %213, %218 : vector<1x128xf32>
    %220 = math.rsqrt %219 : vector<1x128xf32>
    %221 = arith.mulf %220, %214 : vector<1x128xf32>
    %222 = vector.broadcast %221 : vector<1x128xf32> to vector<16x128xf32>
    %223 = arith.mulf %217, %222 : vector<16x128xf32>
    %224 = vector.broadcast %215 : vector<1x128xf32> to vector<16x128xf32>
    %225 = arith.addf %223, %224 : vector<16x128xf32>
    %cst_170 = arith.constant 0.000000e+00 : f32
    %226 = vector.broadcast %cst_170 : f32 to vector<16x128xf32>
    %227 = arith.cmpf ogt, %225, %226 : vector<16x128xf32>
    %cst_171 = arith.constant 0.00999999977 : f32
    %228 = vector.broadcast %cst_171 : f32 to vector<16x128xf32>
    %229 = arith.mulf %228, %225 : vector<16x128xf32>
    %230 = arith.select %227, %225, %229 : vector<16x128xi1>, vector<16x128xf32>
    %231 = arith.truncf %230 : vector<16x128xf32> to vector<16x128xbf16>
    %c0_172 = arith.constant 0 : index
    %c0_173 = arith.constant 0 : index
    %c0_174 = arith.constant 0 : index
    %232 = vector.load %arg7[%c0_172, %c0_173, %c0_174] : memref<9x4x16xbf16, #tpu.memory_space<vmem>>, vector<1x4x16xbf16>
    %233 = vector.shape_cast %232 : vector<1x4x16xbf16> to vector<4x16xbf16>
    %cst_175 = arith.constant dense<0.000000e+00> : vector<4x128xf32>
    %234 = tpu.matmul %233, %231, %cst_175 {dimension_numbers = #tpu.dot_dimension_numbers<[1], [0], [0], [1], [0, 0, 1, 1], [], []>} : vector<4x16xbf16>, vector<16x128xbf16>, vector<4x128xf32> -> vector<4x128xf32>
    %235 = arith.truncf %234 : vector<4x128xf32> to vector<4x128xbf16>
    %c0_176 = arith.constant 0 : index
    %c0_177 = arith.constant 0 : index
    %c0_178 = arith.constant 0 : index
    %236 = vector.load %arg8[%c0_176, %c0_177, %c0_178] : memref<9x128x128xbf16, #tpu.memory_space<vmem>>, vector<1x128x128xbf16>
    %237 = vector.shape_cast %236 : vector<1x128x128xbf16> to vector<128x128xbf16>
    %cst_179 = arith.constant dense<0.000000e+00> : vector<4x128xf32>
    %238 = tpu.matmul %235, %237, %cst_179 {dimension_numbers = #tpu.dot_dimension_numbers<[1], [0], [0], [1], [0, 0, 1, 1], [], []>} : vector<4x128xbf16>, vector<128x128xbf16>, vector<4x128xf32> -> vector<4x128xf32>
    %c1_180 = arith.constant 1 : index
    %c0_181 = arith.constant 0 : index
    %c0_182 = arith.constant 0 : index
    %239 = vector.load %arg7[%c1_180, %c0_181, %c0_182] : memref<9x4x16xbf16, #tpu.memory_space<vmem>>, vector<1x4x16xbf16>
    %240 = vector.shape_cast %239 : vector<1x4x16xbf16> to vector<4x16xbf16>
    %cst_183 = arith.constant dense<0.000000e+00> : vector<4x128xf32>
    %241 = tpu.matmul %240, %231, %cst_183 {dimension_numbers = #tpu.dot_dimension_numbers<[1], [0], [0], [1], [0, 0, 1, 1], [], []>} : vector<4x16xbf16>, vector<16x128xbf16>, vector<4x128xf32> -> vector<4x128xf32>
    %242 = arith.truncf %241 : vector<4x128xf32> to vector<4x128xbf16>
    %c1_184 = arith.constant 1 : index
    %c0_185 = arith.constant 0 : index
    %c0_186 = arith.constant 0 : index
    %243 = vector.load %arg8[%c1_184, %c0_185, %c0_186] : memref<9x128x128xbf16, #tpu.memory_space<vmem>>, vector<1x128x128xbf16>
    %244 = vector.shape_cast %243 : vector<1x128x128xbf16> to vector<128x128xbf16>
    %cst_187 = arith.constant dense<0.000000e+00> : vector<4x128xf32>
    %245 = tpu.matmul %242, %244, %cst_187 {dimension_numbers = #tpu.dot_dimension_numbers<[1], [0], [0], [1], [0, 0, 1, 1], [], []>} : vector<4x128xbf16>, vector<128x128xbf16>, vector<4x128xf32> -> vector<4x128xf32>
    %246 = arith.addf %238, %245 : vector<4x128xf32>
    %c2_188 = arith.constant 2 : index
    %c0_189 = arith.constant 0 : index
    %c0_190 = arith.constant 0 : index
    %247 = vector.load %arg7[%c2_188, %c0_189, %c0_190] : memref<9x4x16xbf16, #tpu.memory_space<vmem>>, vector<1x4x16xbf16>
    %248 = vector.shape_cast %247 : vector<1x4x16xbf16> to vector<4x16xbf16>
    %cst_191 = arith.constant dense<0.000000e+00> : vector<4x128xf32>
    %249 = tpu.matmul %248, %231, %cst_191 {dimension_numbers = #tpu.dot_dimension_numbers<[1], [0], [0], [1], [0, 0, 1, 1], [], []>} : vector<4x16xbf16>, vector<16x128xbf16>, vector<4x128xf32> -> vector<4x128xf32>
    %250 = arith.truncf %249 : vector<4x128xf32> to vector<4x128xbf16>
    %c2_192 = arith.constant 2 : index
    %c0_193 = arith.constant 0 : index
    %c0_194 = arith.constant 0 : index
    %251 = vector.load %arg8[%c2_192, %c0_193, %c0_194] : memref<9x128x128xbf16, #tpu.memory_space<vmem>>, vector<1x128x128xbf16>
    %252 = vector.shape_cast %251 : vector<1x128x128xbf16> to vector<128x128xbf16>
    %cst_195 = arith.constant dense<0.000000e+00> : vector<4x128xf32>
    %253 = tpu.matmul %250, %252, %cst_195 {dimension_numbers = #tpu.dot_dimension_numbers<[1], [0], [0], [1], [0, 0, 1, 1], [], []>} : vector<4x128xbf16>, vector<128x128xbf16>, vector<4x128xf32> -> vector<4x128xf32>
    %254 = arith.addf %246, %253 : vector<4x128xf32>
    %c3_196 = arith.constant 3 : index
    %c0_197 = arith.constant 0 : index
    %c0_198 = arith.constant 0 : index
    %255 = vector.load %arg7[%c3_196, %c0_197, %c0_198] : memref<9x4x16xbf16, #tpu.memory_space<vmem>>, vector<1x4x16xbf16>
    %256 = vector.shape_cast %255 : vector<1x4x16xbf16> to vector<4x16xbf16>
    %cst_199 = arith.constant dense<0.000000e+00> : vector<4x128xf32>
    %257 = tpu.matmul %256, %231, %cst_199 {dimension_numbers = #tpu.dot_dimension_numbers<[1], [0], [0], [1], [0, 0, 1, 1], [], []>} : vector<4x16xbf16>, vector<16x128xbf16>, vector<4x128xf32> -> vector<4x128xf32>
    %258 = arith.truncf %257 : vector<4x128xf32> to vector<4x128xbf16>
    %c3_200 = arith.constant 3 : index
    %c0_201 = arith.constant 0 : index
    %c0_202 = arith.constant 0 : index
    %259 = vector.load %arg8[%c3_200, %c0_201, %c0_202] : memref<9x128x128xbf16, #tpu.memory_space<vmem>>, vector<1x128x128xbf16>
    %260 = vector.shape_cast %259 : vector<1x128x128xbf16> to vector<128x128xbf16>
    %cst_203 = arith.constant dense<0.000000e+00> : vector<4x128xf32>
    %261 = tpu.matmul %258, %260, %cst_203 {dimension_numbers = #tpu.dot_dimension_numbers<[1], [0], [0], [1], [0, 0, 1, 1], [], []>} : vector<4x128xbf16>, vector<128x128xbf16>, vector<4x128xf32> -> vector<4x128xf32>
    %262 = arith.addf %254, %261 : vector<4x128xf32>
    %c4_204 = arith.constant 4 : index
    %c0_205 = arith.constant 0 : index
    %c0_206 = arith.constant 0 : index
    %263 = vector.load %arg7[%c4_204, %c0_205, %c0_206] : memref<9x4x16xbf16, #tpu.memory_space<vmem>>, vector<1x4x16xbf16>
    %264 = vector.shape_cast %263 : vector<1x4x16xbf16> to vector<4x16xbf16>
    %cst_207 = arith.constant dense<0.000000e+00> : vector<4x128xf32>
    %265 = tpu.matmul %264, %231, %cst_207 {dimension_numbers = #tpu.dot_dimension_numbers<[1], [0], [0], [1], [0, 0, 1, 1], [], []>} : vector<4x16xbf16>, vector<16x128xbf16>, vector<4x128xf32> -> vector<4x128xf32>
    %266 = arith.truncf %265 : vector<4x128xf32> to vector<4x128xbf16>
    %c4_208 = arith.constant 4 : index
    %c0_209 = arith.constant 0 : index
    %c0_210 = arith.constant 0 : index
    %267 = vector.load %arg8[%c4_208, %c0_209, %c0_210] : memref<9x128x128xbf16, #tpu.memory_space<vmem>>, vector<1x128x128xbf16>
    %268 = vector.shape_cast %267 : vector<1x128x128xbf16> to vector<128x128xbf16>
    %cst_211 = arith.constant dense<0.000000e+00> : vector<4x128xf32>
    %269 = tpu.matmul %266, %268, %cst_211 {dimension_numbers = #tpu.dot_dimension_numbers<[1], [0], [0], [1], [0, 0, 1, 1], [], []>} : vector<4x128xbf16>, vector<128x128xbf16>, vector<4x128xf32> -> vector<4x128xf32>
    %270 = arith.addf %262, %269 : vector<4x128xf32>
    %c5_212 = arith.constant 5 : index
    %c0_213 = arith.constant 0 : index
    %c0_214 = arith.constant 0 : index
    %271 = vector.load %arg7[%c5_212, %c0_213, %c0_214] : memref<9x4x16xbf16, #tpu.memory_space<vmem>>, vector<1x4x16xbf16>
    %272 = vector.shape_cast %271 : vector<1x4x16xbf16> to vector<4x16xbf16>
    %cst_215 = arith.constant dense<0.000000e+00> : vector<4x128xf32>
    %273 = tpu.matmul %272, %231, %cst_215 {dimension_numbers = #tpu.dot_dimension_numbers<[1], [0], [0], [1], [0, 0, 1, 1], [], []>} : vector<4x16xbf16>, vector<16x128xbf16>, vector<4x128xf32> -> vector<4x128xf32>
    %274 = arith.truncf %273 : vector<4x128xf32> to vector<4x128xbf16>
    %c5_216 = arith.constant 5 : index
    %c0_217 = arith.constant 0 : index
    %c0_218 = arith.constant 0 : index
    %275 = vector.load %arg8[%c5_216, %c0_217, %c0_218] : memref<9x128x128xbf16, #tpu.memory_space<vmem>>, vector<1x128x128xbf16>
    %276 = vector.shape_cast %275 : vector<1x128x128xbf16> to vector<128x128xbf16>
    %cst_219 = arith.constant dense<0.000000e+00> : vector<4x128xf32>
    %277 = tpu.matmul %274, %276, %cst_219 {dimension_numbers = #tpu.dot_dimension_numbers<[1], [0], [0], [1], [0, 0, 1, 1], [], []>} : vector<4x128xbf16>, vector<128x128xbf16>, vector<4x128xf32> -> vector<4x128xf32>
    %278 = arith.addf %270, %277 : vector<4x128xf32>
    %c6_220 = arith.constant 6 : index
    %c0_221 = arith.constant 0 : index
    %c0_222 = arith.constant 0 : index
    %279 = vector.load %arg7[%c6_220, %c0_221, %c0_222] : memref<9x4x16xbf16, #tpu.memory_space<vmem>>, vector<1x4x16xbf16>
    %280 = vector.shape_cast %279 : vector<1x4x16xbf16> to vector<4x16xbf16>
    %cst_223 = arith.constant dense<0.000000e+00> : vector<4x128xf32>
    %281 = tpu.matmul %280, %231, %cst_223 {dimension_numbers = #tpu.dot_dimension_numbers<[1], [0], [0], [1], [0, 0, 1, 1], [], []>} : vector<4x16xbf16>, vector<16x128xbf16>, vector<4x128xf32> -> vector<4x128xf32>
    %282 = arith.truncf %281 : vector<4x128xf32> to vector<4x128xbf16>
    %c6_224 = arith.constant 6 : index
    %c0_225 = arith.constant 0 : index
    %c0_226 = arith.constant 0 : index
    %283 = vector.load %arg8[%c6_224, %c0_225, %c0_226] : memref<9x128x128xbf16, #tpu.memory_space<vmem>>, vector<1x128x128xbf16>
    %284 = vector.shape_cast %283 : vector<1x128x128xbf16> to vector<128x128xbf16>
    %cst_227 = arith.constant dense<0.000000e+00> : vector<4x128xf32>
    %285 = tpu.matmul %282, %284, %cst_227 {dimension_numbers = #tpu.dot_dimension_numbers<[1], [0], [0], [1], [0, 0, 1, 1], [], []>} : vector<4x128xbf16>, vector<128x128xbf16>, vector<4x128xf32> -> vector<4x128xf32>
    %286 = arith.addf %278, %285 : vector<4x128xf32>
    %c7_228 = arith.constant 7 : index
    %c0_229 = arith.constant 0 : index
    %c0_230 = arith.constant 0 : index
    %287 = vector.load %arg7[%c7_228, %c0_229, %c0_230] : memref<9x4x16xbf16, #tpu.memory_space<vmem>>, vector<1x4x16xbf16>
    %288 = vector.shape_cast %287 : vector<1x4x16xbf16> to vector<4x16xbf16>
    %cst_231 = arith.constant dense<0.000000e+00> : vector<4x128xf32>
    %289 = tpu.matmul %288, %231, %cst_231 {dimension_numbers = #tpu.dot_dimension_numbers<[1], [0], [0], [1], [0, 0, 1, 1], [], []>} : vector<4x16xbf16>, vector<16x128xbf16>, vector<4x128xf32> -> vector<4x128xf32>
    %290 = arith.truncf %289 : vector<4x128xf32> to vector<4x128xbf16>
    %c7_232 = arith.constant 7 : index
    %c0_233 = arith.constant 0 : index
    %c0_234 = arith.constant 0 : index
    %291 = vector.load %arg8[%c7_232, %c0_233, %c0_234] : memref<9x128x128xbf16, #tpu.memory_space<vmem>>, vector<1x128x128xbf16>
    %292 = vector.shape_cast %291 : vector<1x128x128xbf16> to vector<128x128xbf16>
    %cst_235 = arith.constant dense<0.000000e+00> : vector<4x128xf32>
    %293 = tpu.matmul %290, %292, %cst_235 {dimension_numbers = #tpu.dot_dimension_numbers<[1], [0], [0], [1], [0, 0, 1, 1], [], []>} : vector<4x128xbf16>, vector<128x128xbf16>, vector<4x128xf32> -> vector<4x128xf32>
    %294 = arith.addf %286, %293 : vector<4x128xf32>
    %c8_236 = arith.constant 8 : index
    %c0_237 = arith.constant 0 : index
    %c0_238 = arith.constant 0 : index
    %295 = vector.load %arg7[%c8_236, %c0_237, %c0_238] : memref<9x4x16xbf16, #tpu.memory_space<vmem>>, vector<1x4x16xbf16>
    %296 = vector.shape_cast %295 : vector<1x4x16xbf16> to vector<4x16xbf16>
    %cst_239 = arith.constant dense<0.000000e+00> : vector<4x128xf32>
    %297 = tpu.matmul %296, %231, %cst_239 {dimension_numbers = #tpu.dot_dimension_numbers<[1], [0], [0], [1], [0, 0, 1, 1], [], []>} : vector<4x16xbf16>, vector<16x128xbf16>, vector<4x128xf32> -> vector<4x128xf32>
    %298 = arith.truncf %297 : vector<4x128xf32> to vector<4x128xbf16>
    %c8_240 = arith.constant 8 : index
    %c0_241 = arith.constant 0 : index
    %c0_242 = arith.constant 0 : index
    %299 = vector.load %arg8[%c8_240, %c0_241, %c0_242] : memref<9x128x128xbf16, #tpu.memory_space<vmem>>, vector<1x128x128xbf16>
    %300 = vector.shape_cast %299 : vector<1x128x128xbf16> to vector<128x128xbf16>
    %cst_243 = arith.constant dense<0.000000e+00> : vector<4x128xf32>
    %301 = tpu.matmul %298, %300, %cst_243 {dimension_numbers = #tpu.dot_dimension_numbers<[1], [0], [0], [1], [0, 0, 1, 1], [], []>} : vector<4x128xbf16>, vector<128x128xbf16>, vector<4x128xf32> -> vector<4x128xf32>
    %302 = arith.addf %294, %301 : vector<4x128xf32>
    %cst_244 = arith.constant dense<0.000000e+00> : vector<128xf32>
    %303 = vector.multi_reduction <add>, %302, %cst_244 [0] : vector<4x128xf32> to vector<128xf32>
    %304 = vector.shape_cast %303 : vector<128xf32> to vector<1x128xf32>
    %305 = arith.mulf %302, %302 : vector<4x128xf32>
    %cst_245 = arith.constant dense<0.000000e+00> : vector<128xf32>
    %306 = vector.multi_reduction <add>, %305, %cst_245 [0] : vector<4x128xf32> to vector<128xf32>
    %307 = vector.shape_cast %306 : vector<128xf32> to vector<1x128xf32>
    %cst_246 = arith.constant 2.500000e-01 : f32
    %308 = vector.broadcast %cst_246 : f32 to vector<1x128xf32>
    %309 = arith.mulf %304, %308 : vector<1x128xf32>
    %cst_247 = arith.constant 2.500000e-01 : f32
    %310 = vector.broadcast %cst_247 : f32 to vector<1x128xf32>
    %311 = arith.mulf %307, %310 : vector<1x128xf32>
    %312 = arith.mulf %309, %309 : vector<1x128xf32>
    %313 = arith.subf %311, %312 : vector<1x128xf32>
    %c3_248 = arith.constant 3 : index
    %c0_249 = arith.constant 0 : index
    %314 = vector.load %arg12[%c3_248, %c0_249] : memref<4x128xf32, #tpu.memory_space<vmem>>, vector<1x128xf32>
    %c3_250 = arith.constant 3 : index
    %c0_251 = arith.constant 0 : index
    %315 = vector.load %arg13[%c3_250, %c0_251] : memref<4x128xf32, #tpu.memory_space<vmem>>, vector<1x128xf32>
    %316 = vector.broadcast %309 : vector<1x128xf32> to vector<4x128xf32>
    %317 = arith.subf %302, %316 : vector<4x128xf32>
    %cst_252 = arith.constant 9.99999974E-6 : f32
    %318 = vector.broadcast %cst_252 : f32 to vector<1x128xf32>
    %319 = arith.addf %313, %318 : vector<1x128xf32>
    %320 = math.rsqrt %319 : vector<1x128xf32>
    %321 = arith.mulf %320, %314 : vector<1x128xf32>
    %322 = vector.broadcast %321 : vector<1x128xf32> to vector<4x128xf32>
    %323 = arith.mulf %317, %322 : vector<4x128xf32>
    %324 = vector.broadcast %315 : vector<1x128xf32> to vector<4x128xf32>
    %325 = arith.addf %323, %324 : vector<4x128xf32>
    %cst_253 = arith.constant 0.000000e+00 : f32
    %326 = vector.broadcast %cst_253 : f32 to vector<4x128xf32>
    %327 = arith.cmpf ogt, %325, %326 : vector<4x128xf32>
    %cst_254 = arith.constant 0.00999999977 : f32
    %328 = vector.broadcast %cst_254 : f32 to vector<4x128xf32>
    %329 = arith.mulf %328, %325 : vector<4x128xf32>
    %330 = arith.select %327, %325, %329 : vector<4x128xi1>, vector<4x128xf32>
    %331 = arith.truncf %330 : vector<4x128xf32> to vector<4x128xbf16>
    %c0_255 = arith.constant 0 : index
    %c0_256 = arith.constant 0 : index
    %c0_257 = arith.constant 0 : index
    %332 = vector.load %arg9[%c0_255, %c0_256, %c0_257] : memref<2x2x4xbf16, #tpu.memory_space<vmem>>, vector<1x2x4xbf16>
    %333 = vector.shape_cast %332 : vector<1x2x4xbf16> to vector<2x4xbf16>
    %cst_258 = arith.constant dense<0.000000e+00> : vector<2x128xf32>
    %334 = tpu.matmul %333, %331, %cst_258 {dimension_numbers = #tpu.dot_dimension_numbers<[1], [0], [0], [1], [0, 0, 1, 1], [], []>} : vector<2x4xbf16>, vector<4x128xbf16>, vector<2x128xf32> -> vector<2x128xf32>
    %335 = arith.truncf %334 : vector<2x128xf32> to vector<2x128xbf16>
    %c0_259 = arith.constant 0 : index
    %c0_260 = arith.constant 0 : index
    %c0_261 = arith.constant 0 : index
    %336 = vector.load %arg10[%c0_259, %c0_260, %c0_261] : memref<2x128x128xbf16, #tpu.memory_space<vmem>>, vector<1x128x128xbf16>
    %337 = vector.shape_cast %336 : vector<1x128x128xbf16> to vector<128x128xbf16>
    %cst_262 = arith.constant dense<0.000000e+00> : vector<2x128xf32>
    %338 = tpu.matmul %335, %337, %cst_262 {dimension_numbers = #tpu.dot_dimension_numbers<[1], [0], [0], [1], [0, 0, 1, 1], [], []>} : vector<2x128xbf16>, vector<128x128xbf16>, vector<2x128xf32> -> vector<2x128xf32>
    %c1_263 = arith.constant 1 : index
    %c0_264 = arith.constant 0 : index
    %c0_265 = arith.constant 0 : index
    %339 = vector.load %arg9[%c1_263, %c0_264, %c0_265] : memref<2x2x4xbf16, #tpu.memory_space<vmem>>, vector<1x2x4xbf16>
    %340 = vector.shape_cast %339 : vector<1x2x4xbf16> to vector<2x4xbf16>
    %cst_266 = arith.constant dense<0.000000e+00> : vector<2x128xf32>
    %341 = tpu.matmul %340, %331, %cst_266 {dimension_numbers = #tpu.dot_dimension_numbers<[1], [0], [0], [1], [0, 0, 1, 1], [], []>} : vector<2x4xbf16>, vector<4x128xbf16>, vector<2x128xf32> -> vector<2x128xf32>
    %342 = arith.truncf %341 : vector<2x128xf32> to vector<2x128xbf16>
    %c1_267 = arith.constant 1 : index
    %c0_268 = arith.constant 0 : index
    %c0_269 = arith.constant 0 : index
    %343 = vector.load %arg10[%c1_267, %c0_268, %c0_269] : memref<2x128x128xbf16, #tpu.memory_space<vmem>>, vector<1x128x128xbf16>
    %344 = vector.shape_cast %343 : vector<1x128x128xbf16> to vector<128x128xbf16>
    %cst_270 = arith.constant dense<0.000000e+00> : vector<2x128xf32>
    %345 = tpu.matmul %342, %344, %cst_270 {dimension_numbers = #tpu.dot_dimension_numbers<[1], [0], [0], [1], [0, 0, 1, 1], [], []>} : vector<2x128xbf16>, vector<128x128xbf16>, vector<2x128xf32> -> vector<2x128xf32>
    %346 = arith.addf %338, %345 : vector<2x128xf32>
    %c0_271 = arith.constant 0 : index
    %c0_272 = arith.constant 0 : index
    %347 = vector.load %arg11[%c0_271, %c0_272] : memref<1x128xf32, #tpu.memory_space<vmem>>, vector<1x128xf32>
    %348 = vector.broadcast %347 : vector<1x128xf32> to vector<2x128xf32>
    %349 = arith.addf %346, %348 : vector<2x128xf32>
    %c0_273 = arith.constant 0 : index
    %c0_274 = arith.constant 0 : index
    %350 = vector.load %arg14[%c0_273, %c0_274] : memref<2x128xf32, #tpu.memory_space<vmem>>, vector<2x128xf32>
    tpu.vector_store %arg14[%c0_273, %c0_274], %349 {strides = array<i32>} : memref<2x128xf32, #tpu.memory_space<vmem>>, vector<2x128xf32>,
    return
  }
  func.func @transform_0(%arg0: i32) -> (i32, i32) {
    %c0_i32 = arith.constant 0 : i32
    %c0_i32_0 = arith.constant 0 : i32
    %c0_i32_1 = arith.constant 0 : i32
    return %c0_i32, %c0_i32_0 : i32, i32
  }
  func.func @transform_1(%arg0: i32) -> (i32, i32) {
    %c0_i32 = arith.constant 0 : i32
    %c0_i32_0 = arith.constant 0 : i32
    %c0_i32_1 = arith.constant 0 : i32
    return %c0_i32, %c0_i32_0 : i32, i32
  }
  func.func @transform_2(%arg0: i32) -> (i32, i32, i32) {
    %c0_i32 = arith.constant 0 : i32
    %c0_i32_0 = arith.constant 0 : i32
    %c0_i32_1 = arith.constant 0 : i32
    %c0_i32_2 = arith.constant 0 : i32
    return %c0_i32, %c0_i32_0, %c0_i32_1 : i32, i32, i32
  }
  func.func @transform_3(%arg0: i32) -> (i32, i32, i32) {
    %c0_i32 = arith.constant 0 : i32
    %c0_i32_0 = arith.constant 0 : i32
    %c0_i32_1 = arith.constant 0 : i32
    %c0_i32_2 = arith.constant 0 : i32
    return %c0_i32, %c0_i32_0, %c0_i32_1 : i32, i32, i32
  }
  func.func @transform_4(%arg0: i32) -> (i32, i32, i32) {
    %c0_i32 = arith.constant 0 : i32
    %c0_i32_0 = arith.constant 0 : i32
    %c0_i32_1 = arith.constant 0 : i32
    %c0_i32_2 = arith.constant 0 : i32
    return %c0_i32, %c0_i32_0, %c0_i32_1 : i32, i32, i32
  }
  func.func @transform_5(%arg0: i32) -> (i32, i32, i32) {
    %c0_i32 = arith.constant 0 : i32
    %c0_i32_0 = arith.constant 0 : i32
    %c0_i32_1 = arith.constant 0 : i32
    %c0_i32_2 = arith.constant 0 : i32
    return %c0_i32, %c0_i32_0, %c0_i32_1 : i32, i32, i32
  }
  func.func @transform_6(%arg0: i32) -> (i32, i32, i32) {
    %c0_i32 = arith.constant 0 : i32
    %c0_i32_0 = arith.constant 0 : i32
    %c0_i32_1 = arith.constant 0 : i32
    %c0_i32_2 = arith.constant 0 : i32
    return %c0_i32, %c0_i32_0, %c0_i32_1 : i32, i32, i32
  }
  func.func @transform_7(%arg0: i32) -> (i32, i32, i32) {
    %c0_i32 = arith.constant 0 : i32
    %c0_i32_0 = arith.constant 0 : i32
    %c0_i32_1 = arith.constant 0 : i32
    %c0_i32_2 = arith.constant 0 : i32
    return %c0_i32, %c0_i32_0, %c0_i32_1 : i32, i32, i32
  }
  func.func @transform_8(%arg0: i32) -> (i32, i32, i32) {
    %c0_i32 = arith.constant 0 : i32
    %c0_i32_0 = arith.constant 0 : i32
    %c0_i32_1 = arith.constant 0 : i32
    %c0_i32_2 = arith.constant 0 : i32
    return %c0_i32, %c0_i32_0, %c0_i32_1 : i32, i32, i32
  }
  func.func @transform_9(%arg0: i32) -> (i32, i32, i32) {
    %c0_i32 = arith.constant 0 : i32
    %c0_i32_0 = arith.constant 0 : i32
    %c0_i32_1 = arith.constant 0 : i32
    %c0_i32_2 = arith.constant 0 : i32
    return %c0_i32, %c0_i32_0, %c0_i32_1 : i32, i32, i32
  }
  func.func @transform_10(%arg0: i32) -> (i32, i32) {
    %c0_i32 = arith.constant 0 : i32
    %c0_i32_0 = arith.constant 0 : i32
    %c0_i32_1 = arith.constant 0 : i32
    return %c0_i32, %c0_i32_0 : i32, i32
  }
  func.func @transform_11(%arg0: i32) -> (i32, i32) {
    %c0_i32 = arith.constant 0 : i32
    %c0_i32_0 = arith.constant 0 : i32
    %c0_i32_1 = arith.constant 0 : i32
    return %c0_i32, %c0_i32_0 : i32, i32
  }
  func.func @transform_12(%arg0: i32) -> (i32, i32) {
    %c0_i32 = arith.constant 0 : i32
    %c0_i32_0 = arith.constant 0 : i32
    %c0_i32_1 = arith.constant 0 : i32
    return %c0_i32, %c0_i32_0 : i32, i32
  }
  func.func @transform_13(%arg0: i32) -> (i32, i32) {
    %c0_i32 = arith.constant 0 : i32
    %c0_i32_0 = arith.constant 0 : i32
    %c0_i32_1 = arith.constant 0 : i32
    return %c0_i32, %c0_i32_0 : i32, i32
  }
}

</mosaic_0001>

<bundles_post_ra>
// kernel: tpu_custom_call.1
= control target key start
LH: loop header
LB: loop body
LE: loop exit
PB: predicated region body
PF: predicated region fallthrough
CT: control target
= control target key end

     0   :  { %18 = vsyncpa [#allocation3], 0  ;;  %s10481_s0 = inlined_call_operand.vmem [shape: bf16[256,9], index: 0, kind: input, shape index: {}]   ;;  %s10482_s1 = inlined_call_operand.vmem [shape: bf16[9,128], index: 1, kind: input, shape index: {}]   ;;  %s10483_s2 = inlined_call_operand.hbm [shape: bf16[9,64,256], index: 2, kind: input, shape index: {}]   ;;  %s10484_s3 = inlined_call_operand.hbm [shape: bf16[9,128,128], index: 3, kind: input, shape index: {}]   ;;  %s10485_s4 = inlined_call_operand.hbm [shape: bf16[9,16,64], index: 4, kind: input, shape index: {}]   ;;  %s10486_s5 = inlined_call_operand.hbm [shape: bf16[9,128,128], index: 5, kind: input, shape index: {}]   ;;  %s10487_s6 = inlined_call_operand.vmem [shape: bf16[9,4,16], index: 6, kind: input, shape index: {}]   ;;  %s10488_s7 = inlined_call_operand.hbm [shape: bf16[9,128,128], index: 7, kind: input, shape index: {}]   ;;  %s10489_s8 = inlined_call_operand.vmem [shape: bf16[2,2,4], index: 8, kind: input, shape index: {}]   ;;  %s10490_s9 = inlined_call_operand.vmem [shape: bf16[2,128,128], index: 9, kind: input, shape index: {}]   ;;  %s10491_s10 = inlined_call_operand.vmem [shape: f32[1,128], index: 10, kind: input, shape index: {}]   ;;  %s10492_s11 = inlined_call_operand.vmem [shape: f32[4,128], index: 11, kind: input, shape index: {}]   ;;  %s10493_s12 = inlined_call_operand.vmem [shape: f32[4,128], index: 12, kind: input, shape index: {}]   ;;  %s10494_s13 = inlined_call_operand.hbm [shape: f32[2,128], index: 13, kind: output, shape index: {}]  }
   0x1   :  { %19 = vsyncpa [#allocation6], 0 }
   0x2   :  { %20 = vsyncpa [#allocation9], 0 }
   0x3   :  { %21 = vsyncpa [#allocation4], 0  ;;  %s9004_s25 = smov [#allocation5]   ;;  %s8864_s29 = scalar_lea.hbm %s10484_s3, 9216 }
   0x4   :  { %s43_s26 = sshll.u32 %s9004_s25, 4  ;;  %p8865_p0 = scmp.ne.s32.totalorder %s10484_s3, %s8864_s29  ;;  %s44_s26 = int_to_ptr.vmem [resolvable:$true] %s43_s26 }
   0x5   :  { %p8868_p1 = scmp.lt.u32.totalorder %s8864_s29, %s10484_s3 }
   0x7   :  { %p8870_p2 = pnand %p8868_p1, %p8865_p0 }
   0x9   :  { %8873 = shalt.err (!%p8870_p2)
}
   0xa   :  { %s8874_s17 = scalar_lea.vmem %s44_s26, 9216  ;;  %p8879_p4 = scmp.lt.s32.totalorder %s44_s26, %s44_s26 }
   0xb   :  { %p8875_p3 = scmp.ne.s32.totalorder %s44_s26, %s8874_s17  ;;  %p8880_p5 = scmp.lt.s32.totalorder %s8874_s17, %s8874_s17 }
   0xd   :  { %p8881_p6 = por %p8880_p5, %p8879_p4 }
   0xf   :  { %p8882_p7 = pnand %p8881_p6, %p8875_p3 }
  0x11   :  { %8885 = shalt.err (!%p8882_p7)
}
  0x12   :  { %s9005_s18 = smov 64   ;;  %s9006_s19 = smov 4  }
  0x13   :  { %49 = dma.hbm_to_vmem [thread:$0]  %s10484_s3, 9216, %s44_s26, [#allocation6], %s9005_s18, %s9005_s18, %s9006_s19  }
  0x14   :  { %s9007_s22 = smov [#allocation8]   ;;  %s9008_s24 = smov [#allocation2]  }
  0x15   :  { %s67_s23 = sshll.u32 %s9007_s22, 4  ;;  %s31_s25 = sshll.u32 %s9008_s24, 4  ;;  %s68_s23 = int_to_ptr.vmem [resolvable:$true] %s67_s23  ;;  %s32_s25 = int_to_ptr.vmem [resolvable:$true] %s31_s25 }
  0x16   :  { %s8886_s29 = scalar_lea.hbm %s10486_s5, 9216 }
  0x17   :  { %p8887_p8 = scmp.ne.s32.totalorder %s10486_s5, %s8886_s29  ;;  %p8890_p9 = scmp.lt.u32.totalorder %s8886_s29, %s10486_s5 }
  0x19   :  { %p8892_p10 = pnand %p8890_p9, %p8887_p8 }
  0x1b   :  { %8895 = shalt.err (!%p8892_p10)
}
  0x1c   :  { %s8896_s3 = scalar_lea.vmem %s68_s23, 9216  ;;  %p8901_p12 = scmp.lt.s32.totalorder %s68_s23, %s68_s23 }
  0x1d   :  { %p8897_p11 = scmp.ne.s32.totalorder %s68_s23, %s8896_s3  ;;  %p8902_p13 = scmp.lt.s32.totalorder %s8896_s3, %s8896_s3 }
  0x1f   :  { %p8903_p0 = por %p8902_p13, %p8901_p12 }
  0x21   :  { %p8904_p1 = pnand %p8903_p0, %p8897_p11 }
  0x23   :  { %8907 = shalt.err (!%p8904_p1)
}
  0x24   :  { %73 = dma.hbm_to_vmem [thread:$0]  %s10486_s5, 9216, %s68_s23, [#allocation9], %s9005_s18, %s9005_s18, %s9006_s19  }
  0x25   :  { %s8908_s22 = scalar_lea.hbm %s10483_s2, 9216 }
  0x26   :  { %p8909_p2 = scmp.ne.s32.totalorder %s10483_s2, %s8908_s22  ;;  %p8912_p3 = scmp.lt.u32.totalorder %s8908_s22, %s10483_s2 }
  0x28   :  { %p8914_p4 = pnand %p8912_p3, %p8909_p2 }
  0x2a   :  { %8917 = shalt.err (!%p8914_p4)
}
  0x2b   :  { %s8918_s30 = scalar_lea.vmem %s32_s25, 9216  ;;  %p8923_p6 = scmp.lt.s32.totalorder %s32_s25, %s32_s25 }
  0x2c   :  { %p8919_p5 = scmp.ne.s32.totalorder %s32_s25, %s8918_s30  ;;  %p8924_p7 = scmp.lt.s32.totalorder %s8918_s30, %s8918_s30 }
  0x2e   :  { %p8925_p8 = por %p8924_p7, %p8923_p6 }
  0x30   :  { %p8926_p9 = pnand %p8925_p8, %p8919_p5 }
  0x32   :  { %8929 = shalt.err (!%p8926_p9)
}
  0x33   :  { %s9009_s5 = smov 128   ;;  %s9010_s23 = smov 8  }
  0x34   :  { %37 = dma.hbm_to_vmem [thread:$0]  %s10483_s2, 9216, %s32_s25, [#allocation3], %s9009_s5, %s9009_s5, %s9010_s23  }
  0x35   :  { %s9011_s16 = smov [#allocation7]   ;;  %s9012_s26 = smov [#allocation10]  }
  0x36   :  { %s55_s3 = sshll.u32 %s9011_s16, 4  ;;  %s81_s17 = sshll.u32 %s9012_s26, 4  ;;  %s56_s3 = int_to_ptr.vmem [resolvable:$true] %s55_s3  ;;  %s82_s17 = int_to_ptr.vmem [resolvable:$true] %s81_s17 }
  0x37   :  { %s8930_s22 = scalar_lea.hbm %s10485_s4, 1152 }
  0x38   :  { %p8931_p10 = scmp.ne.s32.totalorder %s10485_s4, %s8930_s22  ;;  %p8934_p11 = scmp.lt.u32.totalorder %s8930_s22, %s10485_s4 }
  0x3a   :  { %p8936_p12 = pnand %p8934_p11, %p8931_p10 }
  0x3c   :  { %8939 = shalt.err (!%p8936_p12)
}
  0x3d   :  { %s8940_s2 = scalar_lea.vmem %s56_s3, 1152  ;;  %p8945_p0 = scmp.lt.s32.totalorder %s56_s3, %s56_s3 }
  0x3e   :  { %p8941_p13 = scmp.ne.s32.totalorder %s56_s3, %s8940_s2  ;;  %p8946_p1 = scmp.lt.s32.totalorder %s8940_s2, %s8940_s2 }
  0x40   :  { %p8947_p2 = por %p8946_p1, %p8945_p0 }
  0x42   :  { %p8948_p3 = pnand %p8947_p2, %p8941_p13 }
  0x44   :  { %8951 = shalt.err (!%p8948_p3)
}
  0x45   :  { %61 = dma.hbm_to_vmem [thread:$0]  %s10485_s4, 1152, %s56_s3, [#allocation6], %s9005_s18, %s9005_s18, %s9006_s19  }
  0x46   :  { %s8952_s14 = scalar_lea.hbm %s10488_s7, 9216 }
  0x47   :  { %p8953_p4 = scmp.ne.s32.totalorder %s10488_s7, %s8952_s14  ;;  %p8956_p5 = scmp.lt.u32.totalorder %s8952_s14, %s10488_s7 }
  0x49   :  { %p8958_p6 = pnand %p8956_p5, %p8953_p4 }
  0x4b   :  { %8961 = shalt.err (!%p8958_p6)
}
  0x4c   :  { %s8962_s21 = scalar_lea.vmem %s82_s17, 9216  ;;  %p8967_p8 = scmp.lt.s32.totalorder %s82_s17, %s82_s17 }
  0x4d   :  { %p8963_p7 = scmp.ne.s32.totalorder %s82_s17, %s8962_s21  ;;  %p8968_p9 = scmp.lt.s32.totalorder %s8962_s21, %s8962_s21 }
  0x4f   :  { %p8969_p10 = por %p8968_p9, %p8967_p8 }
  0x51   :  { %p8970_p11 = pnand %p8969_p10, %p8963_p7 }
  0x53   :  { %8973 = shalt.err (!%p8970_p11)
}
  0x54   :  { %87 = dma.hbm_to_vmem [thread:$0]  %s10488_s7, 9216, %s82_s17, [#allocation9], %s9005_s18, %s9005_s18, %s9006_s19  }
  0x55   :  { %8996 = dma.done.wait [#allocation3], 9216  }
  0x56   :  { %8997 = vsyncadd [#allocation3], 4294958080 }
  0x57   :  { %8998 = dma.done.wait [#allocation6], 10368  }
  0x58   :  { %8999 = vsyncadd [#allocation6], 4294956928 }
  0x59   :  { %9000 = dma.done.wait [#allocation9], 18432  }
  0x5a   :  { %9001 = vsyncadd [#allocation9], 4294948864  ;;  %vm10495_vm0 = vcmask 1043456   ;;  %vm283_vm1 = vcmask 1044480   ;;  %v9013_v0 = vmov 65535   ;;  %vm233_vm2 = vcmask 72704  }
  0x5b   :  { %v284_v1 = vsel %vm10495_vm0, 4294967295, %v9013_v0  ;;  %v8490_v3 = vld [vmem:[%s10482_s1] sm:$0x1f]   ;;  %v8492_v6 = vld [vmem:[%s10481_s0 + $0x8] sm:$0xff]   ;;  %v8493_v7 = vld [vmem:[%s10481_s0 + $0x10] sm:$0xff]  }
  0x5c   :  { %v285_v2 = vsel %vm283_vm1, %v284_v1, 0  ;;  %v8491_v4 = vld [vmem:[%s10481_s0] sm:$0xff]   ;;  %v8500_v9 = vld [vmem:[%s10481_s0 + $0x48] sm:$0xff]   ;;  %v8501_v10 = vld [vmem:[%s10481_s0 + $0x50] sm:$0xff]  }
  0x5d   :  { %v287_v5 = vand.u32 %v8490_v3, %v285_v2  ;;  %7525 = vmatprep.mubr.msk.bf16.mxu0 %vm233_vm2, %v8491_v4  ;;  %v8499_v8 = vld [vmem:[%s10481_s0 + $0x40] sm:$0xff]   ;;  %v8494_v11 = vld [vmem:[%s10481_s0 + $0x18] sm:$0xff]   ;;  %v8496_v15 = vld [vmem:[%s10481_s0 + $0x28] sm:$0xff]  }
  0x5e   :  { %7541 = vmatprep.mubr.msk.bf16.mxu1 %vm233_vm2, %v8499_v8  ;;  %v8495_v12 = vld [vmem:[%s10481_s0 + $0x20] sm:$0xff]   ;;  %v8502_v13 = vld [vmem:[%s10481_s0 + $0x58] sm:$0xff]   ;;  %v8497_v16 = vld [vmem:[%s10481_s0 + $0x30] sm:$0xff]  }
  0x5f   :  { %7523 = vmatprep.subr.bf16.mxu0 %v287_v5  ;;  %8347 = vmatprep.subr.bf16.mxu1 %v287_v5  ;;  %v8503_v14 = vld [vmem:[%s10481_s0 + $0x60] sm:$0xff]   ;;  %v8504_v17 = vld [vmem:[%s10481_s0 + $0x68] sm:$0xff]   ;;  %v8505_v18 = vld [vmem:[%s10481_s0 + $0x70] sm:$0xff]  }
  0x60   :  { %7524 = vmatpush3.bf16.msra.mxu0 %v287_v5  ;;  %8348 = vmatpush3.bf16.msra.mxu1 %v287_v5  ;;  %v8498_v19 = vld [vmem:[%s10481_s0 + $0x38] sm:$0xff]  }
  0x61   :  { %v8506_v20 = vld [vmem:[%s10481_s0 + $0x78] sm:$0xff]  }
  0x63   :  { %7526 = vmatmul.mubr.msk.bf16.vlgmr.msra.gmra.mrb[0].mxu0 %vm233_vm2, %v8492_v6  ;;  %7542 = vmatmul.mubr.msk.bf16.vlgmr.msra.gmra.mrb[0].mxu1 %vm233_vm2, %v8500_v9 }
  0x64   :  { %7529 = vmatprep.mubr.msk.bf16.mxu0 %vm233_vm2, %v8493_v7  ;;  %7545 = vmatprep.mubr.msk.bf16.mxu1 %vm233_vm2, %v8501_v10 }
  0x6b   :  { %7530 = vmatmul.mubr.msk.bf16.gmra.mrb[4].mxu0 %vm233_vm2, %v8494_v11  ;;  %7546 = vmatmul.mubr.msk.bf16.gmra.mrb[4].mxu1 %vm233_vm2, %v8502_v13 }
  0x6c   :  { %7533 = vmatprep.mubr.msk.bf16.mxu0 %vm233_vm2, %v8495_v12  ;;  %7549 = vmatprep.mubr.msk.bf16.mxu1 %vm233_vm2, %v8503_v14 }
  0x73   :  { %7534 = vmatmul.mubr.msk.bf16.gmra.mrb[8].mxu0 %vm233_vm2, %v8496_v15  ;;  %7550 = vmatmul.mubr.msk.bf16.gmra.mrb[8].mxu1 %vm233_vm2, %v8504_v17 }
  0x74   :  { %7537 = vmatprep.mubr.msk.bf16.mxu0 %vm233_vm2, %v8497_v16  ;;  %7553 = vmatprep.mubr.msk.bf16.mxu1 %vm233_vm2, %v8505_v18 }
  0x7b   :  { %7538 = vmatmul.mubr.msk.bf16.gmra.mrb[12].mxu0 %vm233_vm2, %v8498_v19  ;;  %7554 = vmatmul.mubr.msk.bf16.gmra.mrb[12].mxu1 %vm233_vm2, %v8506_v20 }
 0x136   :  { %v9227_v21 = vpop.f32.mrb[0].mxu0  ;;  %v9241_v28 = vpop.f32.mrb[0].mxu1 }
 0x137   :  { %v9229_v22 = vpop.f32.mrb[1].mxu0  ;;  %v9243_v29 = vpop.f32.mrb[1].mxu1  ;;  %v489_v30 = vmul.f32 %v9227_v21, %v9227_v21 }
 0x138   :  { %v9231_v23 = vpop.f32.mrb[2].mxu0  ;;  %v487_v25 = vmul.f32 %v9229_v22, %v9229_v22  ;;  %v9248_v33 = vpop.f32.mrb[2].mxu1 }
 0x139   :  { %v9233_v24 = vpop.f32.mrb[3].mxu0  ;;  %v9250_v34 = vpop.f32.mrb[3].mxu1  ;;  %v490_v35 = vmul.f32 %v9231_v23, %v9231_v23 }
 0x13a   :  { %v450_v26 = vadd.f32 %v9233_v24, %v9229_v22  ;;  %v488_v27 = vmul.f32 %v9233_v24, %v9233_v24 }
 0x13c   :  { %v451_v31 = vadd.f32 %v9227_v21, %v450_v26  ;;  %v519_v32 = vadd.f32 %v488_v27, %v487_v25 }
 0x13e   :  { %v520_v36 = vadd.f32 %v519_v32, %v489_v30  ;;  %v9254_v37 = vpop.f32.mrb[4].mxu0  ;;  %v452_v38 = vadd.f32 %v9231_v23, %v451_v31  ;;  %v9269_v48 = vpop.f32.mrb[4].mxu1 }
 0x13f   :  { %v9257_v39 = vpop.f32.mrb[5].mxu0  ;;  %v9271_v49 = vpop.f32.mrb[5].mxu1  ;;  %v493_v50 = vmul.f32 %v9254_v37, %v9254_v37 }
 0x140   :  { %v453_v40 = vadd.f32 %v452_v38, %v9257_v39  ;;  %v491_v41 = vmul.f32 %v9257_v39, %v9257_v39  ;;  %v521_v42 = vadd.f32 %v520_v36, %v490_v35  ;;  %v9262_v43 = vpop.f32.mrb[6].mxu0  ;;  %v9276_v53 = vpop.f32.mrb[6].mxu1 }
 0x141   :  { %v9264_v44 = vpop.f32.mrb[7].mxu0  ;;  %v9278_v54 = vpop.f32.mrb[7].mxu1  ;;  %v494_v55 = vmul.f32 %v9262_v43, %v9262_v43 }
 0x142   :  { %v522_v45 = vadd.f32 %v521_v42, %v491_v41  ;;  %v454_v46 = vadd.f32 %v453_v40, %v9264_v44  ;;  %v492_v47 = vmul.f32 %v9264_v44, %v9264_v44 }
 0x144   :  { %v455_v51 = vadd.f32 %v9254_v37, %v454_v46  ;;  %v523_v52 = vadd.f32 %v522_v45, %v492_v47  ;;  %v503_v46 = vmul.f32 %v9243_v29, %v9243_v29 }
 0x146   :  { %v524_v56 = vadd.f32 %v523_v52, %v493_v50  ;;  %v9282_v57 = vpop.f32.mrb[8].mxu0  ;;  %v456_v58 = vadd.f32 %v9262_v43, %v455_v51  ;;  %v9297_v4 = vpop.f32.mrb[8].mxu1 }
 0x147   :  { %v9285_v59 = vpop.f32.mrb[9].mxu0  ;;  %v9299_v5 = vpop.f32.mrb[9].mxu1  ;;  %v497_v6 = vmul.f32 %v9282_v57, %v9282_v57 }
 0x148   :  { %v457_v60 = vadd.f32 %v456_v58, %v9285_v59  ;;  %v495_v61 = vmul.f32 %v9285_v59, %v9285_v59  ;;  %v525_v62 = vadd.f32 %v524_v56, %v494_v55  ;;  %v9290_v63 = vpop.f32.mrb[10].mxu0  ;;  %v9304_v9 = vpop.f32.mrb[10].mxu1  ;;  %v504_v55 = vmul.f32 %v9250_v34, %v9250_v34 }
 0x149   :  { %v9292_v0 = vpop.f32.mrb[11].mxu0  ;;  %v9306_v10 = vpop.f32.mrb[11].mxu1  ;;  %v498_v11 = vmul.f32 %v9290_v63, %v9290_v63  ;;  %v505_v56 = vmul.f32 %v9241_v28, %v9241_v28 }
 0x14a   :  { %v526_v1 = vadd.f32 %v525_v62, %v495_v61  ;;  %v458_v2 = vadd.f32 %v457_v60, %v9292_v0  ;;  %v496_v3 = vmul.f32 %v9292_v0, %v9292_v0  ;;  %v506_v61 = vmul.f32 %v9248_v33, %v9248_v33 }
 0x14c   :  { %v459_v7 = vadd.f32 %v9282_v57, %v458_v2  ;;  %v527_v8 = vadd.f32 %v526_v1, %v496_v3  ;;  %v507_v2 = vmul.f32 %v9271_v49, %v9271_v49 }
 0x14e   :  { %v528_v12 = vadd.f32 %v527_v8, %v497_v6  ;;  %v9310_v13 = vpop.f32.mrb[12].mxu0  ;;  %v460_v14 = vadd.f32 %v9290_v63, %v459_v7  ;;  %v9325_v30 = vpop.f32.mrb[12].mxu1 }
 0x14f   :  { %v9313_v15 = vpop.f32.mrb[13].mxu0  ;;  %v9327_v31 = vpop.f32.mrb[13].mxu1  ;;  %v501_v32 = vmul.f32 %v9310_v13, %v9310_v13 }
 0x150   :  { %v461_v16 = vadd.f32 %v460_v14, %v9313_v15  ;;  %v499_v17 = vmul.f32 %v9313_v15, %v9313_v15  ;;  %v529_v18 = vadd.f32 %v528_v12, %v498_v11  ;;  %v9318_v19 = vpop.f32.mrb[14].mxu0  ;;  %v9332_v38 = vpop.f32.mrb[14].mxu1  ;;  %v508_v11 = vmul.f32 %v9278_v54, %v9278_v54 }
 0x151   :  { %v9320_v20 = vpop.f32.mrb[15].mxu0  ;;  %v9334_v40 = vpop.f32.mrb[15].mxu1  ;;  %v502_v41 = vmul.f32 %v9318_v19, %v9318_v19  ;;  %v509_v12 = vmul.f32 %v9269_v48, %v9269_v48 }
 0x152   :  { %v530_v25 = vadd.f32 %v529_v18, %v499_v17  ;;  %v462_v26 = vadd.f32 %v461_v16, %v9320_v20  ;;  %v500_v27 = vmul.f32 %v9320_v20, %v9320_v20  ;;  %v8509_v17 = vld [vmem:[#allocation2 + $0x44] ss:$8 sps:$4 sm:$0xff]   ;;  %v510_v18 = vmul.f32 %v9276_v53, %v9276_v53 }
 0x153   :  { %995 = vmatprep.mubr.bf16.mxu1 %v8509_v17 }
 0x154   :  { %v463_v35 = vadd.f32 %v9310_v13, %v462_v26  ;;  %v531_v36 = vadd.f32 %v530_v25, %v500_v27  ;;  %v511_v27 = vmul.f32 %v9299_v5, %v9299_v5 }
 0x156   :  { %v532_v42 = vadd.f32 %v531_v36, %v501_v32  ;;  %v464_v45 = vadd.f32 %v9318_v19, %v463_v35 }
 0x158   :  { %v465_v47 = vadd.f32 %v464_v45, %v9243_v29  ;;  %v533_v50 = vadd.f32 %v532_v42, %v502_v41  ;;  %v512_v42 = vmul.f32 %v9306_v10, %v9306_v10  ;;  %v513_v45 = vmul.f32 %v9297_v4, %v9297_v4 }
 0x15a   :  { %v534_v51 = vadd.f32 %v533_v50, %v503_v46  ;;  %v466_v52 = vadd.f32 %v465_v47, %v9250_v34  ;;  %v514_v50 = vmul.f32 %v9304_v9, %v9304_v9 }
 0x15c   :  { %v467_v58 = vadd.f32 %v9241_v28, %v466_v52  ;;  %v535_v60 = vadd.f32 %v534_v51, %v504_v55  ;;  %v515_v55 = vmul.f32 %v9327_v31, %v9327_v31 }
 0x15e   :  { %v536_v62 = vadd.f32 %v535_v60, %v505_v56  ;;  %v468_v1 = vadd.f32 %v9248_v33, %v467_v58 }
 0x160   :  { %v469_v3 = vadd.f32 %v468_v1, %v9271_v49  ;;  %v537_v6 = vadd.f32 %v536_v62, %v506_v61  ;;  %v516_v62 = vmul.f32 %v9334_v40, %v9334_v40  ;;  %v517_v1 = vmul.f32 %v9325_v30, %v9325_v30 }
 0x162   :  { %v538_v7 = vadd.f32 %v537_v6, %v507_v2  ;;  %v470_v8 = vadd.f32 %v469_v3, %v9278_v54  ;;  %v518_v6 = vmul.f32 %v9332_v38, %v9332_v38 }
 0x164   :  { %v471_v14 = vadd.f32 %v9269_v48, %v470_v8  ;;  %v539_v16 = vadd.f32 %v538_v7, %v508_v11 }
 0x166   :  { %v540_v25 = vadd.f32 %v539_v16, %v509_v12  ;;  %v472_v26 = vadd.f32 %v9276_v53, %v471_v14 }
 0x168   :  { %v473_v32 = vadd.f32 %v472_v26, %v9299_v5  ;;  %v541_v35 = vadd.f32 %v540_v25, %v510_v18 }
 0x16a   :  { %v542_v36 = vadd.f32 %v541_v35, %v511_v27  ;;  %v474_v41 = vadd.f32 %v473_v32, %v9306_v10  ;;  %v8521_v35 = vld [vmem:[#allocation2 + $0x4] ss:$8 sps:$4 sm:$0xff]  }
 0x16b   :  { %861 = vmatprep.mubr.bf16.mxu0 %v8521_v35 }
 0x16c   :  { %v475_v46 = vadd.f32 %v9297_v4, %v474_v41  ;;  %v543_v47 = vadd.f32 %v542_v36, %v512_v42 }
 0x16e   :  { %v544_v51 = vadd.f32 %v543_v47, %v513_v45  ;;  %v476_v52 = vadd.f32 %v9304_v9, %v475_v46  ;;  %v597_v46 = vlaneseq }
 0x170   :  { %v477_v56 = vadd.f32 %v476_v52, %v9327_v31  ;;  %v545_v58 = vadd.f32 %v544_v51, %v514_v50 }
 0x172   :  { %v546_v60 = vadd.f32 %v545_v58, %v515_v55  ;;  %v478_v61 = vadd.f32 %v477_v56, %v9334_v40 }
 0x174   :  { %v479_v2 = vadd.f32 %v9325_v30, %v478_v61  ;;  %v547_v3 = vadd.f32 %v546_v60, %v516_v62 }
 0x176   :  { %v480_v7 = vadd.f32 %v9332_v38, %v479_v2  ;;  %v548_v8 = vadd.f32 %v547_v3, %v517_v1  ;;  %v598_v2 = vshrl.u32 %v597_v46, 7 }
 0x178   :  { %v481_v11 = vrot.slane %v480_v7, 4  ;;  %v549_v12 = vadd.f32 %v548_v8, %v518_v6 }
 0x17a   :  { %v482_v14 = vadd.f32 %v481_v11, %v480_v7  ;;  %v550_v16 = vrot.slane %v549_v12, 4 }
 0x17c   :  { %v483_v17 = vrot.slane %v482_v14, 2  ;;  %v551_v18 = vadd.f32 %v550_v16, %v549_v12 }
 0x17e   :  { %v484_v25 = vadd.f32 %v483_v17, %v482_v14  ;;  %v552_v26 = vrot.slane %v551_v18, 2 }
 0x180   :  { %v485_v27 = vrot.slane %v484_v25, 1  ;;  %v553_v32 = vadd.f32 %v552_v26, %v551_v18 }
 0x182   :  { %v486_v36 = vadd.f32 %v485_v27, %v484_v25  ;;  %v554_v41 = vrot.slane %v553_v32, 1 }
 0x184   :  { %v555_v42 = vadd.f32 %v554_v41, %v553_v32  ;;  %v9387_v45 = vmul.f32 0.00390625, %v486_v36 }
 0x186   :  { %v557_v47 = vmul.f32 0.00390625, %v555_v42  ;;  %v558_v50 = vmul.f32 %v9387_v45, %v9387_v45  ;;  %v590_v51 = vsub.f32 %v9327_v31, %v9387_v45  ;;  %v591_v52 = vsub.f32 %v9334_v40, %v9387_v45 }
 0x187   :  { %v562_v55 = vsub.f32 %v9229_v22, %v9387_v45  ;;  %v563_v56 = vsub.f32 %v9233_v24, %v9387_v45  ;;  %v564_v58 = vsub.f32 %v9227_v21, %v9387_v45  ;;  %v565_v60 = vsub.f32 %v9231_v23, %v9387_v45 }
 0x188   :  { %v559_v61 = vsub.f32 %v557_v47, %v558_v50  ;;  %v566_v62 = vsub.f32 %v9257_v39, %v9387_v45  ;;  %v567_v31 = vsub.f32 %v9264_v44, %v9387_v45  ;;  %v568_v40 = vsub.f32 %v9254_v37, %v9387_v45 }
 0x189   :  { %v569_v22 = vsub.f32 %v9262_v43, %v9387_v45  ;;  %v570_v24 = vsub.f32 %v9285_v59, %v9387_v45  ;;  %v571_v21 = vsub.f32 %v9292_v0, %v9387_v45  ;;  %v572_v23 = vsub.f32 %v9282_v57, %v9387_v45 }
 0x18a   :  { %v594_v1 = vadd.f32 1e-05, %v559_v61  ;;  %v573_v39 = vsub.f32 %v9290_v63, %v9387_v45  ;;  %v574_v44 = vsub.f32 %v9313_v15, %v9387_v45  ;;  %v575_v37 = vsub.f32 %v9320_v20, %v9387_v45 }
 0x18b   :  { %v576_v43 = vsub.f32 %v9310_v13, %v9387_v45  ;;  %v577_v59 = vsub.f32 %v9318_v19, %v9387_v45  ;;  %v578_v0 = vsub.f32 %v9243_v29, %v9387_v45  ;;  %v579_v57 = vsub.f32 %v9250_v34, %v9387_v45 }
 0x18c   :  { %8856 = vrsqrt.f32 %v594_v1  ;;  %v580_v63 = vsub.f32 %v9241_v28, %v9387_v45  ;;  %v581_v15 = vsub.f32 %v9248_v33, %v9387_v45  ;;  %v582_v20 = vsub.f32 %v9271_v49, %v9387_v45 }
 0x18d   :  { %v583_v13 = vsub.f32 %v9278_v54, %v9387_v45  ;;  %v584_v19 = vsub.f32 %v9269_v48, %v9387_v45  ;;  %v585_v29 = vsub.f32 %v9276_v53, %v9387_v45  ;;  %v586_v34 = vsub.f32 %v9299_v5, %v9387_v45  ;;  %v560_v53 = vld [vmem:[%s10492_s11] sm:$0x1] }
 0x18e   :  { %v587_v28 = vsub.f32 %v9306_v10, %v9387_v45  ;;  %v588_v33 = vsub.f32 %v9297_v4, %v9387_v45  ;;  %v589_v49 = vsub.f32 %v9304_v9, %v9387_v45  ;;  %v592_v54 = vsub.f32 %v9325_v30, %v9387_v45  ;;  %v9464_v9 = vld [vmem:[%s10493_s12] ss:$0 sm:$0xff] }
 0x18f   :  { %v593_v48 = vsub.f32 %v9332_v38, %v9387_v45  ;;  %v9458_v5 = vsub.s32 0, %v598_v2 }
 0x196   :  { %v8857_v10 = vpop.eup %8856 }
 0x197   :  { %v596_v3 = vmul.f32 %v8857_v10, %v560_v53 }
 0x199   :  { %v600_v4 = vrot.slane %v596_v3, %v9458_v5 }
 0x19b   :  { %v629_v30 = vmul.f32 %v600_v4, %v590_v51  ;;  %v630_v6 = vmul.f32 %v600_v4, %v591_v52  ;;  %v601_v7 = vmul.f32 %v600_v4, %v562_v55  ;;  %v602_v38 = vmul.f32 %v600_v4, %v563_v56 }
 0x19c   :  { %v603_v8 = vmul.f32 %v600_v4, %v564_v58  ;;  %v604_v11 = vmul.f32 %v600_v4, %v565_v60  ;;  %v605_v12 = vmul.f32 %v600_v4, %v566_v62  ;;  %v606_v14 = vmul.f32 %v600_v4, %v567_v31 }
 0x19d   :  { %v665_v16 = vadd.f32 %v9464_v9, %v629_v30  ;;  %v666_v17 = vadd.f32 %v9464_v9, %v630_v6  ;;  %v607_v18 = vmul.f32 %v600_v4, %v568_v40  ;;  %v608_v25 = vmul.f32 %v600_v4, %v569_v22 }
 0x19e   :  { %v609_v26 = vmul.f32 %v600_v4, %v570_v24  ;;  %v610_v27 = vmul.f32 %v600_v4, %v571_v21  ;;  %v611_v32 = vmul.f32 %v600_v4, %v572_v23  ;;  %v612_v35 = vmul.f32 %v600_v4, %v573_v39 }
 0x19f   :  { %vm697_vm3 = vcmp.gt.f32.partialorder %v665_v16, 0.0  ;;  %vm698_vm4 = vcmp.gt.f32.partialorder %v666_v17, 0.0  ;;  %v729_v36 = vmul.f32 0.01, %v665_v16  ;;  %v730_v41 = vmul.f32 0.01, %v666_v17 }
 0x1a0   :  { %v613_v42 = vmul.f32 %v600_v4, %v574_v44  ;;  %v614_v45 = vmul.f32 %v600_v4, %v575_v37  ;;  %v615_v46 = vmul.f32 %v600_v4, %v576_v43  ;;  %v616_v47 = vmul.f32 %v600_v4, %v577_v59 }
 0x1a1   :  { %v761_v50 = vsel %vm697_vm3, %v665_v16, %v729_v36  ;;  %v762_v51 = vsel %vm698_vm4, %v666_v17, %v730_v41  ;;  %v617_v52 = vmul.f32 %v600_v4, %v578_v0  ;;  %v618_v55 = vmul.f32 %v600_v4, %v579_v57 }
 0x1a2   :  { %v9468_v56 = vpack.c.bf16 %v762_v51, %v761_v50  ;;  %v619_v58 = vmul.f32 %v600_v4, %v580_v63  ;;  %v620_v60 = vmul.f32 %v600_v4, %v581_v15  ;;  %v621_v61 = vmul.f32 %v600_v4, %v582_v20 }
 0x1a3   :  { %v622_v62 = vmul.f32 %v600_v4, %v583_v13  ;;  %v623_v31 = vmul.f32 %v600_v4, %v584_v19  ;;  %v624_v40 = vmul.f32 %v600_v4, %v585_v29  ;;  %v625_v22 = vmul.f32 %v600_v4, %v586_v34 }
 0x1a4   :  { %v626_v24 = vmul.f32 %v600_v4, %v587_v28  ;;  %v627_v21 = vmul.f32 %v600_v4, %v588_v33  ;;  %v628_v23 = vmul.f32 %v600_v4, %v589_v49  ;;  %v631_v1 = vmul.f32 %v600_v4, %v592_v54 }
 0x1a5   :  { %v632_v39 = vmul.f32 %v600_v4, %v593_v48  ;;  %v637_v44 = vadd.f32 %v9464_v9, %v601_v7  ;;  %v9472_v37 = vadd.f32 %v9464_v9, %v602_v38  ;;  %v9475_v43 = vadd.f32 %v9464_v9, %v603_v8 }
 0x1a6   :  { %v9478_v59 = vadd.f32 %v9464_v9, %v604_v11  ;;  %v9481_v0 = vadd.f32 %v9464_v9, %v605_v12  ;;  %v9484_v57 = vadd.f32 %v9464_v9, %v606_v14  ;;  %v9487_v63 = vadd.f32 %v9464_v9, %v607_v18 }
 0x1a7   :  { %v9490_v15 = vadd.f32 %v9464_v9, %v608_v25  ;;  %v9493_v20 = vadd.f32 %v9464_v9, %v609_v26  ;;  %v9496_v13 = vadd.f32 %v9464_v9, %v610_v27  ;;  %v9499_v19 = vadd.f32 %v9464_v9, %v611_v32 }
 0x1a8   :  { %v9502_v29 = vadd.f32 %v9464_v9, %v612_v35  ;;  %v9505_v34 = vadd.f32 %v9464_v9, %v613_v42  ;;  %v9508_v28 = vadd.f32 %v9464_v9, %v614_v45  ;;  %v9511_v33 = vadd.f32 %v9464_v9, %v615_v46 }
 0x1a9   :  { %v9514_v49 = vadd.f32 %v9464_v9, %v616_v47  ;;  %v9517_v54 = vadd.f32 %v9464_v9, %v617_v52  ;;  %v9520_v48 = vadd.f32 %v9464_v9, %v618_v55  ;;  %v9523_v2 = vadd.f32 %v9464_v9, %v619_v58 }
 0x1aa   :  { %v9526_v53 = vadd.f32 %v9464_v9, %v620_v60  ;;  %v9529_v10 = vadd.f32 %v9464_v9, %v621_v61  ;;  %v9532_v3 = vadd.f32 %v9464_v9, %v622_v62  ;;  %v9535_v4 = vadd.f32 %v9464_v9, %v623_v31 }
 0x1ab   :  { %v9538_v30 = vadd.f32 %v9464_v9, %v624_v40  ;;  %v9541_v6 = vadd.f32 %v9464_v9, %v625_v22  ;;  %v9544_v7 = vadd.f32 %v9464_v9, %v626_v24  ;;  %v9547_v38 = vadd.f32 %v9464_v9, %v627_v21 }
 0x1ac   :  { %v9550_v8 = vadd.f32 %v9464_v9, %v628_v23  ;;  %v9553_v11 = vadd.f32 %v9464_v9, %v631_v1  ;;  %v9556_v12 = vadd.f32 %v9464_v9, %v632_v39  ;;  %vm669_vm5 = vcmp.gt.f32.partialorder %v637_v44, 0.0 }
 0x1ad   :  { %vm670_vm6 = vcmp.gt.f32.partialorder %v9472_v37, 0.0  ;;  %vm671_vm7 = vcmp.gt.f32.partialorder %v9475_v43, 0.0  ;;  %vm672_vm8 = vcmp.gt.f32.partialorder %v9478_v59, 0.0  ;;  %vm673_vm9 = vcmp.gt.f32.partialorder %v9481_v0, 0.0 }
 0x1ae   :  { %vm674_vm10 = vcmp.gt.f32.partialorder %v9484_v57, 0.0  ;;  %vm675_vm11 = vcmp.gt.f32.partialorder %v9487_v63, 0.0  ;;  %vm679_vm15 = vcmp.gt.f32.partialorder %v9499_v19, 0.0  ;;  %vm680_vm1 = vcmp.gt.f32.partialorder %v9502_v29, 0.0 }
 0x1af   :  { %v701_v9 = vmul.f32 0.01, %v637_v44  ;;  %v702_v14 = vmul.f32 0.01, %v9472_v37  ;;  %vm685_vm12 = vcmp.gt.f32.partialorder %v9517_v54, 0.0  ;;  %vm690_vm2 = vcmp.gt.f32.partialorder %v9532_v3, 0.0 }
 0x1b0   :  { %v703_v16 = vmul.f32 0.01, %v9475_v43  ;;  %v704_v17 = vmul.f32 0.01, %v9478_v59  ;;  %v705_v18 = vmul.f32 0.01, %v9481_v0 }
 0x1b1   :  { %vm691_vm0 = vcmp.gt.f32.partialorder %v9535_v4, 0.0  ;;  %v706_v25 = vmul.f32 0.01, %v9484_v57  ;;  %v707_v26 = vmul.f32 0.01, %v9487_v63  ;;  %v733_v32 = vsel %vm669_vm5, %v637_v44, %v701_v9 }
 0x1b2   :  { %v708_v27 = vmul.f32 0.01, %v9490_v15  ;;  %vm694_vm3 = vcmp.gt.f32.partialorder %v9544_v7, 0.0  ;;  %vm695_vm4 = vcmp.gt.f32.partialorder %v9547_v38, 0.0  ;;  %v709_v35 = vmul.f32 0.01, %v9493_v20 }
 0x1b3   :  { %v710_v36 = vmul.f32 0.01, %v9496_v13  ;;  %v711_v41 = vmul.f32 0.01, %v9499_v19  ;;  %v734_v42 = vsel %vm670_vm6, %v9472_v37, %v702_v14  ;;  %vm696_vm5 = vcmp.gt.f32.partialorder %v9550_v8, 0.0 }
 0x1b4   :  { %vm699_vm14 = vcmp.gt.f32.partialorder %v9553_v11, 0.0  ;;  %vm700_vm13 = vcmp.gt.f32.partialorder %v9556_v12, 0.0  ;;  %v712_v45 = vmul.f32 0.01, %v9502_v29  ;;  %v713_v46 = vmul.f32 0.01, %v9505_v34 }
 0x1b5   :  { %v714_v47 = vmul.f32 0.01, %v9508_v28  ;;  %v735_v50 = vsel %vm671_vm7, %v9475_v43, %v703_v16  ;;  %v715_v51 = vmul.f32 0.01, %v9511_v33  ;;  %v716_v52 = vmul.f32 0.01, %v9514_v49 }
 0x1b6   :  { %v717_v55 = vmul.f32 0.01, %v9517_v54  ;;  %v736_v58 = vsel %vm672_vm8, %v9478_v59, %v704_v17  ;;  %v718_v60 = vmul.f32 0.01, %v9520_v48  ;;  %v719_v61 = vmul.f32 0.01, %v9523_v2 }
 0x1b7   :  { %v720_v62 = vmul.f32 0.01, %v9526_v53  ;;  %v737_v31 = vsel %vm673_vm9, %v9481_v0, %v705_v18  ;;  %v721_v40 = vmul.f32 0.01, %v9529_v10  ;;  %v722_v22 = vmul.f32 0.01, %v9532_v3 }
 0x1b8   :  { %v723_v24 = vmul.f32 0.01, %v9535_v4  ;;  %v738_v21 = vsel %vm674_vm10, %v9484_v57, %v706_v25  ;;  %v724_v23 = vmul.f32 0.01, %v9538_v30  ;;  %v725_v1 = vmul.f32 0.01, %v9541_v6 }
 0x1b9   :  { %v726_v39 = vmul.f32 0.01, %v9544_v7  ;;  %v739_v44 = vsel %vm675_vm11, %v9487_v63, %v707_v26  ;;  %v727_v37 = vmul.f32 0.01, %v9547_v38  ;;  %v728_v43 = vmul.f32 0.01, %v9550_v8 }
 0x1ba   :  { %v731_v59 = vmul.f32 0.01, %v9553_v11  ;;  %vm10496_vm6 = vcmp.gt.f32.partialorder %v9490_v15, 0.0  ;;  %v732_v57 = vmul.f32 0.01, %v9556_v12  ;;  %vm10497_vm7 = vcmp.gt.f32.partialorder %v9493_v20, 0.0 }
 0x1bb   :  { %v740_v0 = vsel %vm10496_vm6, %v9490_v15, %v708_v27  ;;  %v741_v9 = vsel %vm10497_vm7, %v9493_v20, %v709_v35  ;;  %vm10498_vm8 = vcmp.gt.f32.partialorder %v9496_v13, 0.0  ;;  %v743_v14 = vsel %vm679_vm15, %v9499_v19, %v711_v41 }
 0x1bc   :  { %v742_v63 = vsel %vm10498_vm8, %v9496_v13, %v710_v36  ;;  %v744_v16 = vsel %vm680_vm1, %v9502_v29, %v712_v45  ;;  %vm10499_vm9 = vcmp.gt.f32.partialorder %v9505_v34, 0.0  ;;  %vm10500_vm10 = vcmp.gt.f32.partialorder %v9508_v28, 0.0  ;;  %v8507_v45 = vld [vmem:[#allocation2 + $0x40] ss:$8 sps:$4 sm:$0xff]  }
 0x1bd   :  { %v745_v15 = vsel %vm10499_vm9, %v9505_v34, %v713_v46  ;;  %v746_v20 = vsel %vm10500_vm10, %v9508_v28, %v714_v47  ;;  %vm10501_vm11 = vcmp.gt.f32.partialorder %v9511_v33, 0.0  ;;  %vm10502_vm6 = vcmp.gt.f32.partialorder %v9514_v49, 0.0  ;;  %v8519_v46 = vld [vmem:[#allocation2] ss:$8 sps:$4 sm:$0xff]   ;;  %v8510_v47 = vld [vmem:[#allocation2 + $0x54] ss:$8 sps:$4 sm:$0xff]  }
 0x1be   :  { %v747_v13 = vsel %vm10501_vm11, %v9511_v33, %v715_v51  ;;  %v748_v19 = vsel %vm10502_vm6, %v9514_v49, %v716_v52  ;;  %v749_v29 = vsel %vm685_vm12, %v9517_v54, %v717_v55  ;;  %vm10503_vm15 = vcmp.gt.f32.partialorder %v9520_v48, 0.0  ;;  %v8512_v51 = vld [vmem:[#allocation2 + $0x50] ss:$8 sps:$4 sm:$0xff]   ;;  %v8513_v55 = vld [vmem:[#allocation2 + $0x64] ss:$8 sps:$4 sm:$0xff]  }
 0x1bf   :  { %v750_v34 = vsel %vm10503_vm15, %v9520_v48, %v718_v60  ;;  %vm10504_vm1 = vcmp.gt.f32.partialorder %v9523_v2, 0.0  ;;  %vm10505_vm7 = vcmp.gt.f32.partialorder %v9526_v53, 0.0  ;;  %vm10506_vm8 = vcmp.gt.f32.partialorder %v9529_v10, 0.0  ;;  %v8527_v52 = vld [vmem:[#allocation2 + $0x10] ss:$8 sps:$4 sm:$0xff]  }
 0x1c0   :  { %v751_v28 = vsel %vm10504_vm1, %v9523_v2, %v719_v61  ;;  %v752_v33 = vsel %vm10505_vm7, %v9526_v53, %v720_v62  ;;  %v753_v49 = vsel %vm10506_vm8, %v9529_v10, %v721_v40  ;;  %v754_v54 = vsel %vm690_vm2, %v9532_v3, %v722_v22  ;;  %v8515_v60 = vld [vmem:[#allocation2 + $0x60] ss:$8 sps:$4 sm:$0xff]   ;;  %v8516_v62 = vld [vmem:[#allocation2 + $0x74] ss:$8 sps:$4 sm:$0xff]   ;;  %v8518_v40 = vld [vmem:[#allocation2 + $0x70] ss:$8 sps:$4 sm:$0xff]  }
 0x1c1   :  { %v755_v48 = vsel %vm691_vm0, %v9535_v4, %v723_v24  ;;  %vm10507_vm12 = vcmp.gt.f32.partialorder %v9538_v30, 0.0  ;;  %vm10508_vm9 = vcmp.gt.f32.partialorder %v9541_v6, 0.0  ;;  %v758_v10 = vsel %vm694_vm3, %v9544_v7, %v726_v39  ;;  %v8533_v61 = vld [vmem:[#allocation2 + $0x20] ss:$8 sps:$4 sm:$0xff]   ;;  %v8539_v22 = vld [vmem:[#allocation2 + $0x30] ss:$8 sps:$4 sm:$0xff]  }
 0x1c2   :  { %v756_v2 = vsel %vm10507_vm12, %v9538_v30, %v724_v23  ;;  %v757_v53 = vsel %vm10508_vm9, %v9541_v6, %v725_v1  ;;  %v759_v3 = vsel %vm695_vm4, %v9547_v38, %v727_v37  ;;  %v760_v4 = vsel %vm696_vm5, %v9550_v8, %v728_v43  ;;  %v8524_v24 = vld [vmem:[#allocation2 + $0x84] ss:$8 sps:$4 sm:$0xff]   ;;  %v8528_v23 = vld [vmem:[#allocation2 + $0x94] ss:$8 sps:$4 sm:$0xff]   ;;  %v8530_v1 = vld [vmem:[#allocation2 + $0x90] ss:$8 sps:$4 sm:$0xff]  }
 0x1c3   :  { %v763_v30 = vsel %vm699_vm14, %v9553_v11, %v731_v59  ;;  %v764_v6 = vsel %vm700_vm13, %v9556_v12, %v732_v57  ;;  %v9704_v17 = vpack.c.bf16 %v734_v42, %v733_v32  ;;  %v9706_v18 = vpack.c.bf16 %v736_v58, %v735_v50  ;;  %v8525_v50 = vld [vmem:[#allocation2 + $0x14] ss:$8 sps:$4 sm:$0xff]   ;;  %v8531_v58 = vld [vmem:[#allocation2 + $0x24] ss:$8 sps:$4 sm:$0xff]   ;;  %v8542_v43 = vld [vmem:[#allocation2 + $0xb0] ss:$8 sps:$4 sm:$0xff]  }
 0x1c4   :  { %v9708_v7 = vpack.c.bf16 %v738_v21, %v737_v31  ;;  %v9710_v25 = vpack.c.bf16 %v740_v0, %v739_v44  ;;  %v9712_v38 = vpack.c.bf16 %v742_v63, %v741_v9  ;;  %v9714_v26 = vpack.c.bf16 %v744_v16, %v743_v14  ;;  %v8537_v31 = vld [vmem:[#allocation2 + $0x34] ss:$8 sps:$4 sm:$0xff]   ;;  %v8522_v21 = vld [vmem:[#allocation2 + $0x80] ss:$8 sps:$4 sm:$0xff]   ;;  %v8534_v39 = vld [vmem:[#allocation2 + $0xa4] ss:$8 sps:$4 sm:$0xff]  }
 0x1c5   :  { %v9716_v8 = vpack.c.bf16 %v746_v20, %v745_v15  ;;  %v9718_v27 = vpack.c.bf16 %v748_v19, %v747_v13  ;;  %v9720_v11 = vpack.c.bf16 %v750_v34, %v749_v29  ;;  %v9722_v35 = vpack.c.bf16 %v752_v33, %v751_v28  ;;  %v8536_v44 = vld [vmem:[#allocation2 + $0xa0] ss:$8 sps:$4 sm:$0xff]   ;;  %v8540_v37 = vld [vmem:[#allocation2 + $0xb4] ss:$8 sps:$4 sm:$0xff]   ;;  %v8545_v59 = vld [vmem:[#allocation2 + $0xc4] ss:$8 sps:$4 sm:$0xff]  }
 0x1c6   :  { %v9724_v12 = vpack.c.bf16 %v754_v54, %v753_v49  ;;  %v9726_v32 = vpack.c.bf16 %v756_v2, %v755_v48  ;;  %v9728_v36 = vpack.c.bf16 %v758_v10, %v757_v53  ;;  %v9730_v41 = vpack.c.bf16 %v760_v4, %v759_v3  ;;  %v8543_v0 = vld [vmem:[#allocation2 + $0xc0] ss:$8 sps:$4 sm:$0xff]   ;;  %v8546_v57 = vld [vmem:[#allocation2 + $0xd4] ss:$8 sps:$4 sm:$0xff]   ;;  %v8548_v63 = vld [vmem:[#allocation2 + $0xd0] ss:$8 sps:$4 sm:$0xff]  }
 0x1c7   :  { %v9732_v42 = vpack.c.bf16 %v764_v6, %v763_v30  ;;  %6808 = vmatprep.subr.bf16.mxu0 %v9720_v11  ;;  %6848 = vmatprep.subr.bf16.mxu1 %v9720_v11  ;;  %v8594_v9 = vld [vmem:[#allocation5 + $0x40] sm:$0xff]   ;;  %v8595_v16 = vld [vmem:[#allocation5 + $0x48] sm:$0xff]   ;;  %v8596_v15 = vld [vmem:[#allocation5 + $0x50] sm:$0xff]   ;;  %vm9015_vm0 = vmmov 0   ;;  %vm3177_vm6 = vcmask 523264   ;;  %vm4661_vm7 = vcmask 130048  }
 0x1c8   :  { %6809 = vmatpush3.bf16.msra.mxu0 %v9704_v17  ;;  %6849 = vmatpush3.bf16.msra.mxu1 %v9704_v17  ;;  %v8549_v14 = vld [vmem:[#allocation2 + $0xe4] ss:$8 sps:$4 sm:$0xff]   ;;  %v8551_v20 = vld [vmem:[#allocation2 + $0xe0] ss:$8 sps:$4 sm:$0xff]   ;;  %v8552_v13 = vld [vmem:[#allocation2 + $0xf4] ss:$8 sps:$4 sm:$0xff]  }
 0x1c9   :  { %6810 = vmatprep.subr.bf16.mxu0 %v9722_v35  ;;  %6850 = vmatprep.subr.bf16.mxu1 %v9722_v35  ;;  %v8597_v19 = vld [vmem:[#allocation5 + $0x58] sm:$0xff]   ;;  %v8598_v29 = vld [vmem:[#allocation5 + $0x60] sm:$0xff]   ;;  %v8599_v33 = vld [vmem:[#allocation5 + $0x68] sm:$0xff]   ;;  %vm10509_vm8 = vcmask 1043456  }
 0x1ca   :  { %v8554_v34 = vld [vmem:[#allocation2 + $0xf0] ss:$8 sps:$4 sm:$0xff]   ;;  %v8557_v28 = vld [vmem:[#allocation2 + $0x104] ss:$8 sps:$4 sm:$0xff]   ;;  %v8555_v54 = vld [vmem:[#allocation2 + $0x100] ss:$8 sps:$4 sm:$0xff]  }
 0x1cb   :  { %v8600_v49 = vld [vmem:[#allocation5 + $0x70] sm:$0xff]   ;;  %v8604_v2 = vld [vmem:[#allocation5 + $0x78] sm:$0xff]   ;;  %v9816_v53 = vld [vmem:[#allocation5] sm:$0xff]  }
 0x1cc   :  { %6811 = vmatpush3.bf16.msra.mxu0 %v9706_v18  ;;  %6851 = vmatpush3.bf16.msra.mxu1 %v9706_v18  ;;  %v8558_v48 = vld [vmem:[#allocation2 + $0x114] ss:$8 sps:$4 sm:$0xff]   ;;  %v8560_v10 = vld [vmem:[#allocation2 + $0x110] ss:$8 sps:$4 sm:$0xff]   ;;  %v8561_v3 = vld [vmem:[#allocation2 + $0x124] ss:$8 sps:$4 sm:$0xff]  }
 0x1cd   :  { %6812 = vmatprep.subr.bf16.mxu0 %v9724_v12  ;;  %6852 = vmatprep.subr.bf16.mxu1 %v9724_v12  ;;  %v8563_v4 = vld [vmem:[#allocation2 + $0x120] ss:$8 sps:$4 sm:$0xff]   ;;  %v8564_v30 = vld [vmem:[#allocation2 + $0x134] ss:$8 sps:$4 sm:$0xff]   ;;  %v8566_v6 = vld [vmem:[#allocation2 + $0x130] ss:$8 sps:$4 sm:$0xff]  }
 0x1ce   :  { %vm10510_vm12 = vmmov %vm10509_vm8 }
 0x1d0   :  { %6813 = vmatpush3.bf16.msra.mxu0 %v9708_v7  ;;  %6853 = vmatpush3.bf16.msra.mxu1 %v9708_v7 }
 0x1d1   :  { %6814 = vmatprep.subr.bf16.mxu0 %v9726_v32  ;;  %6854 = vmatprep.subr.bf16.mxu1 %v9726_v32 }
 0x1d4   :  { %6815 = vmatpush3.bf16.msra.mxu0 %v9710_v25  ;;  %6855 = vmatpush3.bf16.msra.mxu1 %v9710_v25 }
 0x1d5   :  { %6816 = vmatprep.subr.bf16.mxu0 %v9728_v36  ;;  %6856 = vmatprep.subr.bf16.mxu1 %v9728_v36 }
 0x1d8   :  { %6817 = vmatpush3.bf16.msra.mxu0 %v9712_v38  ;;  %6857 = vmatpush3.bf16.msra.mxu1 %v9712_v38 }
 0x1d9   :  { %6818 = vmatprep.subr.bf16.mxu0 %v9730_v41  ;;  %6858 = vmatprep.subr.bf16.mxu1 %v9730_v41 }
 0x1dc   :  { %6819 = vmatpush3.bf16.msra.mxu0 %v9714_v26  ;;  %6859 = vmatpush3.bf16.msra.mxu1 %v9714_v26 }
 0x1dd   :  { %6820 = vmatprep.subr.bf16.mxu0 %v9468_v56  ;;  %6860 = vmatprep.subr.bf16.mxu1 %v9468_v56 }
 0x1e0   :  { %6821 = vmatpush3.bf16.msra.mxu0 %v9716_v8  ;;  %6861 = vmatpush3.bf16.msra.mxu1 %v9716_v8 }
 0x1e1   :  { %6822 = vmatprep.subr.bf16.mxu0 %v9732_v42  ;;  %6862 = vmatprep.subr.bf16.mxu1 %v9732_v42 }
 0x1e4   :  { %6823 = vmatpush3.bf16.msra.mxu0 %v9718_v27  ;;  %6863 = vmatpush3.bf16.msra.mxu1 %v9718_v27 }
 0x1e5   :  { %6912 = vmatprep.subr.bf16.mxu1 %v9720_v11  ;;  %7557 = vmatprep.subr.bf16.mxu0 %v8594_v9 }
 0x1e7   :  { %996 = vmatmul.mubr.bf16.vlgmr.msra.gmra.mrb[16].mxu1 %v8507_v45  ;;  %862 = vmatmul.mubr.bf16.vlgmr.msra.gmra.mrb[16].mxu0 %v8519_v46  ;;  %v8569_v45 = vld [vmem:[#allocation2 + $0x144] ss:$8 sps:$4 sm:$0xff]   ;;  %v8567_v46 = vld [vmem:[#allocation2 + $0x140] ss:$8 sps:$4 sm:$0xff]  }
 0x1e8   :  { %6913 = vmatpush3.bf16.msra.mxu1 %v9704_v17  ;;  %1003 = vmatprep.mubr.bf16.mxu1 %v8510_v47  ;;  %v8570_v47 = vld [vmem:[#allocation2 + $0x154] ss:$8 sps:$4 sm:$0xff]  }
 0x1e9   :  { %6914 = vmatprep.subr.bf16.mxu1 %v9722_v35  ;;  %869 = vmatprep.mubr.bf16.mxu0 %v8525_v50  ;;  %v8572_v50 = vld [vmem:[#allocation2 + $0x150] ss:$8 sps:$4 sm:$0xff]  }
 0x1ea   :  { %7558 = vmatpush3.bf16.msra.mxu0 %v8594_v9 }
 0x1eb   :  { %7559 = vmatprep.subr.bf16.mxu0 %v8595_v16 }
 0x1ec   :  { %6915 = vmatpush3.bf16.msra.mxu1 %v9706_v18 }
 0x1ed   :  { %6916 = vmatprep.subr.bf16.mxu1 %v9724_v12 }
 0x1ee   :  { %7560 = vmatpush3.bf16.msra.mxu0 %v8595_v16 }
 0x1ef   :  { %1004 = vmatmul.mubr.bf16.gmra.mrb[20].mxu1 %v8512_v51  ;;  %870 = vmatmul.mubr.bf16.gmra.mrb[20].mxu0 %v8527_v52  ;;  %v8573_v51 = vld [vmem:[#allocation2 + $0x164] ss:$8 sps:$4 sm:$0xff]   ;;  %v8575_v52 = vld [vmem:[#allocation2 + $0x160] ss:$8 sps:$4 sm:$0xff]  }
 0x1f0   :  { %6917 = vmatpush3.bf16.msra.mxu1 %v9708_v7  ;;  %1011 = vmatprep.mubr.bf16.mxu1 %v8513_v55  ;;  %v8576_v55 = vld [vmem:[#allocation2 + $0x174] ss:$8 sps:$4 sm:$0xff]  }
 0x1f1   :  { %6918 = vmatprep.subr.bf16.mxu1 %v9726_v32  ;;  %877 = vmatprep.mubr.bf16.mxu0 %v8531_v58  ;;  %v8578_v58 = vld [vmem:[#allocation2 + $0x170] ss:$8 sps:$4 sm:$0xff]  }
 0x1f2   :  { %7561 = vmatprep.subr.bf16.mxu0 %v8596_v15 }
 0x1f3   :  { %7562 = vmatpush3.bf16.msra.mxu0 %v8596_v15 }
 0x1f4   :  { %6919 = vmatpush3.bf16.msra.mxu1 %v9710_v25  ;;  %7563 = vmatprep.subr.bf16.mxu0 %v8597_v19 }
 0x1f5   :  { %6920 = vmatprep.subr.bf16.mxu1 %v9728_v36 }
 0x1f7   :  { %1012 = vmatmul.mubr.bf16.gmra.mrb[24].mxu1 %v8515_v60  ;;  %878 = vmatmul.mubr.bf16.gmra.mrb[24].mxu0 %v8533_v61  ;;  %v8581_v60 = vld [vmem:[#allocation2 + $0x184] ss:$8 sps:$4 sm:$0xff]   ;;  %v8579_v61 = vld [vmem:[#allocation2 + $0x180] ss:$8 sps:$4 sm:$0xff]  }
 0x1f8   :  { %6921 = vmatpush3.bf16.msra.mxu1 %v9712_v38  ;;  %1019 = vmatprep.mubr.bf16.mxu1 %v8516_v62  ;;  %v8582_v62 = vld [vmem:[#allocation2 + $0x194] ss:$8 sps:$4 sm:$0xff]  }
 0x1f9   :  { %6922 = vmatprep.subr.bf16.mxu1 %v9730_v41  ;;  %885 = vmatprep.mubr.bf16.mxu0 %v8537_v31  ;;  %v8584_v31 = vld [vmem:[#allocation2 + $0x190] ss:$8 sps:$4 sm:$0xff]  }
 0x1fa   :  { %7564 = vmatpush3.bf16.msra.mxu0 %v8597_v19 }
 0x1fb   :  { %7565 = vmatprep.subr.bf16.mxu0 %v8598_v29 }
 0x1fc   :  { %6923 = vmatpush3.bf16.msra.mxu1 %v9714_v26 }
 0x1fd   :  { %6924 = vmatprep.subr.bf16.mxu1 %v9468_v56 }
 0x1fe   :  { %7566 = vmatpush3.bf16.msra.mxu0 %v8598_v29 }
 0x1ff   :  { %1020 = vmatmul.mubr.bf16.gmra.mrb[28].mxu1 %v8518_v40  ;;  %886 = vmatmul.mubr.bf16.gmra.mrb[28].mxu0 %v8539_v22  ;;  %v8585_v40 = vld [vmem:[#allocation2 + $0x1a4] ss:$8 sps:$4 sm:$0xff]   ;;  %v8587_v22 = vld [vmem:[#allocation2 + $0x1a0] ss:$8 sps:$4 sm:$0xff]  }
 0x200   :  { %6925 = vmatpush3.bf16.msra.mxu1 %v9716_v8  ;;  %1356 = vmatprep.mubr.bf16.mxu1 %v8524_v24  ;;  %v8588_v24 = vld [vmem:[#allocation2 + $0x1b4] ss:$8 sps:$4 sm:$0xff]  }
 0x201   :  { %6926 = vmatprep.subr.bf16.mxu1 %v9732_v42  ;;  %7567 = vmatprep.subr.bf16.mxu0 %v8599_v33 }
 0x202   :  { %7568 = vmatpush3.bf16.msra.mxu0 %v8599_v33 }
 0x203   :  { %7569 = vmatprep.subr.bf16.mxu0 %v8600_v49 }
 0x204   :  { %6927 = vmatpush3.bf16.msra.mxu1 %v9718_v27 }
 0x205   :  { %6964 = vmatprep.subr.bf16.mxu1 %v9720_v11 }
 0x206   :  { %7570 = vmatpush3.bf16.msra.mxu0 %v8600_v49 }
 0x207   :  { %1357 = vmatmul.mubr.bf16.vlgmr.msra.gmra.mrb[32].mxu1 %v8522_v21  ;;  %7571 = vmatprep.subr.bf16.mxu0 %v8604_v2  ;;  %v8590_v21 = vld [vmem:[#allocation2 + $0x1b0] ss:$8 sps:$4 sm:$0xff]  }
 0x208   :  { %6965 = vmatpush3.bf16.msra.mxu1 %v9704_v17  ;;  %1364 = vmatprep.mubr.bf16.mxu1 %v8528_v23  ;;  %v8593_v23 = vld [vmem:[#allocation2 + $0x1c4] ss:$8 sps:$4 sm:$0xff]  }
 0x209   :  { %6966 = vmatprep.subr.bf16.mxu1 %v9722_v35 }
 0x20a   :  { %7572 = vmatpush3.bf16.msra.mxu0 %v8604_v2 }
 0x20b   :  { %7581 = vmatprep.subr.bf16.mxu0 %v9816_v53 }
 0x20c   :  { %6967 = vmatpush3.bf16.msra.mxu1 %v9706_v18 }
 0x20d   :  { %6968 = vmatprep.subr.bf16.mxu1 %v9724_v12 }
 0x20f   :  { %1365 = vmatmul.mubr.bf16.gmra.mrb[36].mxu1 %v8530_v1  ;;  %v8591_v1 = vld [vmem:[#allocation2 + $0x1c0] ss:$8 sps:$4 sm:$0xff]  }
 0x210   :  { %6969 = vmatpush3.bf16.msra.mxu1 %v9708_v7  ;;  %1372 = vmatprep.mubr.bf16.mxu1 %v8534_v39  ;;  %v8601_v39 = vld [vmem:[#allocation2 + $0x1d4] ss:$8 sps:$4 sm:$0xff]  }
 0x211   :  { %6970 = vmatprep.subr.bf16.mxu1 %v9726_v32 }
 0x214   :  { %6971 = vmatpush3.bf16.msra.mxu1 %v9710_v25 }
 0x215   :  { %6972 = vmatprep.subr.bf16.mxu1 %v9728_v36 }
 0x217   :  { %1373 = vmatmul.mubr.bf16.gmra.mrb[40].mxu1 %v8536_v44  ;;  %v8603_v44 = vld [vmem:[#allocation2 + $0x1d0] ss:$8 sps:$4 sm:$0xff]  }
 0x218   :  { %6973 = vmatpush3.bf16.msra.mxu1 %v9712_v38  ;;  %1380 = vmatprep.mubr.bf16.mxu1 %v8540_v37  ;;  %v8606_v37 = vld [vmem:[#allocation2 + $0x1e4] ss:$8 sps:$4 sm:$0xff]  }
 0x219   :  { %6974 = vmatprep.subr.bf16.mxu1 %v9730_v41 }
 0x21c   :  { %6975 = vmatpush3.bf16.msra.mxu1 %v9714_v26 }
 0x21d   :  { %6976 = vmatprep.subr.bf16.mxu1 %v9468_v56 }
 0x21f   :  { %1381 = vmatmul.mubr.bf16.gmra.mrb[44].mxu1 %v8542_v43  ;;  %v8608_v43 = vld [vmem:[#allocation2 + $0x1e0] ss:$8 sps:$4 sm:$0xff]  }
 0x220   :  { %6977 = vmatpush3.bf16.msra.mxu1 %v9716_v8  ;;  %1612 = vmatprep.mubr.bf16.mxu1 %v8545_v59 }
 0x221   :  { %6978 = vmatprep.subr.bf16.mxu1 %v9732_v42 }
 0x224   :  { %6979 = vmatpush3.bf16.msra.mxu1 %v9718_v27 }
 0x225   :  { %7016 = vmatprep.subr.bf16.mxu1 %v9720_v11 }
 0x227   :  { %1613 = vmatmul.mubr.bf16.vlgmr.msra.gmra.mrb[48].mxu1 %v8543_v0 }
 0x228   :  { %7017 = vmatpush3.bf16.msra.mxu1 %v9704_v17  ;;  %1620 = vmatprep.mubr.bf16.mxu1 %v8546_v57  ;;  %v8618_v57 = vld [vmem:[#allocation2 + $0x204] ss:$8 sps:$4 sm:$0xff]  }
 0x229   :  { %7018 = vmatprep.subr.bf16.mxu1 %v9722_v35 }
 0x22c   :  { %7019 = vmatpush3.bf16.msra.mxu1 %v9706_v18 }
 0x22d   :  { %7020 = vmatprep.subr.bf16.mxu1 %v9724_v12 }
 0x22f   :  { %1621 = vmatmul.mubr.bf16.gmra.mrb[52].mxu1 %v8548_v63 }
 0x230   :  { %7021 = vmatpush3.bf16.msra.mxu1 %v9708_v7  ;;  %1628 = vmatprep.mubr.bf16.mxu1 %v8549_v14 }
 0x231   :  { %7022 = vmatprep.subr.bf16.mxu1 %v9726_v32 }
 0x234   :  { %7023 = vmatpush3.bf16.msra.mxu1 %v9710_v25 }
 0x235   :  { %7024 = vmatprep.subr.bf16.mxu1 %v9728_v36 }
 0x237   :  { %1629 = vmatmul.mubr.bf16.gmra.mrb[56].mxu1 %v8551_v20  ;;  %v8616_v20 = vld [vmem:[#allocation2 + $0x200] ss:$8 sps:$4 sm:$0xff]  }
 0x238   :  { %7025 = vmatpush3.bf16.msra.mxu1 %v9712_v38  ;;  %1636 = vmatprep.mubr.bf16.mxu1 %v8552_v13 }
 0x239   :  { %7026 = vmatprep.subr.bf16.mxu1 %v9730_v41 }
 0x23c   :  { %7027 = vmatpush3.bf16.msra.mxu1 %v9714_v26 }
 0x23d   :  { %7028 = vmatprep.subr.bf16.mxu1 %v9468_v56 }
 0x23f   :  { %1637 = vmatmul.mubr.bf16.gmra.mrb[60].mxu1 %v8554_v34 }
 0x240   :  { %7029 = vmatpush3.bf16.msra.mxu1 %v9716_v8  ;;  %1868 = vmatprep.mubr.bf16.mxu1 %v8557_v28 }
 0x241   :  { %7030 = vmatprep.subr.bf16.mxu1 %v9732_v42 }
 0x244   :  { %7031 = vmatpush3.bf16.msra.mxu1 %v9718_v27 }
 0x245   :  { %7068 = vmatprep.subr.bf16.mxu1 %v9720_v11 }
 0x247   :  { %1869 = vmatmul.mubr.bf16.vlgmr.msra.gmra.mrb[64].mxu1 %v8555_v54 }
 0x248   :  { %7069 = vmatpush3.bf16.msra.mxu1 %v9704_v17  ;;  %1876 = vmatprep.mubr.bf16.mxu1 %v8558_v48  ;;  %v8609_v48 = vld [vmem:[#allocation5 + $0x8] sm:$0xff]  }
 0x249   :  { %7070 = vmatprep.subr.bf16.mxu1 %v9722_v35 }
 0x24c   :  { %7071 = vmatpush3.bf16.msra.mxu1 %v9706_v18 }
 0x24d   :  { %7072 = vmatprep.subr.bf16.mxu1 %v9724_v12 }
 0x24f   :  { %1877 = vmatmul.mubr.bf16.gmra.mrb[68].mxu1 %v8560_v10 }
 0x250   :  { %7073 = vmatpush3.bf16.msra.mxu1 %v9708_v7  ;;  %1884 = vmatprep.mubr.bf16.mxu1 %v8561_v3 }
 0x251   :  { %7074 = vmatprep.subr.bf16.mxu1 %v9726_v32 }
 0x254   :  { %7075 = vmatpush3.bf16.msra.mxu1 %v9710_v25 }
 0x255   :  { %7076 = vmatprep.subr.bf16.mxu1 %v9728_v36 }
 0x257   :  { %1885 = vmatmul.mubr.bf16.gmra.mrb[72].mxu1 %v8563_v4  ;;  %v8623_v4 = vld [vmem:[#allocation2 + $0x210] ss:$8 sps:$4 sm:$0xff]  }
 0x258   :  { %7077 = vmatpush3.bf16.msra.mxu1 %v9712_v38  ;;  %1892 = vmatprep.mubr.bf16.mxu1 %v8564_v30 }
 0x259   :  { %7078 = vmatprep.subr.bf16.mxu1 %v9730_v41 }
 0x25c   :  { %7079 = vmatpush3.bf16.msra.mxu1 %v9714_v26 }
 0x25d   :  { %7080 = vmatprep.subr.bf16.mxu1 %v9468_v56 }
 0x25f   :  { %1893 = vmatmul.mubr.bf16.gmra.mrb[76].mxu1 %v8566_v6 }
 0x260   :  { %7081 = vmatpush3.bf16.msra.mxu1 %v9716_v8  ;;  %2124 = vmatprep.mubr.bf16.mxu1 %v8569_v45 }
 0x261   :  { %7082 = vmatprep.subr.bf16.mxu1 %v9732_v42 }
 0x264   :  { %7083 = vmatpush3.bf16.msra.mxu1 %v9718_v27 }
 0x265   :  { %7120 = vmatprep.subr.bf16.mxu1 %v9720_v11 }
 0x267   :  { %2125 = vmatmul.mubr.bf16.vlgmr.msra.gmra.mrb[80].mxu1 %v8567_v46  ;;  %v8610_v46 = vld [vmem:[#allocation5 + $0x10] sm:$0xff]  }
 0x268   :  { %7121 = vmatpush3.bf16.msra.mxu1 %v9704_v17  ;;  %2132 = vmatprep.mubr.bf16.mxu1 %v8570_v47 }
 0x269   :  { %7122 = vmatprep.subr.bf16.mxu1 %v9722_v35 }
 0x26c   :  { %7123 = vmatpush3.bf16.msra.mxu1 %v9706_v18 }
 0x26d   :  { %7124 = vmatprep.subr.bf16.mxu1 %v9724_v12 }
 0x26f   :  { %2133 = vmatmul.mubr.bf16.gmra.mrb[84].mxu1 %v8572_v50  ;;  %v8626_v50 = vld [vmem:[#allocation2 + $0x224] ss:$8 sps:$4 sm:$0xff]  }
 0x270   :  { %7125 = vmatpush3.bf16.msra.mxu1 %v9708_v7  ;;  %2140 = vmatprep.mubr.bf16.mxu1 %v8573_v51 }
 0x271   :  { %7126 = vmatprep.subr.bf16.mxu1 %v9726_v32 }
 0x274   :  { %7127 = vmatpush3.bf16.msra.mxu1 %v9710_v25 }
 0x275   :  { %7128 = vmatprep.subr.bf16.mxu1 %v9728_v36 }
 0x277   :  { %2141 = vmatmul.mubr.bf16.gmra.mrb[88].mxu1 %v8575_v52 }
 0x278   :  { %7129 = vmatpush3.bf16.msra.mxu1 %v9712_v38  ;;  %2148 = vmatprep.mubr.bf16.mxu1 %v8576_v55 }
 0x279   :  { %7130 = vmatprep.subr.bf16.mxu1 %v9730_v41 }
 0x27c   :  { %7131 = vmatpush3.bf16.msra.mxu1 %v9714_v26 }
 0x27d   :  { %7132 = vmatprep.subr.bf16.mxu1 %v9468_v56 }
 0x27f   :  { %2149 = vmatmul.mubr.bf16.gmra.mrb[92].mxu1 %v8578_v58 }
 0x280   :  { %7133 = vmatpush3.bf16.msra.mxu1 %v9716_v8  ;;  %2380 = vmatprep.mubr.bf16.mxu1 %v8581_v60 }
 0x281   :  { %7134 = vmatprep.subr.bf16.mxu1 %v9732_v42 }
 0x284   :  { %7135 = vmatpush3.bf16.msra.mxu1 %v9718_v27 }
 0x285   :  { %7172 = vmatprep.subr.bf16.mxu1 %v9720_v11 }
 0x287   :  { %2381 = vmatmul.mubr.bf16.vlgmr.msra.gmra.mrb[96].mxu1 %v8579_v61  ;;  %v8614_v61 = vld [vmem:[#allocation5 + $0x18] sm:$0xff]  }
 0x288   :  { %7173 = vmatpush3.bf16.msra.mxu1 %v9704_v17  ;;  %2388 = vmatprep.mubr.bf16.mxu1 %v8582_v62 }
 0x289   :  { %7174 = vmatprep.subr.bf16.mxu1 %v9722_v35 }
 0x28c   :  { %7175 = vmatpush3.bf16.msra.mxu1 %v9706_v18 }
 0x28d   :  { %7176 = vmatprep.subr.bf16.mxu1 %v9724_v12 }
 0x28f   :  { %2389 = vmatmul.mubr.bf16.gmra.mrb[100].mxu1 %v8584_v31 }
 0x290   :  { %7177 = vmatpush3.bf16.msra.mxu1 %v9708_v7  ;;  %2396 = vmatprep.mubr.bf16.mxu1 %v8585_v40 }
 0x291   :  { %7178 = vmatprep.subr.bf16.mxu1 %v9726_v32 }
 0x294   :  { %7179 = vmatpush3.bf16.msra.mxu1 %v9710_v25 }
 0x295   :  { %7180 = vmatprep.subr.bf16.mxu1 %v9728_v36 }
 0x297   :  { %2397 = vmatmul.mubr.bf16.gmra.mrb[104].mxu1 %v8587_v22 }
 0x298   :  { %7181 = vmatpush3.bf16.msra.mxu1 %v9712_v38  ;;  %2404 = vmatprep.mubr.bf16.mxu1 %v8588_v24  ;;  %v8628_v24 = vld [vmem:[#allocation2 + $0x220] ss:$8 sps:$4 sm:$0xff]  }
 0x299   :  { %7182 = vmatprep.subr.bf16.mxu1 %v9730_v41 }
 0x29c   :  { %7183 = vmatpush3.bf16.msra.mxu1 %v9714_v26 }
 0x29d   :  { %7184 = vmatprep.subr.bf16.mxu1 %v9468_v56 }
 0x29f   :  { %2405 = vmatmul.mubr.bf16.gmra.mrb[108].mxu1 %v8590_v21 }
 0x2a0   :  { %7185 = vmatpush3.bf16.msra.mxu1 %v9716_v8  ;;  %2636 = vmatprep.mubr.bf16.mxu1 %v8593_v23 }
 0x2a1   :  { %7186 = vmatprep.subr.bf16.mxu1 %v9732_v42 }
 0x2a4   :  { %7187 = vmatpush3.bf16.msra.mxu1 %v9718_v27 }
 0x2a5   :  { %7224 = vmatprep.subr.bf16.mxu1 %v9720_v11  ;;  %v8611_v11 = vld [vmem:[#allocation2 + $0x1f4] ss:$8 sps:$4 sm:$0xff]  }
 0x2a7   :  { %2637 = vmatmul.mubr.bf16.vlgmr.msra.gmra.mrb[112].mxu1 %v8591_v1 }
 0x2a8   :  { %7225 = vmatpush3.bf16.msra.mxu1 %v9704_v17  ;;  %2644 = vmatprep.mubr.bf16.mxu1 %v8601_v39  ;;  %v8615_v39 = vld [vmem:[#allocation5 + $0x20] sm:$0xff]  }
 0x2a9   :  { %7226 = vmatprep.subr.bf16.mxu1 %v9722_v35 }
 0x2ac   :  { %7227 = vmatpush3.bf16.msra.mxu1 %v9706_v18 }
 0x2ad   :  { %7228 = vmatprep.subr.bf16.mxu1 %v9724_v12  ;;  %v8613_v12 = vld [vmem:[#allocation2 + $0x1f0] ss:$8 sps:$4 sm:$0xff]  }
 0x2af   :  { %2645 = vmatmul.mubr.bf16.gmra.mrb[116].mxu1 %v8603_v44 }
 0x2b0   :  { %7229 = vmatpush3.bf16.msra.mxu1 %v9708_v7  ;;  %2652 = vmatprep.mubr.bf16.mxu1 %v8606_v37 }
 0x2b1   :  { %7230 = vmatprep.subr.bf16.mxu1 %v9726_v32 }
 0x2b4   :  { %7231 = vmatpush3.bf16.msra.mxu1 %v9710_v25 }
 0x2b5   :  { %7232 = vmatprep.subr.bf16.mxu1 %v9728_v36 }
 0x2b7   :  { %2653 = vmatmul.mubr.bf16.gmra.mrb[120].mxu1 %v8608_v43  ;;  %v8631_v43 = vld [vmem:[#allocation2 + $0x234] ss:$8 sps:$4 sm:$0xff]  }
 0x2b8   :  { %7233 = vmatpush3.bf16.msra.mxu1 %v9712_v38  ;;  %2660 = vmatprep.mubr.bf16.mxu1 %v8611_v11 }
 0x2b9   :  { %7234 = vmatprep.subr.bf16.mxu1 %v9730_v41 }
 0x2ba   :  { %v6864_v17 = vpop.f32.mrb[16].mxu1  ;;  %v6824_v18 = vpop.f32.mrb[16].mxu0 }
 0x2bb   :  { %v6865_v35 = vpop.f32.mrb[17].mxu1  ;;  %v6825_v7 = vpop.f32.mrb[17].mxu0 }
 0x2bc   :  { %v6866_v59 = vadd.f32 %v6865_v35, %v6864_v17  ;;  %v6867_v0 = vpop.f32.mrb[18].mxu1  ;;  %7235 = vmatpush3.bf16.msra.mxu1 %v9714_v26  ;;  %v9877_v32 = vadd.f32 %v6825_v7, %v6824_v18  ;;  %v6827_v25 = vpop.f32.mrb[18].mxu0  ;;  %v8619_v7 = vld [vmem:[#allocation5 + $0x28] sm:$0xff]  }
 0x2bd   :  { %v6868_v36 = vpop.f32.mrb[19].mxu1  ;;  %7236 = vmatprep.subr.bf16.mxu1 %v9468_v56  ;;  %v6828_v38 = vpop.f32.mrb[19].mxu0 }
 0x2be   :  { %v6869_v9 = vadd.f32 %v6868_v36, %v6867_v0  ;;  %v9880_v63 = vadd.f32 %v6828_v38, %v6827_v25  ;;  %v8620_v36 = vld [vmem:[#allocation5 + $0x30] sm:$0xff]  }
 0x2bf   :  { %2661 = vmatmul.mubr.bf16.gmra.mrb[124].mxu1 %v8613_v12 }
 0x2c0   :  { %v1028_v41 = vpack.c.bf16 %v6869_v9, %v6866_v59  ;;  %7237 = vmatpush3.bf16.msra.mxu1 %v9716_v8  ;;  %v894_v14 = vpack.c.bf16 %v9880_v63, %v9877_v32  ;;  %2892 = vmatprep.mubr.bf16.mxu1 %v8618_v57  ;;  %v8621_v8 = vld [vmem:[#allocation2 + $0x214] ss:$8 sps:$4 sm:$0xff]   ;;  %v8633_v57 = vld [vmem:[#allocation2 + $0x230] ss:$8 sps:$4 sm:$0xff]  }
 0x2c1   :  { %7238 = vmatprep.subr.bf16.mxu1 %v9732_v42 }
 0x2c2   :  { %v6870_v26 = vpop.f32.mrb[20].mxu1  ;;  %7573 = vmatprep.mubr.bf16.mxu0 %v1028_v41  ;;  %v6830_v16 = vpop.f32.mrb[20].mxu0 }
 0x2c3   :  { %v6871_v15 = vpop.f32.mrb[21].mxu1  ;;  %v6831_v56 = vpop.f32.mrb[21].mxu0 }
 0x2c4   :  { %v6872_v13 = vadd.f32 %v6871_v15, %v6870_v26  ;;  %v6873_v19 = vpop.f32.mrb[22].mxu1  ;;  %7239 = vmatpush3.bf16.msra.mxu1 %v9718_v27  ;;  %v9887_v29 = vadd.f32 %v6831_v56, %v6830_v16  ;;  %v6833_v34 = vpop.f32.mrb[22].mxu0  ;;  %v8624_v16 = vld [vmem:[#allocation5 + $0x38] sm:$0xff]  }
 0x2c5   :  { %v6874_v28 = vpop.f32.mrb[23].mxu1  ;;  %v6834_v33 = vpop.f32.mrb[23].mxu0 }
 0x2c6   :  { %v6875_v49 = vadd.f32 %v6874_v28, %v6873_v19  ;;  %v9889_v54 = vadd.f32 %v6834_v33, %v6833_v34  ;;  %v8629_v34 = vld [vmem:[#allocation5 + $0x88] sm:$0xff]  }
 0x2c7   :  { %2893 = vmatmul.mubr.bf16.vlgmr.msra.gmra.mrb[128].mxu1 %v8616_v20 }
 0x2c8   :  { %v1029_v42 = vpack.c.bf16 %v6875_v49, %v6872_v13  ;;  %v895_v2 = vpack.c.bf16 %v9889_v54, %v9887_v29  ;;  %2900 = vmatprep.mubr.bf16.mxu1 %v8621_v8  ;;  %v8625_v13 = vld [vmem:[#allocation5 + $0x80] sm:$0xff]   ;;  %v8630_v49 = vld [vmem:[#allocation5 + $0x90] sm:$0xff]  }
 0x2c9   :  { %v8635_v54 = vld [vmem:[#allocation5 + $0xa0] sm:$0xff]  }
 0x2ca   :  { %7574 = vmatmul.mubr.bf16.vlgmr.msra.gmra.mrb[32].mxu0 %v1029_v42  ;;  %v6876_v10 = vpop.f32.mrb[24].mxu1  ;;  %v6836_v3 = vpop.f32.mrb[24].mxu0 }
 0x2cb   :  { %7582 = vmatpush3.bf16.msra.mxu0 %v9816_v53  ;;  %v6877_v27 = vpop.f32.mrb[25].mxu1  ;;  %v6837_v30 = vpop.f32.mrb[25].mxu0 }
 0x2cc   :  { %7583 = vmatprep.subr.bf16.mxu0 %v8609_v48  ;;  %v6878_v6 = vadd.f32 %v6877_v27, %v6876_v10  ;;  %v6879_v45 = vpop.f32.mrb[26].mxu1  ;;  %v9894_v47 = vadd.f32 %v6837_v30, %v6836_v3  ;;  %v6839_v51 = vpop.f32.mrb[26].mxu0  ;;  %v8634_v27 = vld [vmem:[#allocation5 + $0x98] sm:$0xff]  }
 0x2cd   :  { %v6880_v52 = vpop.f32.mrb[27].mxu1  ;;  %v6840_v55 = vpop.f32.mrb[27].mxu0 }
 0x2ce   :  { %v6881_v58 = vadd.f32 %v6880_v52, %v6879_v45  ;;  %v9896_v60 = vadd.f32 %v6840_v55, %v6839_v51  ;;  %v8637_v55 = vld [vmem:[#allocation5 + $0xb0] sm:$0xff]  }
 0x2cf   :  { %7584 = vmatpush3.bf16.msra.mxu0 %v8609_v48  ;;  %2901 = vmatmul.mubr.bf16.gmra.mrb[132].mxu1 %v8623_v4 }
 0x2d0   :  { %7585 = vmatprep.subr.bf16.mxu0 %v8610_v46  ;;  %v1030_v53 = vpack.c.bf16 %v6881_v58, %v6878_v6  ;;  %2908 = vmatprep.mubr.bf16.mxu1 %v8626_v50  ;;  %v896_v62 = vpack.c.bf16 %v9896_v60, %v9894_v47  ;;  %v8636_v47 = vld [vmem:[#allocation5 + $0xa8] sm:$0xff]  }
 0x2d2   :  { %v6882_v31 = vpop.f32.mrb[28].mxu1  ;;  %7577 = vmatprep.mubr.bf16.mxu0 %v1030_v53  ;;  %v6842_v40 = vpop.f32.mrb[28].mxu0 }
 0x2d3   :  { %7586 = vmatpush3.bf16.msra.mxu0 %v8610_v46  ;;  %v6883_v22 = vpop.f32.mrb[29].mxu1  ;;  %v6843_v21 = vpop.f32.mrb[29].mxu0 }
 0x2d4   :  { %7587 = vmatprep.subr.bf16.mxu0 %v8614_v61  ;;  %v6884_v23 = vadd.f32 %v6883_v22, %v6882_v31  ;;  %v6885_v1 = vpop.f32.mrb[30].mxu1  ;;  %v6844_v44 = vadd.f32 %v6843_v21, %v6842_v40  ;;  %v6845_v37 = vpop.f32.mrb[30].mxu0 }
 0x2d5   :  { %v6886_v11 = vpop.f32.mrb[31].mxu1  ;;  %v6846_v17 = vpop.f32.mrb[31].mxu0 }
 0x2d6   :  { %v6887_v18 = vadd.f32 %v6886_v11, %v6885_v1  ;;  %v6847_v35 = vadd.f32 %v6846_v17, %v6845_v37  ;;  %v8641_v17 = vld [vmem:[#allocation5 + $0xd0] sm:$0xff]  }
 0x2d7   :  { %7588 = vmatpush3.bf16.msra.mxu0 %v8614_v61  ;;  %2909 = vmatmul.mubr.bf16.gmra.mrb[136].mxu1 %v8628_v24  ;;  %v8639_v24 = vld [vmem:[#allocation5 + $0xc0] sm:$0xff]  }
 0x2d8   :  { %v1031_v12 = vpack.c.bf16 %v6887_v18, %v6884_v23  ;;  %7589 = vmatprep.subr.bf16.mxu0 %v8615_v39  ;;  %v897_v59 = vpack.c.bf16 %v6847_v35, %v6844_v44  ;;  %2916 = vmatprep.mubr.bf16.mxu1 %v8631_v43  ;;  %v8640_v44 = vld [vmem:[#allocation5 + $0xc8] sm:$0xff]  }
 0x2da   :  { %7578 = vmatmul.mubr.bf16.gmra.mrb[36].mxu0 %v1031_v12  ;;  %v6928_v0 = vpop.f32.mrb[32].mxu1 }
 0x2db   :  { %7590 = vmatpush3.bf16.msra.mxu0 %v8615_v39  ;;  %7597 = vmatprep.mubr.bf16.mxu0 %v894_v14  ;;  %v6929_v25 = vpop.f32.mrb[33].mxu1 }
 0x2dc   :  { %7591 = vmatprep.subr.bf16.mxu0 %v8619_v7  ;;  %v6930_v38 = vadd.f32 %v6929_v25, %v6928_v0  ;;  %v6931_v9 = vpop.f32.mrb[34].mxu1 }
 0x2dd   :  { %v6932_v41 = vpop.f32.mrb[35].mxu1 }
 0x2de   :  { %v6933_v26 = vadd.f32 %v6932_v41, %v6931_v9 }
 0x2df   :  { %7592 = vmatpush3.bf16.msra.mxu0 %v8619_v7  ;;  %2917 = vmatmul.mubr.bf16.gmra.mrb[140].mxu1 %v8633_v57 }
 0x2e0   :  { %7593 = vmatprep.subr.bf16.mxu0 %v8620_v36  ;;  %v1389_v15 = vpack.c.bf16 %v6933_v26, %v6930_v38 }
 0x2e2   :  { %v6934_v20 = vpop.f32.mrb[36].mxu1 }
 0x2e3   :  { %7594 = vmatpush3.bf16.msra.mxu0 %v8620_v36  ;;  %v6935_v56 = vpop.f32.mrb[37].mxu1  ;;  %v8643_v36 = vld [vmem:[#allocation5 + $0xe0] sm:$0xff]  }
 0x2e4   :  { %7595 = vmatprep.subr.bf16.mxu0 %v8624_v16  ;;  %v9903_v32 = vadd.f32 %v6935_v56, %v6934_v20  ;;  %v6937_v63 = vpop.f32.mrb[38].mxu1 }
 0x2e5   :  { %v6938_v14 = vpop.f32.mrb[39].mxu1 }
 0x2e6   :  { %v6939_v19 = vadd.f32 %v6938_v14, %v6937_v63 }
 0x2e7   :  { %7596 = vmatpush3.bf16.msra.mxu0 %v8624_v16  ;;  %v8644_v16 = vld [vmem:[#allocation5 + $0xe8] sm:$0xff]  }
 0x2e8   :  { %7605 = vmatprep.subr.bf16.mxu0 %v8625_v13  ;;  %v1390_v8 = vpack.c.bf16 %v6939_v19, %v9903_v32 }
 0x2ea   :  { %7598 = vmatmul.mubr.bf16.vlgmr.msra.gmra.mrb[32].mxu0 %v895_v2  ;;  %v6940_v28 = vpop.f32.mrb[40].mxu1 }
 0x2eb   :  { %7606 = vmatpush3.bf16.msra.mxu0 %v8625_v13  ;;  %7601 = vmatprep.mubr.bf16.mxu0 %v896_v62  ;;  %v6941_v33 = vpop.f32.mrb[41].mxu1  ;;  %v8638_v62 = vld [vmem:[#allocation5 + $0xb8] sm:$0xff]   ;;  %v8645_v13 = vld [vmem:[#allocation5 + $0xf0] sm:$0xff]  }
 0x2ec   :  { %7607 = vmatprep.subr.bf16.mxu0 %v8629_v34  ;;  %v6942_v42 = vadd.f32 %v6941_v33, %v6940_v28  ;;  %v6943_v48 = vpop.f32.mrb[42].mxu1 }
 0x2ed   :  { %v6944_v10 = vpop.f32.mrb[43].mxu1 }
 0x2ee   :  { %v6945_v3 = vadd.f32 %v6944_v10, %v6943_v48 }
 0x2ef   :  { %7608 = vmatpush3.bf16.msra.mxu0 %v8629_v34  ;;  %v8646_v34 = vld [vmem:[#allocation5 + $0xf8] sm:$0xff]  }
 0x2f0   :  { %7609 = vmatprep.subr.bf16.mxu0 %v8630_v49  ;;  %v1391_v4 = vpack.c.bf16 %v6945_v3, %v6942_v42 }
 0x2f2   :  { %7602 = vmatmul.mubr.bf16.gmra.mrb[36].mxu0 %v897_v59  ;;  %v6946_v30 = vpop.f32.mrb[44].mxu1  ;;  %v8642_v59 = vld [vmem:[#allocation5 + $0xd8] sm:$0xff]  }
 0x2f3   :  { %7610 = vmatpush3.bf16.msra.mxu0 %v8630_v49  ;;  %7621 = vmatprep.mubr.bf16.mxu0 %v1389_v15  ;;  %v6947_v29 = vpop.f32.mrb[45].mxu1  ;;  %v8647_v49 = vld [vmem:[#allocation5 + $0x100] sm:$0xff]  }
 0x2f4   :  { %7611 = vmatprep.subr.bf16.mxu0 %v8634_v27  ;;  %v6948_v2 = vadd.f32 %v6947_v29, %v6946_v30  ;;  %v6949_v6 = vpop.f32.mrb[46].mxu1 }
 0x2f5   :  { %v6950_v45 = vpop.f32.mrb[47].mxu1 }
 0x2f6   :  { %v6951_v46 = vadd.f32 %v6950_v45, %v6949_v6 }
 0x2f7   :  { %7612 = vmatpush3.bf16.msra.mxu0 %v8634_v27  ;;  %v8648_v27 = vld [vmem:[#allocation5 + $0x108] sm:$0xff]  }
 0x2f8   :  { %7613 = vmatprep.subr.bf16.mxu0 %v8635_v54  ;;  %v1392_v50 = vpack.c.bf16 %v6951_v46, %v6948_v2 }
 0x2fa   :  { %v6980_v51 = vpop.f32.mrb[48].mxu1 }
 0x2fb   :  { %7614 = vmatpush3.bf16.msra.mxu0 %v8635_v54  ;;  %v6981_v52 = vpop.f32.mrb[49].mxu1  ;;  %v8649_v54 = vld [vmem:[#allocation5 + $0x110] sm:$0xff]  }
 0x2fc   :  { %7615 = vmatprep.subr.bf16.mxu0 %v8636_v47  ;;  %v6982_v58 = vadd.f32 %v6981_v52, %v6980_v51  ;;  %v6983_v60 = vpop.f32.mrb[50].mxu1 }
 0x2fd   :  { %v6984_v53 = vpop.f32.mrb[51].mxu1 }
 0x2fe   :  { %v6985_v61 = vadd.f32 %v6984_v53, %v6983_v60 }
 0x2ff   :  { %7616 = vmatpush3.bf16.msra.mxu0 %v8636_v47  ;;  %v8650_v47 = vld [vmem:[#allocation5 + $0x118] sm:$0xff]  }
 0x300   :  { %7617 = vmatprep.subr.bf16.mxu0 %v8637_v55  ;;  %v1645_v31 = vpack.c.bf16 %v6985_v61, %v6982_v58 }
 0x302   :  { %v6986_v40 = vpop.f32.mrb[52].mxu1 }
 0x303   :  { %7618 = vmatpush3.bf16.msra.mxu0 %v8637_v55  ;;  %v6987_v22 = vpop.f32.mrb[53].mxu1  ;;  %v8651_v55 = vld [vmem:[#allocation5 + $0x120] sm:$0xff]  }
 0x304   :  { %7619 = vmatprep.subr.bf16.mxu0 %v8638_v62  ;;  %v9909_v21 = vadd.f32 %v6987_v22, %v6986_v40  ;;  %v6989_v23 = vpop.f32.mrb[54].mxu1 }
 0x305   :  { %v6990_v1 = vpop.f32.mrb[55].mxu1 }
 0x306   :  { %v6991_v39 = vadd.f32 %v6990_v1, %v6989_v23 }
 0x307   :  { %7620 = vmatpush3.bf16.msra.mxu0 %v8638_v62  ;;  %v8652_v62 = vld [vmem:[#allocation5 + $0x128] sm:$0xff]  }
 0x308   :  { %7629 = vmatprep.subr.bf16.mxu0 %v8639_v24  ;;  %v1646_v37 = vpack.c.bf16 %v6991_v39, %v9909_v21 }
 0x30a   :  { %7622 = vmatmul.mubr.bf16.vlgmr.msra.gmra.mrb[32].mxu0 %v1390_v8  ;;  %v6992_v43 = vpop.f32.mrb[56].mxu1 }
 0x30b   :  { %7625 = vmatprep.mubr.bf16.mxu0 %v1391_v4  ;;  %7630 = vmatpush3.bf16.msra.mxu0 %v8639_v24  ;;  %v6993_v11 = vpop.f32.mrb[57].mxu1  ;;  %v8653_v24 = vld [vmem:[#allocation5 + $0x130] sm:$0xff]  }
 0x30c   :  { %7631 = vmatprep.subr.bf16.mxu0 %v8640_v44  ;;  %v6994_v18 = vadd.f32 %v6993_v11, %v6992_v43  ;;  %v6995_v35 = vpop.f32.mrb[58].mxu1 }
 0x30d   :  { %v6996_v12 = vpop.f32.mrb[59].mxu1 }
 0x30e   :  { %v6997_v7 = vadd.f32 %v6996_v12, %v6995_v35 }
 0x30f   :  { %7632 = vmatpush3.bf16.msra.mxu0 %v8640_v44  ;;  %v8654_v44 = vld [vmem:[#allocation5 + $0x138] sm:$0xff]  }
 0x310   :  { %7633 = vmatprep.subr.bf16.mxu0 %v8641_v17  ;;  %v1647_v0 = vpack.c.bf16 %v6997_v7, %v6994_v18 }
 0x312   :  { %7626 = vmatmul.mubr.bf16.gmra.mrb[36].mxu0 %v1392_v50  ;;  %v6998_v25 = vpop.f32.mrb[60].mxu1 }
 0x313   :  { %7634 = vmatpush3.bf16.msra.mxu0 %v8641_v17  ;;  %7645 = vmatprep.mubr.bf16.mxu0 %v1645_v31  ;;  %v6999_v57 = vpop.f32.mrb[61].mxu1  ;;  %v8655_v17 = vld [vmem:[#allocation5 + $0x140] sm:$0xff]  }
 0x314   :  { %7635 = vmatprep.subr.bf16.mxu0 %v8642_v59  ;;  %v7000_v38 = vadd.f32 %v6999_v57, %v6998_v25  ;;  %v7001_v9 = vpop.f32.mrb[62].mxu1 }
 0x315   :  { %v7002_v41 = vpop.f32.mrb[63].mxu1 }
 0x316   :  { %v7003_v26 = vadd.f32 %v7002_v41, %v7001_v9 }
 0x317   :  { %7636 = vmatpush3.bf16.msra.mxu0 %v8642_v59  ;;  %v8656_v59 = vld [vmem:[#allocation5 + $0x148] sm:$0xff]  }
 0x318   :  { %7637 = vmatprep.subr.bf16.mxu0 %v8643_v36  ;;  %v1648_v15 = vpack.c.bf16 %v7003_v26, %v7000_v38 }
 0x31a   :  { %v7032_v20 = vpop.f32.mrb[64].mxu1 }
 0x31b   :  { %7638 = vmatpush3.bf16.msra.mxu0 %v8643_v36  ;;  %v7033_v56 = vpop.f32.mrb[65].mxu1  ;;  %v8657_v36 = vld [vmem:[#allocation5 + $0x150] sm:$0xff]  }
 0x31c   :  { %7639 = vmatprep.subr.bf16.mxu0 %v8644_v16  ;;  %v7034_v32 = vadd.f32 %v7033_v56, %v7032_v20  ;;  %v7035_v63 = vpop.f32.mrb[66].mxu1 }
 0x31d   :  { %v7036_v14 = vpop.f32.mrb[67].mxu1 }
 0x31e   :  { %v7037_v19 = vadd.f32 %v7036_v14, %v7035_v63 }
 0x31f   :  { %7640 = vmatpush3.bf16.msra.mxu0 %v8644_v16  ;;  %v8658_v16 = vld [vmem:[#allocation5 + $0x158] sm:$0xff]  }
 0x320   :  { %7641 = vmatprep.subr.bf16.mxu0 %v8645_v13  ;;  %v1901_v8 = vpack.c.bf16 %v7037_v19, %v7034_v32 }
 0x322   :  { %v7038_v28 = vpop.f32.mrb[68].mxu1 }
 0x323   :  { %7642 = vmatpush3.bf16.msra.mxu0 %v8645_v13  ;;  %v7039_v33 = vpop.f32.mrb[69].mxu1  ;;  %v8659_v13 = vld [vmem:[#allocation5 + $0x160] sm:$0xff]  }
 0x324   :  { %7643 = vmatprep.subr.bf16.mxu0 %v8646_v34  ;;  %v9912_v42 = vadd.f32 %v7039_v33, %v7038_v28  ;;  %v7041_v48 = vpop.f32.mrb[70].mxu1 }
 0x325   :  { %v7042_v10 = vpop.f32.mrb[71].mxu1 }
 0x326   :  { %v7043_v3 = vadd.f32 %v7042_v10, %v7041_v48 }
 0x327   :  { %7644 = vmatpush3.bf16.msra.mxu0 %v8646_v34  ;;  %v8660_v34 = vld [vmem:[#allocation5 + $0x168] sm:$0xff]  }
 0x328   :  { %7653 = vmatprep.subr.bf16.mxu0 %v8647_v49  ;;  %v1902_v4 = vpack.c.bf16 %v7043_v3, %v9912_v42 }
 0x32a   :  { %7646 = vmatmul.mubr.bf16.vlgmr.msra.gmra.mrb[32].mxu0 %v1646_v37  ;;  %v7044_v30 = vpop.f32.mrb[72].mxu1 }
 0x32b   :  { %7649 = vmatprep.mubr.bf16.mxu0 %v1647_v0  ;;  %7654 = vmatpush3.bf16.msra.mxu0 %v8647_v49  ;;  %v7045_v29 = vpop.f32.mrb[73].mxu1  ;;  %v8661_v49 = vld [vmem:[#allocation5 + $0x170] sm:$0xff]  }
 0x32c   :  { %7655 = vmatprep.subr.bf16.mxu0 %v8648_v27  ;;  %v7046_v2 = vadd.f32 %v7045_v29, %v7044_v30  ;;  %v7047_v6 = vpop.f32.mrb[74].mxu1 }
 0x32d   :  { %v7048_v45 = vpop.f32.mrb[75].mxu1 }
 0x32e   :  { %v7049_v46 = vadd.f32 %v7048_v45, %v7047_v6 }
 0x32f   :  { %7656 = vmatpush3.bf16.msra.mxu0 %v8648_v27  ;;  %v8662_v27 = vld [vmem:[#allocation5 + $0x178] sm:$0xff]  }
 0x330   :  { %7657 = vmatprep.subr.bf16.mxu0 %v8649_v54  ;;  %v1903_v50 = vpack.c.bf16 %v7049_v46, %v7046_v2 }
 0x332   :  { %7650 = vmatmul.mubr.bf16.gmra.mrb[36].mxu0 %v1648_v15  ;;  %v7050_v51 = vpop.f32.mrb[76].mxu1 }
 0x333   :  { %7658 = vmatpush3.bf16.msra.mxu0 %v8649_v54  ;;  %7669 = vmatprep.mubr.bf16.mxu0 %v1901_v8  ;;  %v7051_v52 = vpop.f32.mrb[77].mxu1  ;;  %v8663_v54 = vld [vmem:[#allocation5 + $0x180] sm:$0xff]  }
 0x334   :  { %7659 = vmatprep.subr.bf16.mxu0 %v8650_v47  ;;  %v7052_v58 = vadd.f32 %v7051_v52, %v7050_v51  ;;  %v7053_v60 = vpop.f32.mrb[78].mxu1 }
 0x335   :  { %v7054_v53 = vpop.f32.mrb[79].mxu1 }
 0x336   :  { %v7055_v61 = vadd.f32 %v7054_v53, %v7053_v60 }
 0x337   :  { %7660 = vmatpush3.bf16.msra.mxu0 %v8650_v47  ;;  %v8664_v47 = vld [vmem:[#allocation5 + $0x188] sm:$0xff]  }
 0x338   :  { %7661 = vmatprep.subr.bf16.mxu0 %v8651_v55  ;;  %v1904_v31 = vpack.c.bf16 %v7055_v61, %v7052_v58 }
 0x33a   :  { %v7084_v40 = vpop.f32.mrb[80].mxu1 }
 0x33b   :  { %7662 = vmatpush3.bf16.msra.mxu0 %v8651_v55  ;;  %v7085_v22 = vpop.f32.mrb[81].mxu1  ;;  %v8665_v55 = vld [vmem:[#allocation5 + $0x190] sm:$0xff]  }
 0x33c   :  { %7663 = vmatprep.subr.bf16.mxu0 %v8652_v62  ;;  %v7086_v21 = vadd.f32 %v7085_v22, %v7084_v40  ;;  %v7087_v23 = vpop.f32.mrb[82].mxu1 }
 0x33d   :  { %v7088_v1 = vpop.f32.mrb[83].mxu1 }
 0x33e   :  { %v7089_v39 = vadd.f32 %v7088_v1, %v7087_v23 }
 0x33f   :  { %7664 = vmatpush3.bf16.msra.mxu0 %v8652_v62  ;;  %v8666_v62 = vld [vmem:[#allocation5 + $0x198] sm:$0xff]  }
 0x340   :  { %7665 = vmatprep.subr.bf16.mxu0 %v8653_v24  ;;  %v2157_v37 = vpack.c.bf16 %v7089_v39, %v7086_v21 }
 0x342   :  { %v7090_v43 = vpop.f32.mrb[84].mxu1 }
 0x343   :  { %7666 = vmatpush3.bf16.msra.mxu0 %v8653_v24  ;;  %v7091_v11 = vpop.f32.mrb[85].mxu1  ;;  %v8667_v24 = vld [vmem:[#allocation5 + $0x1a0] sm:$0xff]  }
 0x344   :  { %7667 = vmatprep.subr.bf16.mxu0 %v8654_v44  ;;  %v9915_v18 = vadd.f32 %v7091_v11, %v7090_v43  ;;  %v7093_v35 = vpop.f32.mrb[86].mxu1 }
 0x345   :  { %v7094_v12 = vpop.f32.mrb[87].mxu1 }
 0x346   :  { %v7095_v7 = vadd.f32 %v7094_v12, %v7093_v35 }
 0x347   :  { %7668 = vmatpush3.bf16.msra.mxu0 %v8654_v44  ;;  %v8668_v44 = vld [vmem:[#allocation5 + $0x1a8] sm:$0xff]  }
 0x348   :  { %7677 = vmatprep.subr.bf16.mxu0 %v8655_v17  ;;  %v2158_v0 = vpack.c.bf16 %v7095_v7, %v9915_v18 }
 0x34a   :  { %7670 = vmatmul.mubr.bf16.vlgmr.msra.gmra.mrb[32].mxu0 %v1902_v4  ;;  %v7096_v25 = vpop.f32.mrb[88].mxu1 }
 0x34b   :  { %7673 = vmatprep.mubr.bf16.mxu0 %v1903_v50  ;;  %7678 = vmatpush3.bf16.msra.mxu0 %v8655_v17  ;;  %v7097_v57 = vpop.f32.mrb[89].mxu1  ;;  %v8669_v17 = vld [vmem:[#allocation5 + $0x1b0] sm:$0xff]  }
 0x34c   :  { %7679 = vmatprep.subr.bf16.mxu0 %v8656_v59  ;;  %v7098_v38 = vadd.f32 %v7097_v57, %v7096_v25  ;;  %v7099_v9 = vpop.f32.mrb[90].mxu1 }
 0x34d   :  { %v7100_v41 = vpop.f32.mrb[91].mxu1 }
 0x34e   :  { %v7101_v26 = vadd.f32 %v7100_v41, %v7099_v9 }
 0x34f   :  { %7680 = vmatpush3.bf16.msra.mxu0 %v8656_v59  ;;  %v8670_v59 = vld [vmem:[#allocation5 + $0x1b8] sm:$0xff]  }
 0x350   :  { %7681 = vmatprep.subr.bf16.mxu0 %v8657_v36  ;;  %v2159_v15 = vpack.c.bf16 %v7101_v26, %v7098_v38 }
 0x352   :  { %7674 = vmatmul.mubr.bf16.gmra.mrb[36].mxu0 %v1904_v31  ;;  %v7102_v20 = vpop.f32.mrb[92].mxu1 }
 0x353   :  { %7682 = vmatpush3.bf16.msra.mxu0 %v8657_v36  ;;  %7693 = vmatprep.mubr.bf16.mxu0 %v2157_v37  ;;  %v7103_v56 = vpop.f32.mrb[93].mxu1  ;;  %v8671_v36 = vld [vmem:[#allocation5 + $0x1c0] sm:$0xff]  }
 0x354   :  { %7683 = vmatprep.subr.bf16.mxu0 %v8658_v16  ;;  %v7104_v32 = vadd.f32 %v7103_v56, %v7102_v20  ;;  %v7105_v63 = vpop.f32.mrb[94].mxu1 }
 0x355   :  { %v7106_v14 = vpop.f32.mrb[95].mxu1 }
 0x356   :  { %v7107_v19 = vadd.f32 %v7106_v14, %v7105_v63 }
 0x357   :  { %7684 = vmatpush3.bf16.msra.mxu0 %v8658_v16  ;;  %v8672_v16 = vld [vmem:[#allocation5 + $0x1c8] sm:$0xff]  }
 0x358   :  { %7685 = vmatprep.subr.bf16.mxu0 %v8659_v13  ;;  %v2160_v8 = vpack.c.bf16 %v7107_v19, %v7104_v32 }
 0x35a   :  { %v7136_v28 = vpop.f32.mrb[96].mxu1 }
 0x35b   :  { %7686 = vmatpush3.bf16.msra.mxu0 %v8659_v13  ;;  %v7137_v33 = vpop.f32.mrb[97].mxu1  ;;  %v8673_v13 = vld [vmem:[#allocation5 + $0x1d0] sm:$0xff]  }
 0x35c   :  { %7687 = vmatprep.subr.bf16.mxu0 %v8660_v34  ;;  %v7138_v42 = vadd.f32 %v7137_v33, %v7136_v28  ;;  %v7139_v48 = vpop.f32.mrb[98].mxu1 }
 0x35d   :  { %v7140_v10 = vpop.f32.mrb[99].mxu1 }
 0x35e   :  { %v7141_v3 = vadd.f32 %v7140_v10, %v7139_v48 }
 0x35f   :  { %7688 = vmatpush3.bf16.msra.mxu0 %v8660_v34  ;;  %v8674_v34 = vld [vmem:[#allocation5 + $0x1d8] sm:$0xff]  }
 0x360   :  { %7689 = vmatprep.subr.bf16.mxu0 %v8661_v49  ;;  %v2413_v4 = vpack.c.bf16 %v7141_v3, %v7138_v42 }
 0x362   :  { %v7142_v30 = vpop.f32.mrb[100].mxu1 }
 0x363   :  { %7690 = vmatpush3.bf16.msra.mxu0 %v8661_v49  ;;  %v7143_v29 = vpop.f32.mrb[101].mxu1  ;;  %v8675_v49 = vld [vmem:[#allocation5 + $0x1e0] sm:$0xff]  }
 0x364   :  { %7691 = vmatprep.subr.bf16.mxu0 %v8662_v27  ;;  %v9918_v2 = vadd.f32 %v7143_v29, %v7142_v30  ;;  %v7145_v6 = vpop.f32.mrb[102].mxu1 }
 0x365   :  { %v7146_v45 = vpop.f32.mrb[103].mxu1 }
 0x366   :  { %v7147_v46 = vadd.f32 %v7146_v45, %v7145_v6 }
 0x367   :  { %7692 = vmatpush3.bf16.msra.mxu0 %v8662_v27  ;;  %v8676_v27 = vld [vmem:[#allocation5 + $0x1e8] sm:$0xff]  }
 0x368   :  { %7701 = vmatprep.subr.bf16.mxu0 %v8663_v54  ;;  %v2414_v50 = vpack.c.bf16 %v7147_v46, %v9918_v2 }
 0x36a   :  { %7694 = vmatmul.mubr.bf16.vlgmr.msra.gmra.mrb[32].mxu0 %v2158_v0  ;;  %v7148_v51 = vpop.f32.mrb[104].mxu1 }
 0x36b   :  { %7697 = vmatprep.mubr.bf16.mxu0 %v2159_v15  ;;  %7702 = vmatpush3.bf16.msra.mxu0 %v8663_v54  ;;  %v7149_v52 = vpop.f32.mrb[105].mxu1  ;;  %v8677_v54 = vld [vmem:[#allocation5 + $0x1f0] sm:$0xff]  }
 0x36c   :  { %7703 = vmatprep.subr.bf16.mxu0 %v8664_v47  ;;  %v7150_v58 = vadd.f32 %v7149_v52, %v7148_v51  ;;  %v7151_v60 = vpop.f32.mrb[106].mxu1 }
 0x36d   :  { %v7152_v53 = vpop.f32.mrb[107].mxu1 }
 0x36e   :  { %v7153_v61 = vadd.f32 %v7152_v53, %v7151_v60 }
 0x36f   :  { %7704 = vmatpush3.bf16.msra.mxu0 %v8664_v47  ;;  %v8678_v47 = vld [vmem:[#allocation5 + $0x1f8] sm:$0xff]  }
 0x370   :  { %7705 = vmatprep.subr.bf16.mxu0 %v8665_v55  ;;  %v2415_v31 = vpack.c.bf16 %v7153_v61, %v7150_v58 }
 0x372   :  { %7698 = vmatmul.mubr.bf16.gmra.mrb[36].mxu0 %v2160_v8  ;;  %v7154_v40 = vpop.f32.mrb[108].mxu1 }
 0x373   :  { %7706 = vmatpush3.bf16.msra.mxu0 %v8665_v55  ;;  %7717 = vmatprep.mubr.bf16.mxu0 %v2413_v4  ;;  %v7155_v22 = vpop.f32.mrb[109].mxu1  ;;  %v8679_v55 = vld [vmem:[#allocation5 + $0x200] sm:$0xff]  }
 0x374   :  { %7707 = vmatprep.subr.bf16.mxu0 %v8666_v62  ;;  %v7156_v21 = vadd.f32 %v7155_v22, %v7154_v40  ;;  %v7157_v23 = vpop.f32.mrb[110].mxu1 }
 0x375   :  { %v7158_v1 = vpop.f32.mrb[111].mxu1 }
 0x376   :  { %v7159_v39 = vadd.f32 %v7158_v1, %v7157_v23 }
 0x377   :  { %7708 = vmatpush3.bf16.msra.mxu0 %v8666_v62  ;;  %v8680_v62 = vld [vmem:[#allocation5 + $0x208] sm:$0xff]  }
 0x378   :  { %7709 = vmatprep.subr.bf16.mxu0 %v8667_v24  ;;  %v2416_v37 = vpack.c.bf16 %v7159_v39, %v7156_v21 }
 0x37a   :  { %v7188_v43 = vpop.f32.mrb[112].mxu1 }
 0x37b   :  { %7710 = vmatpush3.bf16.msra.mxu0 %v8667_v24  ;;  %v7189_v11 = vpop.f32.mrb[113].mxu1  ;;  %v8681_v24 = vld [vmem:[#allocation5 + $0x210] sm:$0xff]  }
 0x37c   :  { %7711 = vmatprep.subr.bf16.mxu0 %v8668_v44  ;;  %v7190_v18 = vadd.f32 %v7189_v11, %v7188_v43  ;;  %v7191_v35 = vpop.f32.mrb[114].mxu1 }
 0x37d   :  { %v7192_v12 = vpop.f32.mrb[115].mxu1 }
 0x37e   :  { %v7193_v7 = vadd.f32 %v7192_v12, %v7191_v35 }
 0x37f   :  { %7712 = vmatpush3.bf16.msra.mxu0 %v8668_v44  ;;  %v8682_v44 = vld [vmem:[#allocation5 + $0x218] sm:$0xff]  }
 0x380   :  { %7713 = vmatprep.subr.bf16.mxu0 %v8669_v17  ;;  %v2669_v0 = vpack.c.bf16 %v7193_v7, %v7190_v18 }
 0x382   :  { %v7194_v25 = vpop.f32.mrb[116].mxu1 }
 0x383   :  { %7714 = vmatpush3.bf16.msra.mxu0 %v8669_v17  ;;  %v7195_v57 = vpop.f32.mrb[117].mxu1  ;;  %v8683_v17 = vld [vmem:[#allocation5 + $0x220] sm:$0xff]  }
 0x384   :  { %7715 = vmatprep.subr.bf16.mxu0 %v8670_v59  ;;  %v9921_v38 = vadd.f32 %v7195_v57, %v7194_v25  ;;  %v7197_v9 = vpop.f32.mrb[118].mxu1  ;;  %v8685_v25 = vld [vmem:[#allocation5 + $0x230] sm:$0xff]   ;;  %v8686_v57 = vld [vmem:[#allocation5 + $0x238] sm:$0xff]  }
 0x385   :  { %v7198_v41 = vpop.f32.mrb[119].mxu1 }
 0x386   :  { %v7199_v26 = vadd.f32 %v7198_v41, %v7197_v9 }
 0x387   :  { %7716 = vmatpush3.bf16.msra.mxu0 %v8670_v59  ;;  %v8684_v59 = vld [vmem:[#allocation5 + $0x228] sm:$0xff]  }
 0x388   :  { %7725 = vmatprep.subr.bf16.mxu0 %v8671_v36  ;;  %v2670_v15 = vpack.c.bf16 %v7199_v26, %v9921_v38 }
 0x38a   :  { %7718 = vmatmul.mubr.bf16.vlgmr.msra.gmra.mrb[32].mxu0 %v2414_v50  ;;  %v7200_v20 = vpop.f32.mrb[120].mxu1 }
 0x38b   :  { %7721 = vmatprep.mubr.bf16.mxu0 %v2415_v31  ;;  %7726 = vmatpush3.bf16.msra.mxu0 %v8671_v36  ;;  %v7201_v56 = vpop.f32.mrb[121].mxu1  ;;  %v9014_v36 = vmov 0.0  }
 0x38c   :  { %7727 = vmatprep.subr.bf16.mxu0 %v8672_v16  ;;  %v7202_v32 = vadd.f32 %v7201_v56, %v7200_v20  ;;  %v7203_v63 = vpop.f32.mrb[122].mxu1  ;;  %7785 = vmatprep.subr.bf16.mxu1 %v9014_v36 }
 0x38d   :  { %v7204_v14 = vpop.f32.mrb[123].mxu1  ;;  %7793 = vmatprep.mubr.msk.bf16.mxu1 %vm9015_vm0, %v9014_v36 }
 0x38e   :  { %v7205_v19 = vadd.f32 %v7204_v14, %v7203_v63 }
 0x38f   :  { %7728 = vmatpush3.bf16.msra.mxu0 %v8672_v16 }
 0x390   :  { %7729 = vmatprep.subr.bf16.mxu0 %v8673_v13  ;;  %v2671_v8 = vpack.c.bf16 %v7205_v19, %v7202_v32 }
 0x392   :  { %7722 = vmatmul.mubr.bf16.gmra.mrb[36].mxu0 %v2416_v37  ;;  %v7206_v28 = vpop.f32.mrb[124].mxu1 }
 0x393   :  { %7730 = vmatpush3.bf16.msra.mxu0 %v8673_v13  ;;  %7741 = vmatprep.mubr.bf16.mxu0 %v2669_v0  ;;  %v7207_v33 = vpop.f32.mrb[125].mxu1 }
 0x394   :  { %7731 = vmatprep.subr.bf16.mxu0 %v8674_v34  ;;  %v7208_v42 = vadd.f32 %v7207_v33, %v7206_v28  ;;  %v7209_v48 = vpop.f32.mrb[126].mxu1 }
 0x395   :  { %v7210_v10 = vpop.f32.mrb[127].mxu1 }
 0x396   :  { %v7211_v3 = vadd.f32 %v7210_v10, %v7209_v48 }
 0x397   :  { %7732 = vmatpush3.bf16.msra.mxu0 %v8674_v34 }
 0x398   :  { %7733 = vmatprep.subr.bf16.mxu0 %v8675_v49  ;;  %v2672_v4 = vpack.c.bf16 %v7211_v3, %v7208_v42 }
 0x39a   :  { %v7240_v30 = vpop.f32.mrb[128].mxu1 }
 0x39b   :  { %7734 = vmatpush3.bf16.msra.mxu0 %v8675_v49  ;;  %v7241_v29 = vpop.f32.mrb[129].mxu1 }
 0x39c   :  { %7735 = vmatprep.subr.bf16.mxu0 %v8676_v27  ;;  %v7242_v2 = vadd.f32 %v7241_v29, %v7240_v30  ;;  %v7243_v6 = vpop.f32.mrb[130].mxu1 }
 0x39d   :  { %v7244_v45 = vpop.f32.mrb[131].mxu1 }
 0x39e   :  { %v7245_v46 = vadd.f32 %v7244_v45, %v7243_v6 }
 0x39f   :  { %7736 = vmatpush3.bf16.msra.mxu0 %v8676_v27 }
 0x3a0   :  { %7737 = vmatprep.subr.bf16.mxu0 %v8677_v54  ;;  %v2925_v50 = vpack.c.bf16 %v7245_v46, %v7242_v2 }
 0x3a2   :  { %v7246_v51 = vpop.f32.mrb[132].mxu1 }
 0x3a3   :  { %7738 = vmatpush3.bf16.msra.mxu0 %v8677_v54  ;;  %v7247_v52 = vpop.f32.mrb[133].mxu1 }
 0x3a4   :  { %7739 = vmatprep.subr.bf16.mxu0 %v8678_v47  ;;  %v7248_v58 = vadd.f32 %v7247_v52, %v7246_v51  ;;  %v7249_v60 = vpop.f32.mrb[134].mxu1 }
 0x3a5   :  { %v7250_v53 = vpop.f32.mrb[135].mxu1 }
 0x3a6   :  { %v7251_v61 = vadd.f32 %v7250_v53, %v7249_v60 }
 0x3a7   :  { %7740 = vmatpush3.bf16.msra.mxu0 %v8678_v47 }
 0x3a8   :  { %7749 = vmatprep.subr.bf16.mxu0 %v8679_v55  ;;  %v2926_v31 = vpack.c.bf16 %v7251_v61, %v7248_v58 }
 0x3aa   :  { %7742 = vmatmul.mubr.bf16.vlgmr.msra.gmra.mrb[32].mxu0 %v2670_v15  ;;  %v7252_v40 = vpop.f32.mrb[136].mxu1 }
 0x3ab   :  { %7745 = vmatprep.mubr.bf16.mxu0 %v2671_v8  ;;  %7750 = vmatpush3.bf16.msra.mxu0 %v8679_v55  ;;  %v7253_v22 = vpop.f32.mrb[137].mxu1 }
 0x3ac   :  { %7751 = vmatprep.subr.bf16.mxu0 %v8680_v62  ;;  %v7254_v21 = vadd.f32 %v7253_v22, %v7252_v40  ;;  %v7255_v23 = vpop.f32.mrb[138].mxu1 }
 0x3ad   :  { %v7256_v1 = vpop.f32.mrb[139].mxu1 }
 0x3ae   :  { %v7257_v39 = vadd.f32 %v7256_v1, %v7255_v23 }
 0x3af   :  { %7752 = vmatpush3.bf16.msra.mxu0 %v8680_v62 }
 0x3b0   :  { %7753 = vmatprep.subr.bf16.mxu0 %v8681_v24  ;;  %v2927_v37 = vpack.c.bf16 %v7257_v39, %v7254_v21 }
 0x3b2   :  { %7746 = vmatmul.mubr.bf16.gmra.mrb[36].mxu0 %v2672_v4  ;;  %v7258_v43 = vpop.f32.mrb[140].mxu1 }
 0x3b3   :  { %7754 = vmatpush3.bf16.msra.mxu0 %v8681_v24  ;;  %7765 = vmatprep.mubr.bf16.mxu0 %v2925_v50  ;;  %v7259_v11 = vpop.f32.mrb[141].mxu1 }
 0x3b4   :  { %7755 = vmatprep.subr.bf16.mxu0 %v8682_v44  ;;  %v7260_v18 = vadd.f32 %v7259_v11, %v7258_v43  ;;  %v7261_v35 = vpop.f32.mrb[142].mxu1 }
 0x3b5   :  { %v7262_v12 = vpop.f32.mrb[143].mxu1 }
 0x3b6   :  { %v7263_v7 = vadd.f32 %v7262_v12, %v7261_v35  ;;  %v3105_v35 = vld [vmem:[%s10492_s11 + $0x1] sm:$0x1] }
 0x3b7   :  { %7756 = vmatpush3.bf16.msra.mxu0 %v8682_v44 }
 0x3b8   :  { %7757 = vmatprep.subr.bf16.mxu0 %v8683_v17  ;;  %v2928_v0 = vpack.c.bf16 %v7263_v7, %v7260_v18 }
 0x3bb   :  { %7758 = vmatpush3.bf16.msra.mxu0 %v8683_v17 }
 0x3bc   :  { %7759 = vmatprep.subr.bf16.mxu0 %v8684_v59 }
 0x3bf   :  { %7760 = vmatpush3.bf16.msra.mxu0 %v8684_v59 }
 0x3c0   :  { %7761 = vmatprep.subr.bf16.mxu0 %v8685_v25 }
 0x3c3   :  { %7762 = vmatpush3.bf16.msra.mxu0 %v8685_v25 }
 0x3c4   :  { %7763 = vmatprep.subr.bf16.mxu0 %v8686_v57 }
 0x3c7   :  { %7764 = vmatpush3.bf16.msra.mxu0 %v8686_v57 }
 0x3c8   :  { %7773 = vmatprep.subr.bf16.mxu0 %v9014_v36 }
 0x3ca   :  { %7766 = vmatmul.mubr.bf16.vlgmr.msra.gmra.mrb[32].mxu0 %v2926_v31 }
 0x3cb   :  { %7769 = vmatprep.mubr.bf16.mxu0 %v2927_v37 }
 0x3d2   :  { %7770 = vmatmul.mubr.bf16.gmra.mrb[36].mxu0 %v2928_v0  ;;  %v6573_v0 = vld [vmem:[%s10493_s12 + $0x1] ss:$0 sm:$0xff] }
 0x3d3   :  { %7781 = vmatprep.mubr.msk.bf16.mxu0 %vm9015_vm0, %v9014_v36 }
 0x49d   :  { %v9930_v38 = vpop.f32.mrb[32].mxu0 }
 0x49e   :  { %v3028_v9 = vpop.f32.mrb[33].mxu0  ;;  %v3082_v56 = vmul.f32 %v9930_v38, %v9930_v38 }
 0x49f   :  { %v9932_v41 = vpop.f32.mrb[34].mxu0  ;;  %v3080_v16 = vmul.f32 %v3028_v9, %v3028_v9 }
 0x4a0   :  { %v3031_v26 = vpop.f32.mrb[35].mxu0  ;;  %v3083_v63 = vmul.f32 %v9932_v41, %v9932_v41 }
 0x4a1   :  { %v3067_v15 = vadd.f32 %v3031_v26, %v3028_v9  ;;  %v3081_v20 = vmul.f32 %v3031_v26, %v3031_v26 }
 0x4a3   :  { %v3068_v13 = vadd.f32 %v9930_v38, %v3067_v15  ;;  %v3088_v32 = vadd.f32 %v3081_v20, %v3080_v16 }
 0x4a5   :  { %v3089_v14 = vadd.f32 %v3088_v32, %v3082_v56  ;;  %v7771_v19 = vpop.f32.mrb[36].mxu0  ;;  %v3069_v34 = vadd.f32 %v9932_v41, %v3068_v13 }
 0x4a6   :  { %v3044_v8 = vpop.f32.mrb[37].mxu0  ;;  %v3086_v4 = vmul.f32 %v7771_v19, %v7771_v19 }
 0x4a7   :  { %v3070_v28 = vadd.f32 %v3069_v34, %v3044_v8  ;;  %v3084_v33 = vmul.f32 %v3044_v8, %v3044_v8  ;;  %v3090_v49 = vadd.f32 %v3089_v14, %v3083_v63  ;;  %v7772_v42 = vpop.f32.mrb[38].mxu0 }
 0x4a8   :  { %v3047_v48 = vpop.f32.mrb[39].mxu0  ;;  %v3087_v54 = vmul.f32 %v7772_v42, %v7772_v42 }
 0x4a9   :  { %v3091_v10 = vadd.f32 %v3090_v49, %v3084_v33  ;;  %v3071_v3 = vadd.f32 %v3070_v28, %v3047_v48  ;;  %v3085_v27 = vmul.f32 %v3047_v48, %v3047_v48 }
 0x4ab   :  { %v3072_v30 = vadd.f32 %v7771_v19, %v3071_v3  ;;  %v3092_v29 = vadd.f32 %v3091_v10, %v3085_v27 }
 0x4ad   :  { %v3073_v2 = vadd.f32 %v7772_v42, %v3072_v30  ;;  %v3093_v6 = vadd.f32 %v3092_v29, %v3086_v4 }
 0x4af   :  { %v3074_v45 = vrot.slane %v3073_v2, 4  ;;  %v3094_v46 = vadd.f32 %v3093_v6, %v3087_v54 }
 0x4b1   :  { %v3075_v47 = vadd.f32 %v3074_v45, %v3073_v2  ;;  %v3095_v50 = vrot.slane %v3094_v46, 4 }
 0x4b3   :  { %v3076_v51 = vrot.slane %v3075_v47, 2  ;;  %v3096_v52 = vadd.f32 %v3095_v50, %v3094_v46 }
 0x4b5   :  { %v3077_v55 = vadd.f32 %v3076_v51, %v3075_v47  ;;  %v3097_v58 = vrot.slane %v3096_v52, 2 }
 0x4b7   :  { %v3078_v60 = vrot.slane %v3077_v55, 1  ;;  %v3098_v53 = vadd.f32 %v3097_v58, %v3096_v52  ;;  %v8687_v52 = vld [vmem:[#allocation7 + $0x8] sm:$0xff]  }
 0x4b8   :  { %v8695_v58 = vld [vmem:[#allocation8 + $0x40] sm:$0xff]  }
 0x4b9   :  { %v3079_v61 = vadd.f32 %v3078_v60, %v3077_v55  ;;  %v3099_v62 = vrot.slane %v3098_v53, 1  ;;  %v8689_v55 = vld [vmem:[#allocation7] sm:$0xff]   ;;  %v8696_v60 = vld [vmem:[#allocation8 + $0x48] sm:$0xff]  }
 0x4bb   :  { %v3100_v31 = vadd.f32 %v3099_v62, %v3098_v53  ;;  %v3101_v40 = vmul.f32 0.015625, %v3079_v61  ;;  %v8697_v53 = vld [vmem:[#allocation8 + $0x50] sm:$0xff]   ;;  %v8698_v61 = vld [vmem:[#allocation8 + $0x58] sm:$0xff]   ;;  %v8688_v62 = vld [vmem:[#allocation7 + $0x10] sm:$0xff]  }
 0x4bd   :  { %v3102_v22 = vmul.f32 0.015625, %v3100_v31  ;;  %v3103_v24 = vmul.f32 %v3101_v40, %v3101_v40  ;;  %v3107_v21 = vsub.f32 %v3028_v9, %v3101_v40  ;;  %v3108_v23 = vsub.f32 %v3031_v26, %v3101_v40  ;;  %v8699_v31 = vld [vmem:[#allocation8 + $0x60] sm:$0xff]  }
 0x4be   :  { %v3109_v1 = vsub.f32 %v9930_v38, %v3101_v40  ;;  %v3110_v39 = vsub.f32 %v9932_v41, %v3101_v40  ;;  %v3111_v44 = vsub.f32 %v3044_v8, %v3101_v40  ;;  %v3112_v37 = vsub.f32 %v3047_v48, %v3101_v40 }
 0x4bf   :  { %v3104_v43 = vsub.f32 %v3102_v22, %v3103_v24  ;;  %v3113_v11 = vsub.f32 %v7771_v19, %v3101_v40  ;;  %v3114_v17 = vsub.f32 %v7772_v42, %v3101_v40  ;;  %v8700_v40 = vld [vmem:[#allocation8 + $0x68] sm:$0xff]   ;;  %v8701_v22 = vld [vmem:[#allocation8 + $0x70] sm:$0xff]  }
 0x4c0   :  { %v8690_v24 = vld [vmem:[#allocation7 + $0x18] sm:$0xff]  }
 0x4c1   :  { %v3115_v18 = vadd.f32 1e-05, %v3104_v43 }
 0x4c3   :  { %8858 = vrsqrt.f32 %v3115_v18 }
 0x4cd   :  { %v8859_v12 = vpop.eup %8858 }
 0x4ce   :  { %v3117_v7 = vmul.f32 %v8859_v12, %v3105_v35  ;;  %v8703_v12 = vld [vmem:[#allocation8] sm:$0xff]  }
 0x4d0   :  { %v3121_v59 = vrot.slane %v3117_v7, %v9458_v5 }
 0x4d2   :  { %v3122_v25 = vmul.f32 %v3121_v59, %v3107_v21  ;;  %v3123_v57 = vmul.f32 %v3121_v59, %v3108_v23  ;;  %v3124_v38 = vmul.f32 %v3121_v59, %v3109_v1  ;;  %v3125_v9 = vmul.f32 %v3121_v59, %v3110_v39  ;;  %v8691_v21 = vld [vmem:[#allocation7 + $0x20] sm:$0xff]   ;;  %v8692_v23 = vld [vmem:[#allocation7 + $0x28] sm:$0xff]   ;;  %v8693_v1 = vld [vmem:[#allocation7 + $0x30] sm:$0xff]  }
 0x4d3   :  { %v3126_v41 = vmul.f32 %v3121_v59, %v3111_v44  ;;  %v3127_v26 = vmul.f32 %v3121_v59, %v3112_v37  ;;  %v3128_v16 = vmul.f32 %v3121_v59, %v3113_v11  ;;  %v3129_v15 = vmul.f32 %v3121_v59, %v3114_v17  ;;  %v8702_v39 = vld [vmem:[#allocation8 + $0x78] sm:$0xff]   ;;  %v8694_v44 = vld [vmem:[#allocation7 + $0x38] sm:$0xff]  }
 0x4d4   :  { %v3134_v20 = vadd.f32 %v6573_v0, %v3122_v25  ;;  %v3135_v56 = vadd.f32 %v6573_v0, %v3123_v57  ;;  %v3136_v13 = vadd.f32 %v6573_v0, %v3124_v38  ;;  %v3137_v32 = vadd.f32 %v6573_v0, %v3125_v9  ;;  %v8713_v37 = vld [vmem:[#allocation7 + $0x40] sm:$0xff]   ;;  %v8704_v38 = vld [vmem:[#allocation8 + $0x8] sm:$0xff]   ;;  %v8705_v9 = vld [vmem:[#allocation8 + $0x10] sm:$0xff]  }
 0x4d5   :  { %v3138_v63 = vadd.f32 %v6573_v0, %v3126_v41  ;;  %v3139_v14 = vadd.f32 %v6573_v0, %v3127_v26  ;;  %v3140_v19 = vadd.f32 %v6573_v0, %v3128_v16  ;;  %v3141_v34 = vadd.f32 %v6573_v0, %v3129_v15  ;;  %v8706_v41 = vld [vmem:[#allocation8 + $0x18] sm:$0xff]   ;;  %v8707_v15 = vld [vmem:[#allocation8 + $0x20] sm:$0xff]  }
 0x4d6   :  { %v3150_v8 = vmul.f32 0.01, %v3134_v20  ;;  %v3151_v28 = vmul.f32 0.01, %v3135_v56  ;;  %v3152_v33 = vmul.f32 0.01, %v3136_v13 }
 0x4d7   :  { %vm3146_vm13 = vcmp.gt.f32.partialorder %v3138_v63, 0.0  ;;  %vm3147_vm14 = vcmp.gt.f32.partialorder %v3139_v14, 0.0  ;;  %v3153_v49 = vmul.f32 0.01, %v3137_v32  ;;  %v3154_v42 = vmul.f32 0.01, %v3138_v63 }
 0x4d8   :  { %v3155_v48 = vmul.f32 0.01, %v3139_v14  ;;  %v3156_v10 = vmul.f32 0.01, %v3140_v19  ;;  %v3157_v3 = vmul.f32 0.01, %v3141_v34 }
 0x4d9   :  { %v3162_v27 = vsel %vm3146_vm13, %v3138_v63, %v3154_v42  ;;  %vm3142_vm2 = vcmp.gt.f32.partialorder %v3134_v20, 0.0  ;;  %vm3143_vm3 = vcmp.gt.f32.partialorder %v3135_v56, 0.0  ;;  %vm3144_vm4 = vcmp.gt.f32.partialorder %v3136_v13, 0.0  ;;  %v8709_v63 = vld [vmem:[#allocation8 + $0x30] sm:$0xff]   ;;  %v8712_v42 = vld [vmem:[#allocation8 + $0x88] sm:$0xff]  }
 0x4da   :  { %v3163_v4 = vsel %vm3147_vm14, %v3139_v14, %v3155_v48  ;;  %v3158_v30 = vsel %vm3142_vm2, %v3134_v20, %v3150_v8  ;;  %v3159_v29 = vsel %vm3143_vm3, %v3135_v56, %v3151_v28  ;;  %vm3145_vm5 = vcmp.gt.f32.partialorder %v3137_v32, 0.0  ;;  %v8710_v14 = vld [vmem:[#allocation8 + $0x38] sm:$0xff]   ;;  %v8711_v8 = vld [vmem:[#allocation8 + $0x80] sm:$0xff]   ;;  %v8714_v48 = vld [vmem:[#allocation8 + $0x90] sm:$0xff]  }
 0x4db   :  { %v9949_v54 = vpack.c.bf16 %v3163_v4, %v3162_v27  ;;  %v9951_v2 = vpack.c.bf16 %v3159_v29, %v3158_v30  ;;  %v3160_v6 = vsel %vm3144_vm4, %v3136_v13, %v3152_v33  ;;  %v3161_v45 = vsel %vm3145_vm5, %v3137_v32, %v3153_v49  ;;  %v8708_v32 = vld [vmem:[#allocation8 + $0x28] sm:$0xff]   ;;  %v8716_v4 = vld [vmem:[#allocation8 + $0xa0] sm:$0xff]  }
 0x4dc   :  { %v9953_v46 = vpack.c.bf16 %v3161_v45, %v3160_v6  ;;  %vm3148_vm10 = vcmp.gt.f32.partialorder %v3140_v19, 0.0  ;;  %vm3149_vm11 = vcmp.gt.f32.partialorder %v3141_v34, 0.0  ;;  %v8718_v6 = vld [vmem:[#allocation8 + $0xb0] sm:$0xff]   ;;  %v8719_v45 = vld [vmem:[#allocation8 + $0xb8] sm:$0xff]   ;;  %vm6069_vm13 = vcmask 1041408  }
 0x4dd   :  { %7774 = vmatpush3.bf16.msra.mxu0 %v9951_v2  ;;  %7786 = vmatpush3.bf16.msra.mxu1 %v9951_v2  ;;  %v3164_v47 = vsel %vm3148_vm10, %v3140_v19, %v3156_v10  ;;  %v3165_v50 = vsel %vm3149_vm11, %v3141_v34, %v3157_v3  ;;  %v8715_v10 = vld [vmem:[#allocation8 + $0x98] sm:$0xff]   ;;  %vm6065_vm14 = vcmask 31744  }
 0x4de   :  { %7775 = vmatprep.subr.bf16.mxu0 %v9014_v36  ;;  %7787 = vmatprep.subr.bf16.mxu1 %v9014_v36  ;;  %v9959_v51 = vpack.c.bf16 %v3165_v50, %v3164_v47  ;;  %v8720_v50 = vld [vmem:[#allocation8 + $0xc0] sm:$0xff]  }
 0x4e1   :  { %7776 = vmatpush3.bf16.msra.mxu0 %v9953_v46  ;;  %7788 = vmatpush3.bf16.msra.mxu1 %v9953_v46 }
 0x4e2   :  { %7777 = vmatprep.subr.bf16.mxu0 %v9014_v36  ;;  %7789 = vmatprep.subr.bf16.mxu1 %v9014_v36 }
 0x4e5   :  { %7778 = vmatpush3.bf16.msra.mxu0 %v9949_v54  ;;  %7790 = vmatpush3.bf16.msra.mxu1 %v9949_v54 }
 0x4e6   :  { %7779 = vmatprep.subr.bf16.mxu0 %v9014_v36  ;;  %7791 = vmatprep.subr.bf16.mxu1 %v9014_v36 }
 0x4e9   :  { %7780 = vmatpush3.bf16.msra.mxu0 %v9959_v51  ;;  %7792 = vmatpush3.bf16.msra.mxu1 %v9959_v51 }
 0x4ea   :  { %7837 = vmatprep.subr.bf16.mxu1 %v9014_v36  ;;  %7797 = vmatprep.subr.bf16.mxu0 %v9014_v36 }
 0x4ec   :  { %7794 = vmatmul.mubr.msk.bf16.vlgmr.msra.gmra.mrb[144].mxu1 %vm3177_vm6, %v8687_v52  ;;  %7782 = vmatmul.mubr.msk.bf16.vlgmr.msra.gmra.mrb[40].mxu0 %vm3177_vm6, %v8689_v55 }
 0x4ed   :  { %7838 = vmatpush3.bf16.msra.mxu1 %v9951_v2  ;;  %7845 = vmatprep.mubr.msk.bf16.mxu1 %vm9015_vm0, %v9014_v36 }
 0x4ee   :  { %7839 = vmatprep.subr.bf16.mxu1 %v9014_v36  ;;  %7798 = vmatpush3.bf16.msra.mxu0 %v8695_v58  ;;  %v8721_v58 = vld [vmem:[#allocation8 + $0xc8] sm:$0xff]  }
 0x4ef   :  { %7799 = vmatprep.subr.bf16.mxu0 %v9014_v36  ;;  %7813 = vmatprep.mubr.msk.bf16.mxu0 %vm9015_vm0, %v9014_v36 }
 0x4f1   :  { %7840 = vmatpush3.bf16.msra.mxu1 %v9953_v46 }
 0x4f2   :  { %7841 = vmatprep.subr.bf16.mxu1 %v9014_v36  ;;  %7800 = vmatpush3.bf16.msra.mxu0 %v8696_v60  ;;  %v8722_v60 = vld [vmem:[#allocation8 + $0xd0] sm:$0xff]  }
 0x4f3   :  { %7801 = vmatprep.subr.bf16.mxu0 %v9014_v36 }
 0x4f5   :  { %7842 = vmatpush3.bf16.msra.mxu1 %v9949_v54 }
 0x4f6   :  { %7843 = vmatprep.subr.bf16.mxu1 %v9014_v36  ;;  %7802 = vmatpush3.bf16.msra.mxu0 %v8697_v53  ;;  %v8723_v53 = vld [vmem:[#allocation8 + $0xd8] sm:$0xff]  }
 0x4f7   :  { %7803 = vmatprep.subr.bf16.mxu0 %v9014_v36 }
 0x4f9   :  { %7844 = vmatpush3.bf16.msra.mxu1 %v9959_v51 }
 0x4fa   :  { %7869 = vmatprep.subr.bf16.mxu1 %v9014_v36  ;;  %7804 = vmatpush3.bf16.msra.mxu0 %v8698_v61 }
 0x4fb   :  { %7805 = vmatprep.subr.bf16.mxu0 %v9014_v36 }
 0x4fc   :  { %7846 = vmatmul.mubr.msk.bf16.vlgmr.msra.gmra.mrb[148].mxu1 %vm3177_vm6, %v8688_v62 }
 0x4fd   :  { %7870 = vmatpush3.bf16.msra.mxu1 %v9951_v2  ;;  %7877 = vmatprep.mubr.msk.bf16.mxu1 %vm9015_vm0, %v9014_v36 }
 0x4fe   :  { %7871 = vmatprep.subr.bf16.mxu1 %v9014_v36  ;;  %7806 = vmatpush3.bf16.msra.mxu0 %v8699_v31  ;;  %v8724_v31 = vld [vmem:[#allocation8 + $0xe0] sm:$0xff]  }
 0x4ff   :  { %7807 = vmatprep.subr.bf16.mxu0 %v9014_v36 }
 0x501   :  { %7872 = vmatpush3.bf16.msra.mxu1 %v9953_v46 }
 0x502   :  { %7873 = vmatprep.subr.bf16.mxu1 %v9014_v36  ;;  %7808 = vmatpush3.bf16.msra.mxu0 %v8700_v40 }
 0x503   :  { %7809 = vmatprep.subr.bf16.mxu0 %v9014_v36 }
 0x505   :  { %7874 = vmatpush3.bf16.msra.mxu1 %v9949_v54 }
 0x506   :  { %7875 = vmatprep.subr.bf16.mxu1 %v9014_v36  ;;  %7810 = vmatpush3.bf16.msra.mxu0 %v8701_v22 }
 0x507   :  { %7811 = vmatprep.subr.bf16.mxu0 %v9014_v36 }
 0x509   :  { %7876 = vmatpush3.bf16.msra.mxu1 %v9959_v51 }
 0x50a   :  { %7901 = vmatprep.subr.bf16.mxu1 %v9014_v36  ;;  %7812 = vmatpush3.bf16.msra.mxu0 %v8702_v39 }
 0x50b   :  { %7817 = vmatprep.subr.bf16.mxu0 %v9014_v36 }
 0x50c   :  { %7878 = vmatmul.mubr.msk.bf16.vlgmr.msra.gmra.mrb[152].mxu1 %vm3177_vm6, %v8690_v24 }
 0x50d   :  { %7902 = vmatpush3.bf16.msra.mxu1 %v9951_v2  ;;  %7909 = vmatprep.mubr.msk.bf16.mxu1 %vm9015_vm0, %v9014_v36 }
 0x50e   :  { %7903 = vmatprep.subr.bf16.mxu1 %v9014_v36 }
 0x511   :  { %7904 = vmatpush3.bf16.msra.mxu1 %v9953_v46 }
 0x512   :  { %7905 = vmatprep.subr.bf16.mxu1 %v9014_v36 }
 0x515   :  { %7906 = vmatpush3.bf16.msra.mxu1 %v9949_v54 }
 0x516   :  { %7907 = vmatprep.subr.bf16.mxu1 %v9014_v36 }
 0x519   :  { %7908 = vmatpush3.bf16.msra.mxu1 %v9959_v51 }
 0x51a   :  { %7933 = vmatprep.subr.bf16.mxu1 %v9014_v36 }
 0x51c   :  { %7910 = vmatmul.mubr.msk.bf16.vlgmr.msra.gmra.mrb[156].mxu1 %vm3177_vm6, %v8691_v21  ;;  %v8725_v21 = vld [vmem:[#allocation8 + $0xe8] sm:$0xff]  }
 0x51d   :  { %7934 = vmatpush3.bf16.msra.mxu1 %v9951_v2  ;;  %7941 = vmatprep.mubr.msk.bf16.mxu1 %vm9015_vm0, %v9014_v36 }
 0x51e   :  { %7935 = vmatprep.subr.bf16.mxu1 %v9014_v36 }
 0x521   :  { %7936 = vmatpush3.bf16.msra.mxu1 %v9953_v46 }
 0x522   :  { %7937 = vmatprep.subr.bf16.mxu1 %v9014_v36 }
 0x525   :  { %7938 = vmatpush3.bf16.msra.mxu1 %v9949_v54 }
 0x526   :  { %7939 = vmatprep.subr.bf16.mxu1 %v9014_v36 }
 0x529   :  { %7940 = vmatpush3.bf16.msra.mxu1 %v9959_v51 }
 0x52a   :  { %7965 = vmatprep.subr.bf16.mxu1 %v9014_v36 }
 0x52c   :  { %7942 = vmatmul.mubr.msk.bf16.vlgmr.msra.gmra.mrb[160].mxu1 %vm3177_vm6, %v8692_v23  ;;  %v8726_v23 = vld [vmem:[#allocation8 + $0xf0] sm:$0xff]  }
 0x52d   :  { %7966 = vmatpush3.bf16.msra.mxu1 %v9951_v2  ;;  %7973 = vmatprep.mubr.msk.bf16.mxu1 %vm9015_vm0, %v9014_v36 }
 0x52e   :  { %7967 = vmatprep.subr.bf16.mxu1 %v9014_v36 }
 0x531   :  { %7968 = vmatpush3.bf16.msra.mxu1 %v9953_v46 }
 0x532   :  { %7969 = vmatprep.subr.bf16.mxu1 %v9014_v36 }
 0x535   :  { %7970 = vmatpush3.bf16.msra.mxu1 %v9949_v54 }
 0x536   :  { %7971 = vmatprep.subr.bf16.mxu1 %v9014_v36 }
 0x539   :  { %7972 = vmatpush3.bf16.msra.mxu1 %v9959_v51 }
 0x53a   :  { %7997 = vmatprep.subr.bf16.mxu1 %v9014_v36 }
 0x53c   :  { %7974 = vmatmul.mubr.msk.bf16.vlgmr.msra.gmra.mrb[164].mxu1 %vm3177_vm6, %v8693_v1  ;;  %v8727_v1 = vld [vmem:[#allocation8 + $0xf8] sm:$0xff]  }
 0x53d   :  { %7998 = vmatpush3.bf16.msra.mxu1 %v9951_v2  ;;  %8005 = vmatprep.mubr.msk.bf16.mxu1 %vm9015_vm0, %v9014_v36 }
 0x53e   :  { %7999 = vmatprep.subr.bf16.mxu1 %v9014_v36 }
 0x541   :  { %8000 = vmatpush3.bf16.msra.mxu1 %v9953_v46 }
 0x542   :  { %8001 = vmatprep.subr.bf16.mxu1 %v9014_v36 }
 0x545   :  { %8002 = vmatpush3.bf16.msra.mxu1 %v9949_v54 }
 0x546   :  { %8003 = vmatprep.subr.bf16.mxu1 %v9014_v36 }
 0x549   :  { %8004 = vmatpush3.bf16.msra.mxu1 %v9959_v51 }
 0x54a   :  { %8029 = vmatprep.subr.bf16.mxu1 %v9014_v36 }
 0x54c   :  { %8006 = vmatmul.mubr.msk.bf16.vlgmr.msra.gmra.mrb[168].mxu1 %vm3177_vm6, %v8694_v44 }
 0x54d   :  { %8030 = vmatpush3.bf16.msra.mxu1 %v9951_v2  ;;  %8037 = vmatprep.mubr.msk.bf16.mxu1 %vm9015_vm0, %v9014_v36  ;;  %v8717_v2 = vld [vmem:[#allocation8 + $0xa8] sm:$0xff]  }
 0x54e   :  { %8031 = vmatprep.subr.bf16.mxu1 %v9014_v36 }
 0x551   :  { %8032 = vmatpush3.bf16.msra.mxu1 %v9953_v46 }
 0x552   :  { %8033 = vmatprep.subr.bf16.mxu1 %v9014_v36 }
 0x555   :  { %8034 = vmatpush3.bf16.msra.mxu1 %v9949_v54 }
 0x556   :  { %8035 = vmatprep.subr.bf16.mxu1 %v9014_v36 }
 0x559   :  { %8036 = vmatpush3.bf16.msra.mxu1 %v9959_v51 }
 0x55a   :  { %8061 = vmatprep.subr.bf16.mxu1 %v9014_v36 }
 0x55c   :  { %8038 = vmatmul.mubr.msk.bf16.vlgmr.msra.gmra.mrb[172].mxu1 %vm3177_vm6, %v8713_v37  ;;  %v8728_v37 = vld [vmem:[#allocation8 + $0x100] sm:$0xff]  }
 0x55d   :  { %8063 = vmatprep.mubr.msk.bf16.mxu1 %vm9015_vm0, %v9014_v36 }
 0x5bf   :  { %v3284_v43 = vpop.f32.mrb[144].mxu1  ;;  %v3215_v11 = vpop.f32.mrb[40].mxu0 }
 0x5c0   :  { %v7795_v17 = vpop.f32.mrb[145].mxu1  ;;  %v7783_v18 = vpop.f32.mrb[41].mxu0 }
 0x5c1   :  { %v3287_v35 = vpop.f32.mrb[146].mxu1  ;;  %v3218_v7 = vpop.f32.mrb[42].mxu0  ;;  %v8729_v18 = vld [vmem:[#allocation8 + $0x108] sm:$0xff]  }
 0x5c2   :  { %v3291_v59 = vpack.c.bf16 %v3287_v35, %v3284_v43  ;;  %v7796_v0 = vpop.f32.mrb[147].mxu1  ;;  %v3222_v25 = vpack.c.bf16 %v3218_v7, %v3215_v11  ;;  %v7784_v57 = vpop.f32.mrb[43].mxu0  ;;  %v8730_v35 = vld [vmem:[#allocation8 + $0x110] sm:$0xff]   ;;  %v8732_v7 = vld [vmem:[#allocation8 + $0x120] sm:$0xff]  }
 0x5c3   :  { %v8734_v0 = vld [vmem:[#allocation8 + $0x130] sm:$0xff]  }
 0x5c4   :  { %7814 = vmatmul.mubr.bf16.vlgmr.msra.gmra.mrb[44].mxu0 %v3291_v59  ;;  %v8733_v59 = vld [vmem:[#allocation8 + $0x128] sm:$0xff]  }
 0x5c5   :  { %7818 = vmatpush3.bf16.msra.mxu0 %v8703_v12  ;;  %7833 = vmatprep.mubr.msk.bf16.mxu0 %vm9015_vm0, %v9014_v36  ;;  %v8731_v12 = vld [vmem:[#allocation8 + $0x118] sm:$0xff]  }
 0x5c6   :  { %7819 = vmatprep.subr.bf16.mxu0 %v9014_v36 }
 0x5c9   :  { %7820 = vmatpush3.bf16.msra.mxu0 %v8704_v38 }
 0x5ca   :  { %7821 = vmatprep.subr.bf16.mxu0 %v9014_v36 }
 0x5cd   :  { %7822 = vmatpush3.bf16.msra.mxu0 %v8705_v9  ;;  %v8736_v9 = vld [vmem:[#allocation8 + $0x140] sm:$0xff]  }
 0x5ce   :  { %7823 = vmatprep.subr.bf16.mxu0 %v9014_v36 }
 0x5cf   :  { %v3532_v26 = vpop.f32.mrb[148].mxu1 }
 0x5d0   :  { %v7847_v16 = vpop.f32.mrb[149].mxu1 }
 0x5d1   :  { %7824 = vmatpush3.bf16.msra.mxu0 %v8706_v41  ;;  %v3535_v20 = vpop.f32.mrb[150].mxu1 }
 0x5d2   :  { %7825 = vmatprep.subr.bf16.mxu0 %v9014_v36  ;;  %v3539_v56 = vpack.c.bf16 %v3535_v20, %v3532_v26  ;;  %v7848_v13 = vpop.f32.mrb[151].mxu1  ;;  %v8738_v20 = vld [vmem:[#allocation8 + $0x150] sm:$0xff]  }
 0x5d3   :  { %v8740_v13 = vld [vmem:[#allocation8 + $0x160] sm:$0xff]  }
 0x5d5   :  { %7826 = vmatpush3.bf16.msra.mxu0 %v8707_v15  ;;  %v8737_v15 = vld [vmem:[#allocation8 + $0x148] sm:$0xff]  }
 0x5d6   :  { %7827 = vmatprep.subr.bf16.mxu0 %v9014_v36 }
 0x5d9   :  { %7828 = vmatpush3.bf16.msra.mxu0 %v8708_v32  ;;  %v8741_v32 = vld [vmem:[#allocation8 + $0x168] sm:$0xff]  }
 0x5da   :  { %7829 = vmatprep.subr.bf16.mxu0 %v9014_v36 }
 0x5dd   :  { %7830 = vmatpush3.bf16.msra.mxu0 %v8709_v63  ;;  %v8742_v63 = vld [vmem:[#allocation8 + $0x170] sm:$0xff]  }
 0x5de   :  { %7831 = vmatprep.subr.bf16.mxu0 %v9014_v36 }
 0x5df   :  { %v10073_v19 = vpop.f32.mrb[152].mxu1 }
 0x5e0   :  { %v7879_v34 = vpop.f32.mrb[153].mxu1 }
 0x5e1   :  { %7832 = vmatpush3.bf16.msra.mxu0 %v8710_v14  ;;  %v10075_v28 = vpop.f32.mrb[154].mxu1  ;;  %v8743_v14 = vld [vmem:[#allocation8 + $0x178] sm:$0xff]   ;;  %v8745_v34 = vld [vmem:[#allocation8 + $0x188] sm:$0xff]  }
 0x5e2   :  { %7849 = vmatprep.subr.bf16.mxu0 %v9014_v36  ;;  %v3700_v33 = vpack.c.bf16 %v10075_v28, %v10073_v19  ;;  %v7880_v49 = vpop.f32.mrb[155].mxu1  ;;  %v8744_v19 = vld [vmem:[#allocation8 + $0x180] sm:$0xff]   ;;  %v8747_v28 = vld [vmem:[#allocation8 + $0x198] sm:$0xff]  }
 0x5e3   :  { %v8749_v49 = vld [vmem:[#allocation8 + $0x1a8] sm:$0xff]  }
 0x5e4   :  { %7834 = vmatmul.mubr.bf16.vlgmr.msra.gmra.mrb[44].mxu0 %v3222_v25  ;;  %v8735_v25 = vld [vmem:[#allocation8 + $0x138] sm:$0xff]  }
 0x5e5   :  { %7850 = vmatpush3.bf16.msra.mxu0 %v8711_v8  ;;  %7865 = vmatprep.mubr.msk.bf16.mxu0 %vm9015_vm0, %v9014_v36  ;;  %v8746_v8 = vld [vmem:[#allocation8 + $0x190] sm:$0xff]  }
 0x5e6   :  { %7851 = vmatprep.subr.bf16.mxu0 %v9014_v36 }
 0x5e9   :  { %7852 = vmatpush3.bf16.msra.mxu0 %v8712_v42  ;;  %v8750_v42 = vld [vmem:[#allocation8 + $0x1b0] sm:$0xff]  }
 0x5ea   :  { %7853 = vmatprep.subr.bf16.mxu0 %v9014_v36 }
 0x5ed   :  { %7854 = vmatpush3.bf16.msra.mxu0 %v8714_v48  ;;  %v8751_v48 = vld [vmem:[#allocation8 + $0x1b8] sm:$0xff]  }
 0x5ee   :  { %7855 = vmatprep.subr.bf16.mxu0 %v9014_v36 }
 0x5ef   :  { %v10085_v3 = vpop.f32.mrb[156].mxu1 }
 0x5f0   :  { %v7911_v27 = vpop.f32.mrb[157].mxu1 }
 0x5f1   :  { %7856 = vmatpush3.bf16.msra.mxu0 %v8715_v10  ;;  %v10087_v30 = vpop.f32.mrb[158].mxu1  ;;  %v8752_v10 = vld [vmem:[#allocation8 + $0x1c0] sm:$0xff]   ;;  %v8754_v27 = vld [vmem:[#allocation8 + $0x1d0] sm:$0xff]  }
 0x5f2   :  { %7857 = vmatprep.subr.bf16.mxu0 %v9014_v36  ;;  %v3861_v29 = vpack.c.bf16 %v10087_v30, %v10085_v3  ;;  %v7912_v54 = vpop.f32.mrb[159].mxu1  ;;  %v8753_v3 = vld [vmem:[#allocation8 + $0x1c8] sm:$0xff]   ;;  %v8756_v30 = vld [vmem:[#allocation8 + $0x1e0] sm:$0xff]  }
 0x5f3   :  { %v8758_v54 = vld [vmem:[#allocation8 + $0x1f0] sm:$0xff]  }
 0x5f5   :  { %7858 = vmatpush3.bf16.msra.mxu0 %v8716_v4  ;;  %v8755_v4 = vld [vmem:[#allocation8 + $0x1d8] sm:$0xff]  }
 0x5f6   :  { %7859 = vmatprep.subr.bf16.mxu0 %v9014_v36 }
 0x5f9   :  { %7860 = vmatpush3.bf16.msra.mxu0 %v8717_v2  ;;  %v8759_v2 = vld [vmem:[#allocation8 + $0x1f8] sm:$0xff]  }
 0x5fa   :  { %7861 = vmatprep.subr.bf16.mxu0 %v9014_v36 }
 0x5fd   :  { %7862 = vmatpush3.bf16.msra.mxu0 %v8718_v6  ;;  %v8760_v6 = vld [vmem:[#allocation8 + $0x200] sm:$0xff]  }
 0x5fe   :  { %7863 = vmatprep.subr.bf16.mxu0 %v9014_v36 }
 0x5ff   :  { %v10095_v46 = vpop.f32.mrb[160].mxu1 }
 0x600   :  { %v7943_v47 = vpop.f32.mrb[161].mxu1 }
 0x601   :  { %7864 = vmatpush3.bf16.msra.mxu0 %v8719_v45  ;;  %v10097_v51 = vpop.f32.mrb[162].mxu1  ;;  %v8761_v45 = vld [vmem:[#allocation8 + $0x208] sm:$0xff]   ;;  %v8763_v47 = vld [vmem:[#allocation8 + $0x218] sm:$0xff]  }
 0x602   :  { %7881 = vmatprep.subr.bf16.mxu0 %v9014_v36  ;;  %v4022_v52 = vpack.c.bf16 %v10097_v51, %v10095_v46  ;;  %v7944_v55 = vpop.f32.mrb[163].mxu1  ;;  %v8762_v46 = vld [vmem:[#allocation8 + $0x210] sm:$0xff]   ;;  %v8765_v51 = vld [vmem:[#allocation8 + $0x228] sm:$0xff]  }
 0x603   :  { %v8767_v55 = vld [vmem:[#allocation8 + $0x238] sm:$0xff]  }
 0x604   :  { %7866 = vmatmul.mubr.bf16.vlgmr.msra.gmra.mrb[44].mxu0 %v3539_v56  ;;  %v8739_v56 = vld [vmem:[#allocation8 + $0x158] sm:$0xff]  }
 0x605   :  { %7882 = vmatpush3.bf16.msra.mxu0 %v8720_v50  ;;  %7897 = vmatprep.mubr.msk.bf16.mxu0 %vm9015_vm0, %v9014_v36  ;;  %v8764_v50 = vld [vmem:[#allocation8 + $0x220] sm:$0xff]  }
 0x606   :  { %7883 = vmatprep.subr.bf16.mxu0 %v9014_v36 }
 0x609   :  { %7884 = vmatpush3.bf16.msra.mxu0 %v8721_v58 }
 0x60a   :  { %7885 = vmatprep.subr.bf16.mxu0 %v9014_v36 }
 0x60d   :  { %7886 = vmatpush3.bf16.msra.mxu0 %v8722_v60 }
 0x60e   :  { %7887 = vmatprep.subr.bf16.mxu0 %v9014_v36 }
 0x60f   :  { %v10107_v61 = vpop.f32.mrb[164].mxu1 }
 0x610   :  { %v7975_v62 = vpop.f32.mrb[165].mxu1 }
 0x611   :  { %7888 = vmatpush3.bf16.msra.mxu0 %v8723_v53  ;;  %v10109_v40 = vpop.f32.mrb[166].mxu1 }
 0x612   :  { %7889 = vmatprep.subr.bf16.mxu0 %v9014_v36  ;;  %v4183_v22 = vpack.c.bf16 %v10109_v40, %v10107_v61  ;;  %v7976_v24 = vpop.f32.mrb[167].mxu1 }
 0x615   :  { %7890 = vmatpush3.bf16.msra.mxu0 %v8724_v31 }
 0x616   :  { %7891 = vmatprep.subr.bf16.mxu0 %v9014_v36 }
 0x619   :  { %7892 = vmatpush3.bf16.msra.mxu0 %v8725_v21 }
 0x61a   :  { %7893 = vmatprep.subr.bf16.mxu0 %v9014_v36 }
 0x61d   :  { %7894 = vmatpush3.bf16.msra.mxu0 %v8726_v23 }
 0x61e   :  { %7895 = vmatprep.subr.bf16.mxu0 %v9014_v36 }
 0x61f   :  { %v10117_v39 = vpop.f32.mrb[168].mxu1 }
 0x620   :  { %v8007_v44 = vpop.f32.mrb[169].mxu1 }
 0x621   :  { %7896 = vmatpush3.bf16.msra.mxu0 %v8727_v1  ;;  %v10119_v43 = vpop.f32.mrb[170].mxu1 }
 0x622   :  { %7913 = vmatprep.subr.bf16.mxu0 %v9014_v36  ;;  %v4344_v11 = vpack.c.bf16 %v10119_v43, %v10117_v39  ;;  %v8008_v17 = vpop.f32.mrb[171].mxu1 }
 0x624   :  { %7898 = vmatmul.mubr.bf16.vlgmr.msra.gmra.mrb[44].mxu0 %v3700_v33  ;;  %v8748_v33 = vld [vmem:[#allocation8 + $0x1a0] sm:$0xff]  }
 0x625   :  { %7914 = vmatpush3.bf16.msra.mxu0 %v8728_v37  ;;  %7929 = vmatprep.mubr.msk.bf16.mxu0 %vm9015_vm0, %v9014_v36 }
 0x626   :  { %7915 = vmatprep.subr.bf16.mxu0 %v9014_v36 }
 0x629   :  { %7916 = vmatpush3.bf16.msra.mxu0 %v8729_v18 }
 0x62a   :  { %7917 = vmatprep.subr.bf16.mxu0 %v9014_v36 }
 0x62d   :  { %7918 = vmatpush3.bf16.msra.mxu0 %v8730_v35 }
 0x62e   :  { %7919 = vmatprep.subr.bf16.mxu0 %v9014_v36 }
 0x62f   :  { %v10136_v57 = vpop.f32.mrb[172].mxu1 }
 0x630   :  { %v8039_v38 = vpop.f32.mrb[173].mxu1 }
 0x631   :  { %7920 = vmatpush3.bf16.msra.mxu0 %v8731_v12  ;;  %v10138_v41 = vpop.f32.mrb[174].mxu1 }
 0x632   :  { %7921 = vmatprep.subr.bf16.mxu0 %v9014_v36  ;;  %v4505_v26 = vpack.c.bf16 %v10138_v41, %v10136_v57  ;;  %v8040_v16 = vpop.f32.mrb[175].mxu1 }
 0x635   :  { %7922 = vmatpush3.bf16.msra.mxu0 %v8732_v7 }
 0x636   :  { %7923 = vmatprep.subr.bf16.mxu0 %v9014_v36 }
 0x639   :  { %7924 = vmatpush3.bf16.msra.mxu0 %v8733_v59 }
 0x63a   :  { %7925 = vmatprep.subr.bf16.mxu0 %v9014_v36 }
 0x63d   :  { %7926 = vmatpush3.bf16.msra.mxu0 %v8734_v0 }
 0x63e   :  { %7927 = vmatprep.subr.bf16.mxu0 %v9014_v36 }
 0x641   :  { %7928 = vmatpush3.bf16.msra.mxu0 %v8735_v25 }
 0x642   :  { %7945 = vmatprep.subr.bf16.mxu0 %v9014_v36 }
 0x644   :  { %7930 = vmatmul.mubr.bf16.vlgmr.msra.gmra.mrb[44].mxu0 %v3861_v29  ;;  %v8757_v29 = vld [vmem:[#allocation8 + $0x1e8] sm:$0xff]  }
 0x645   :  { %7946 = vmatpush3.bf16.msra.mxu0 %v8736_v9  ;;  %7961 = vmatprep.mubr.msk.bf16.mxu0 %vm9015_vm0, %v9014_v36  ;;  %v4634_v9 = vld [vmem:[%s10492_s11 + $0x2] sm:$0x1] }
 0x646   :  { %7947 = vmatprep.subr.bf16.mxu0 %v9014_v36 }
 0x649   :  { %7948 = vmatpush3.bf16.msra.mxu0 %v8737_v15  ;;  %v6664_v15 = vld [vmem:[%s10493_s12 + $0x2] ss:$0 sm:$0xff] }
 0x64a   :  { %7949 = vmatprep.subr.bf16.mxu0 %v9014_v36 }
 0x64d   :  { %7950 = vmatpush3.bf16.msra.mxu0 %v8738_v20 }
 0x64e   :  { %7951 = vmatprep.subr.bf16.mxu0 %v9014_v36 }
 0x651   :  { %7952 = vmatpush3.bf16.msra.mxu0 %v8739_v56 }
 0x652   :  { %7953 = vmatprep.subr.bf16.mxu0 %v9014_v36 }
 0x655   :  { %7954 = vmatpush3.bf16.msra.mxu0 %v8740_v13 }
 0x656   :  { %7955 = vmatprep.subr.bf16.mxu0 %v9014_v36 }
 0x659   :  { %7956 = vmatpush3.bf16.msra.mxu0 %v8741_v32 }
 0x65a   :  { %7957 = vmatprep.subr.bf16.mxu0 %v9014_v36 }
 0x65d   :  { %7958 = vmatpush3.bf16.msra.mxu0 %v8742_v63 }
 0x65e   :  { %7959 = vmatprep.subr.bf16.mxu0 %v9014_v36 }
 0x661   :  { %7960 = vmatpush3.bf16.msra.mxu0 %v8743_v14 }
 0x662   :  { %7977 = vmatprep.subr.bf16.mxu0 %v9014_v36 }
 0x664   :  { %7962 = vmatmul.mubr.bf16.vlgmr.msra.gmra.mrb[44].mxu0 %v4022_v52  ;;  %v8766_v52 = vld [vmem:[#allocation8 + $0x230] sm:$0xff]  }
 0x665   :  { %7978 = vmatpush3.bf16.msra.mxu0 %v8744_v19  ;;  %7993 = vmatprep.mubr.msk.bf16.mxu0 %vm9015_vm0, %v9014_v36 }
 0x666   :  { %7979 = vmatprep.subr.bf16.mxu0 %v9014_v36 }
 0x669   :  { %7980 = vmatpush3.bf16.msra.mxu0 %v8745_v34 }
 0x66a   :  { %7981 = vmatprep.subr.bf16.mxu0 %v9014_v36 }
 0x66d   :  { %7982 = vmatpush3.bf16.msra.mxu0 %v8746_v8 }
 0x66e   :  { %7983 = vmatprep.subr.bf16.mxu0 %v9014_v36 }
 0x671   :  { %7984 = vmatpush3.bf16.msra.mxu0 %v8747_v28  ;;  %v4660_v28 = vld [vmem:[%s10487_s6] sm:$0x3] }
 0x672   :  { %7985 = vmatprep.subr.bf16.mxu0 %v9014_v36 }
 0x675   :  { %7986 = vmatpush3.bf16.msra.mxu0 %v8748_v33  ;;  %v6714_v33 = vld [vmem:[%s10487_s6 + $0xa] sm:$0x3] }
 0x676   :  { %7987 = vmatprep.subr.bf16.mxu0 %v9014_v36 }
 0x679   :  { %7988 = vmatpush3.bf16.msra.mxu0 %v8749_v49  ;;  %v6666_v49 = vld [vmem:[%s10487_s6 + $0x2] sm:$0x3] }
 0x67a   :  { %7989 = vmatprep.subr.bf16.mxu0 %v9014_v36 }
 0x67d   :  { %7990 = vmatpush3.bf16.msra.mxu0 %v8750_v42  ;;  %v6724_v42 = vld [vmem:[%s10487_s6 + $0xc] sm:$0x3] }
 0x67e   :  { %7991 = vmatprep.subr.bf16.mxu0 %v9014_v36 }
 0x681   :  { %7992 = vmatpush3.bf16.msra.mxu0 %v8751_v48  ;;  %v8768_v48 = vld [vmem:[#allocation10 + $0x40] sm:$0xff]  }
 0x682   :  { %8009 = vmatprep.subr.bf16.mxu0 %v9014_v36 }
 0x684   :  { %7994 = vmatmul.mubr.bf16.vlgmr.msra.gmra.mrb[44].mxu0 %v4183_v22 }
 0x685   :  { %8010 = vmatpush3.bf16.msra.mxu0 %v8752_v10  ;;  %8025 = vmatprep.mubr.msk.bf16.mxu0 %vm9015_vm0, %v9014_v36  ;;  %v8769_v10 = vld [vmem:[#allocation10 + $0x48] sm:$0xff]  }
 0x686   :  { %8011 = vmatprep.subr.bf16.mxu0 %v9014_v36 }
 0x689   :  { %8012 = vmatpush3.bf16.msra.mxu0 %v8753_v3  ;;  %v6734_v3 = vld [vmem:[%s10487_s6 + $0xe] sm:$0x3] }
 0x68a   :  { %8013 = vmatprep.subr.bf16.mxu0 %v9014_v36 }
 0x68d   :  { %8014 = vmatpush3.bf16.msra.mxu0 %v8754_v27  ;;  %v8770_v27 = vld [vmem:[#allocation10 + $0x50] sm:$0xff]  }
 0x68e   :  { %8015 = vmatprep.subr.bf16.mxu0 %v9014_v36 }
 0x691   :  { %8016 = vmatpush3.bf16.msra.mxu0 %v8755_v4  ;;  %v8771_v4 = vld [vmem:[#allocation10 + $0x58] sm:$0xff]  }
 0x692   :  { %8017 = vmatprep.subr.bf16.mxu0 %v9014_v36 }
 0x695   :  { %8018 = vmatpush3.bf16.msra.mxu0 %v8756_v30  ;;  %v8772_v30 = vld [vmem:[#allocation10 + $0x60] sm:$0xff]  }
 0x696   :  { %8019 = vmatprep.subr.bf16.mxu0 %v9014_v36 }
 0x699   :  { %8020 = vmatpush3.bf16.msra.mxu0 %v8757_v29  ;;  %v8773_v29 = vld [vmem:[#allocation10 + $0x68] sm:$0xff]  }
 0x69a   :  { %8021 = vmatprep.subr.bf16.mxu0 %v9014_v36 }
 0x69d   :  { %8022 = vmatpush3.bf16.msra.mxu0 %v8758_v54  ;;  %v8774_v54 = vld [vmem:[#allocation10 + $0x70] sm:$0xff]  }
 0x69e   :  { %8023 = vmatprep.subr.bf16.mxu0 %v9014_v36 }
 0x6a1   :  { %8024 = vmatpush3.bf16.msra.mxu0 %v8759_v2  ;;  %v8775_v2 = vld [vmem:[#allocation10 + $0x78] sm:$0xff]  }
 0x6a2   :  { %8041 = vmatprep.subr.bf16.mxu0 %v9014_v36 }
 0x6a4   :  { %8026 = vmatmul.mubr.bf16.vlgmr.msra.gmra.mrb[44].mxu0 %v4344_v11 }
 0x6a5   :  { %8042 = vmatpush3.bf16.msra.mxu0 %v8760_v6  ;;  %8057 = vmatprep.mubr.msk.bf16.mxu0 %vm9015_vm0, %v9014_v36 }
 0x6a6   :  { %8043 = vmatprep.subr.bf16.mxu0 %v9014_v36 }
 0x6a9   :  { %8044 = vmatpush3.bf16.msra.mxu0 %v8761_v45 }
 0x6aa   :  { %8045 = vmatprep.subr.bf16.mxu0 %v9014_v36 }
 0x6ad   :  { %8046 = vmatpush3.bf16.msra.mxu0 %v8762_v46 }
 0x6ae   :  { %8047 = vmatprep.subr.bf16.mxu0 %v9014_v36 }
 0x6b1   :  { %8048 = vmatpush3.bf16.msra.mxu0 %v8763_v47 }
 0x6b2   :  { %8049 = vmatprep.subr.bf16.mxu0 %v9014_v36 }
 0x6b5   :  { %8050 = vmatpush3.bf16.msra.mxu0 %v8764_v50 }
 0x6b6   :  { %8051 = vmatprep.subr.bf16.mxu0 %v9014_v36 }
 0x6b9   :  { %8052 = vmatpush3.bf16.msra.mxu0 %v8765_v51  ;;  %v8776_v51 = vld [vmem:[#allocation10] sm:$0xff]  }
 0x6ba   :  { %8053 = vmatprep.subr.bf16.mxu0 %v9014_v36 }
 0x6bd   :  { %8054 = vmatpush3.bf16.msra.mxu0 %v8766_v52 }
 0x6be   :  { %8055 = vmatprep.subr.bf16.mxu0 %v9014_v36 }
 0x6c1   :  { %8056 = vmatpush3.bf16.msra.mxu0 %v8767_v55 }
 0x6c2   :  { %8191 = vmatprep.subr.bf16.mxu0 %v9014_v36 }
 0x6c4   :  { %8058 = vmatmul.mubr.bf16.vlgmr.msra.gmra.mrb[44].mxu0 %v4505_v26 }
 0x6c5   :  { %8193 = vmatprep.mubr.msk.bf16.mxu0 %vm9015_vm0, %v9014_v36 }
 0x797   :  { %v4605_v58 = vpop.f32.mrb[44].mxu0 }
 0x798   :  { %v8059_v60 = vpop.f32.mrb[45].mxu0  ;;  %v4621_v61 = vmul.f32 %v4605_v58, %v4605_v58 }
 0x799   :  { %v4608_v53 = vpop.f32.mrb[46].mxu0 }
 0x79a   :  { %v4614_v62 = vadd.f32 %v4608_v53, %v4605_v58  ;;  %v4622_v31 = vmul.f32 %v4608_v53, %v4608_v53  ;;  %v8060_v40 = vpop.f32.mrb[47].mxu0 }
 0x79b   :  { %v8781_v40 = vld [vmem:[#allocation10 + $0x28] sm:$0xff]  }
 0x79c   :  { %v4615_v22 = vrot.slane %v4614_v62, 4  ;;  %v4623_v24 = vadd.f32 %v4622_v31, %v4621_v61  ;;  %v8778_v61 = vld [vmem:[#allocation10 + $0x10] sm:$0xff]   ;;  %v8780_v31 = vld [vmem:[#allocation10 + $0x20] sm:$0xff]  }
 0x79e   :  { %v4616_v21 = vadd.f32 %v4615_v22, %v4614_v62  ;;  %v4624_v23 = vrot.slane %v4623_v24, 4  ;;  %v8779_v62 = vld [vmem:[#allocation10 + $0x18] sm:$0xff]   ;;  %v8782_v22 = vld [vmem:[#allocation10 + $0x30] sm:$0xff]  }
 0x7a0   :  { %v4617_v1 = vrot.slane %v4616_v21, 2  ;;  %v4625_v39 = vadd.f32 %v4624_v23, %v4623_v24  ;;  %v8783_v24 = vld [vmem:[#allocation10 + $0x38] sm:$0xff]  }
 0x7a1   :  { %v6684_v23 = vld [vmem:[%s10487_s6 + $0x4] sm:$0x3] }
 0x7a2   :  { %v4618_v44 = vadd.f32 %v4617_v1, %v4616_v21  ;;  %v4626_v37 = vrot.slane %v4625_v39, 2  ;;  %v8784_v1 = vld [vmem:[#allocation10 + $0x80] sm:$0xff]  }
 0x7a4   :  { %v4619_v43 = vrot.slane %v4618_v44, 1  ;;  %v4627_v11 = vadd.f32 %v4626_v37, %v4625_v39  ;;  %v8785_v39 = vld [vmem:[#allocation10 + $0x88] sm:$0xff]   ;;  %v8787_v37 = vld [vmem:[#allocation10 + $0x98] sm:$0xff]  }
 0x7a6   :  { %v4620_v17 = vadd.f32 %v4619_v43, %v4618_v44  ;;  %v4628_v18 = vrot.slane %v4627_v11, 1  ;;  %v8786_v44 = vld [vmem:[#allocation10 + $0x90] sm:$0xff]   ;;  %v8788_v43 = vld [vmem:[#allocation10 + $0xa0] sm:$0xff]  }
 0x7a8   :  { %v4629_v35 = vadd.f32 %v4628_v18, %v4627_v11  ;;  %v4630_v12 = vmul.f32 0.0625, %v4620_v17  ;;  %v8789_v11 = vld [vmem:[#allocation10 + $0xa8] sm:$0xff]   ;;  %v8790_v17 = vld [vmem:[#allocation10 + $0xb0] sm:$0xff]   ;;  %v8791_v18 = vld [vmem:[#allocation10 + $0xb8] sm:$0xff]  }
 0x7aa   :  { %v4631_v7 = vmul.f32 0.0625, %v4629_v35  ;;  %v4632_v59 = vmul.f32 %v4630_v12, %v4630_v12  ;;  %v4636_v0 = vsub.f32 %v4605_v58, %v4630_v12  ;;  %v4637_v25 = vsub.f32 %v4608_v53, %v4630_v12  ;;  %v8777_v53 = vld [vmem:[#allocation10 + $0x8] sm:$0xff]  }
 0x7ac   :  { %v4633_v57 = vsub.f32 %v4631_v7, %v4632_v59 }
 0x7ae   :  { %v4638_v38 = vadd.f32 1e-05, %v4633_v57  ;;  %v8792_v57 = vld [vmem:[#allocation10 + $0xc0] sm:$0xff]  }
 0x7b0   :  { %8860 = vrsqrt.f32 %v4638_v38  ;;  %v8793_v38 = vld [vmem:[#allocation10 + $0xc8] sm:$0xff]  }
 0x7ba   :  { %v8861_v41 = vpop.eup %8860 }
 0x7bb   :  { %v4640_v26 = vmul.f32 %v8861_v41, %v4634_v9  ;;  %v8794_v9 = vld [vmem:[#allocation10 + $0xd0] sm:$0xff]   ;;  %v8795_v41 = vld [vmem:[#allocation10 + $0xd8] sm:$0xff]  }
 0x7bd   :  { %v4644_v16 = vrot.slane %v4640_v26, %v9458_v5  ;;  %v8796_v26 = vld [vmem:[#allocation10 + $0xe0] sm:$0xff]  }
 0x7bf   :  { %v4645_v20 = vmul.f32 %v4644_v16, %v4636_v0  ;;  %v4646_v56 = vmul.f32 %v4644_v16, %v4637_v25  ;;  %v6694_v25 = vld [vmem:[%s10487_s6 + $0x6] sm:$0x3]  ;;  %v8797_v16 = vld [vmem:[#allocation10 + $0xe8] sm:$0xff]  }
 0x7c1   :  { %v4651_v13 = vadd.f32 %v6664_v15, %v4645_v20  ;;  %v4652_v32 = vadd.f32 %v6664_v15, %v4646_v56  ;;  %v8798_v15 = vld [vmem:[#allocation10 + $0xf0] sm:$0xff]   ;;  %v8799_v20 = vld [vmem:[#allocation10 + $0xf8] sm:$0xff]   ;;  %v6744_v56 = vld [vmem:[%s10487_s6 + $0x10] sm:$0x3] }
 0x7c3   :  { %vm4653_vm15 = vcmp.gt.f32.partialorder %v4651_v13, 0.0  ;;  %vm4654_vm1 = vcmp.gt.f32.partialorder %v4652_v32, 0.0  ;;  %v4655_v63 = vmul.f32 0.01, %v4651_v13  ;;  %v4656_v14 = vmul.f32 0.01, %v4652_v32 }
 0x7c5   :  { %v4657_v19 = vsel %vm4653_vm15, %v4651_v13, %v4655_v63  ;;  %v4658_v34 = vsel %vm4654_vm1, %v4652_v32, %v4656_v14 }
 0x7c6   :  { %v10207_v8 = vpack.c.bf16 %v4658_v34, %v4657_v19  ;;  %v6704_v34 = vld [vmem:[%s10487_s6 + $0x8] sm:$0x3] }
 0x7c8   :  { %8062 = vmatpush3.bf16.msra.mxu1 %v10207_v8  ;;  %8192 = vmatpush3.bf16.msra.mxu0 %v10207_v8 }
 0x7c9   :  { %8067 = vmatprep.subr.bf16.mxu1 %v9014_v36  ;;  %8217 = vmatprep.subr.bf16.mxu0 %v9014_v36 }
 0x7cb   :  { %8064 = vmatmul.mubr.msk.bf16.vlgmr.msra.gmra.mrb[176].mxu1 %vm4661_vm7, %v4660_v28  ;;  %8194 = vmatmul.mubr.msk.bf16.vlgmr.msra.gmra.mrb[48].mxu0 %vm4661_vm7, %v6714_v33  ;;  %v8800_v28 = vld [vmem:[#allocation10 + $0x100] sm:$0xff]   ;;  %v8801_v33 = vld [vmem:[#allocation10 + $0x108] sm:$0xff]  }
 0x7cc   :  { %8068 = vmatpush3.bf16.msra.mxu1 %v10207_v8  ;;  %8218 = vmatpush3.bf16.msra.mxu0 %v10207_v8 }
 0x7cd   :  { %8069 = vmatprep.mubr.msk.bf16.mxu1 %vm9015_vm0, %v9014_v36  ;;  %8219 = vmatprep.mubr.msk.bf16.mxu0 %vm9015_vm0, %v9014_v36 }
 0x7ce   :  { %8243 = vmatprep.subr.bf16.mxu0 %v9014_v36  ;;  %8073 = vmatprep.subr.bf16.mxu1 %v9014_v36 }
 0x7d3   :  { %8070 = vmatmul.mubr.msk.bf16.vlgmr.msra.gmra.mrb[180].mxu1 %vm4661_vm7, %v6666_v49  ;;  %8220 = vmatmul.mubr.msk.bf16.vlgmr.msra.gmra.mrb[52].mxu0 %vm4661_vm7, %v6724_v42  ;;  %v8803_v49 = vld [vmem:[#allocation10 + $0x118] sm:$0xff]   ;;  %v8804_v42 = vld [vmem:[#allocation10 + $0x120] sm:$0xff]  }
 0x7d4   :  { %8244 = vmatpush3.bf16.msra.mxu0 %v10207_v8  ;;  %8245 = vmatprep.mubr.msk.bf16.mxu0 %vm9015_vm0, %v9014_v36 }
 0x7d5   :  { %8269 = vmatprep.subr.bf16.mxu0 %v9014_v36  ;;  %8074 = vmatpush3.bf16.msra.mxu1 %v8768_v48  ;;  %v8805_v48 = vld [vmem:[#allocation10 + $0x128] sm:$0xff]  }
 0x7d6   :  { %8075 = vmatprep.subr.bf16.mxu1 %v9014_v36  ;;  %8089 = vmatprep.mubr.msk.bf16.mxu1 %vm9015_vm0, %v9014_v36 }
 0x7d9   :  { %8076 = vmatpush3.bf16.msra.mxu1 %v8769_v10  ;;  %v8806_v10 = vld [vmem:[#allocation10 + $0x130] sm:$0xff]  }
 0x7da   :  { %8077 = vmatprep.subr.bf16.mxu1 %v9014_v36 }
 0x7db   :  { %8246 = vmatmul.mubr.msk.bf16.vlgmr.msra.gmra.mrb[56].mxu0 %vm4661_vm7, %v6734_v3  ;;  %v8807_v3 = vld [vmem:[#allocation10 + $0x138] sm:$0xff]  }
 0x7dc   :  { %8270 = vmatpush3.bf16.msra.mxu0 %v10207_v8  ;;  %8271 = vmatprep.mubr.msk.bf16.mxu0 %vm9015_vm0, %v9014_v36 }
 0x7dd   :  { %8078 = vmatpush3.bf16.msra.mxu1 %v8770_v27  ;;  %8295 = vmatprep.subr.bf16.mxu0 %v9014_v36 }
 0x7de   :  { %8079 = vmatprep.subr.bf16.mxu1 %v9014_v36 }
 0x7e1   :  { %8080 = vmatpush3.bf16.msra.mxu1 %v8771_v4 }
 0x7e2   :  { %8081 = vmatprep.subr.bf16.mxu1 %v9014_v36 }
 0x7e3   :  { %8272 = vmatmul.mubr.msk.bf16.vlgmr.msra.gmra.mrb[60].mxu0 %vm4661_vm7, %v6744_v56 }
 0x7e4   :  { %8297 = vmatprep.mubr.msk.bf16.mxu0 %vm9015_vm0, %v9014_v36 }
 0x7e5   :  { %8082 = vmatpush3.bf16.msra.mxu1 %v8772_v30 }
 0x7e6   :  { %8083 = vmatprep.subr.bf16.mxu1 %v9014_v36 }
 0x7e9   :  { %8084 = vmatpush3.bf16.msra.mxu1 %v8773_v29 }
 0x7ea   :  { %8085 = vmatprep.subr.bf16.mxu1 %v9014_v36 }
 0x7ed   :  { %8086 = vmatpush3.bf16.msra.mxu1 %v8774_v54 }
 0x7ee   :  { %8087 = vmatprep.subr.bf16.mxu1 %v9014_v36 }
 0x7f1   :  { %8088 = vmatpush3.bf16.msra.mxu1 %v8775_v2 }
 0x7f2   :  { %8093 = vmatprep.subr.bf16.mxu1 %v9014_v36 }
 0x89e   :  { %v4699_v6 = vpop.f32.mrb[176].mxu1  ;;  %v5456_v27 = vpop.f32.mrb[48].mxu0 }
 0x89f   :  { %v8065_v45 = vpop.f32.mrb[177].mxu1  ;;  %v4705_v21 = vpack.c.bf16 %v4699_v6, %v4699_v6  ;;  %v8195_v4 = vpop.f32.mrb[49].mxu0 }
 0x8a0   :  { %v4702_v46 = vpop.f32.mrb[178].mxu1  ;;  %v5459_v30 = vpop.f32.mrb[50].mxu0 }
 0x8a1   :  { %v8066_v47 = vpop.f32.mrb[179].mxu1  ;;  %v8196_v29 = vpop.f32.mrb[51].mxu0 }
 0x8a6   :  { %v4761_v50 = vpop.f32.mrb[180].mxu1  ;;  %v10329_v54 = vpop.f32.mrb[52].mxu0 }
 0x8a7   :  { %v4767_v52 = vpack.c.bf16 %v4761_v50, %v4761_v50  ;;  %v8071_v55 = vpop.f32.mrb[181].mxu1  ;;  %v8221_v2 = vpop.f32.mrb[53].mxu0 }
 0x8a8   :  { %v4764_v58 = vpop.f32.mrb[182].mxu1  ;;  %v5611_v6 = vpop.f32.mrb[54].mxu0 }
 0x8a9   :  { %8090 = vmatmul.mubr.bf16.vlgmr.msra.gmra.mrb[184].mxu1 %v4767_v52  ;;  %v8072_v60 = vpop.f32.mrb[183].mxu1  ;;  %v8222_v45 = vpop.f32.mrb[55].mxu0 }
 0x8aa   :  { %8094 = vmatpush3.bf16.msra.mxu1 %v8776_v51  ;;  %8109 = vmatprep.mubr.msk.bf16.mxu1 %vm9015_vm0, %v9014_v36 }
 0x8ab   :  { %8095 = vmatprep.subr.bf16.mxu1 %v9014_v36 }
 0x8ae   :  { %8096 = vmatpush3.bf16.msra.mxu1 %v8777_v53  ;;  %v10331_v46 = vpop.f32.mrb[56].mxu0  ;;  %v8808_v53 = vld [vmem:[#allocation10 + $0x140] sm:$0xff]  }
 0x8af   :  { %8097 = vmatprep.subr.bf16.mxu1 %v9014_v36  ;;  %v8247_v47 = vpop.f32.mrb[57].mxu0  ;;  %v5766_v56 = vpack.c.bf16 %v10331_v46, %v10331_v46 }
 0x8b0   :  { %v5763_v50 = vpop.f32.mrb[58].mxu0 }
 0x8b1   :  { %v8248_v51 = vpop.f32.mrb[59].mxu0 }
 0x8b2   :  { %8098 = vmatpush3.bf16.msra.mxu1 %v8778_v61 }
 0x8b3   :  { %8099 = vmatprep.subr.bf16.mxu1 %v9014_v36 }
 0x8b6   :  { %8100 = vmatpush3.bf16.msra.mxu1 %v8779_v62  ;;  %v10333_v52 = vpop.f32.mrb[60].mxu0 }
 0x8b7   :  { %8101 = vmatprep.subr.bf16.mxu1 %v9014_v36  ;;  %v8273_v55 = vpop.f32.mrb[61].mxu0 }
 0x8b8   :  { %v5915_v58 = vpop.f32.mrb[62].mxu0 }
 0x8b9   :  { %v8274_v61 = vpop.f32.mrb[63].mxu0 }
 0x8ba   :  { %8102 = vmatpush3.bf16.msra.mxu1 %v8780_v31 }
 0x8bb   :  { %8103 = vmatprep.subr.bf16.mxu1 %v9014_v36 }
 0x8be   :  { %8104 = vmatpush3.bf16.msra.mxu1 %v8781_v40 }
 0x8bf   :  { %8105 = vmatprep.subr.bf16.mxu1 %v9014_v36 }
 0x8c2   :  { %8106 = vmatpush3.bf16.msra.mxu1 %v8782_v22 }
 0x8c3   :  { %8107 = vmatprep.subr.bf16.mxu1 %v9014_v36 }
 0x8c6   :  { %8108 = vmatpush3.bf16.msra.mxu1 %v8783_v24  ;;  %v8809_v24 = vld [vmem:[#allocation10 + $0x148] sm:$0xff]  }
 0x8c7   :  { %8113 = vmatprep.subr.bf16.mxu1 %v9014_v36 }
 0x8c9   :  { %8110 = vmatmul.mubr.bf16.vlgmr.msra.gmra.mrb[184].mxu1 %v4705_v21  ;;  %v8810_v21 = vld [vmem:[#allocation10 + $0x150] sm:$0xff]  }
 0x8ca   :  { %8114 = vmatpush3.bf16.msra.mxu1 %v10207_v8  ;;  %8115 = vmatprep.mubr.msk.bf16.mxu1 %vm9015_vm0, %v9014_v36 }
 0x8cb   :  { %8119 = vmatprep.subr.bf16.mxu1 %v9014_v36 }
 0x8d1   :  { %8116 = vmatmul.mubr.msk.bf16.vlgmr.msra.gmra.mrb[188].mxu1 %vm4661_vm7, %v6684_v23  ;;  %v8811_v23 = vld [vmem:[#allocation10 + $0x158] sm:$0xff]  }
 0x8d2   :  { %8120 = vmatpush3.bf16.msra.mxu1 %v8784_v1  ;;  %8135 = vmatprep.mubr.msk.bf16.mxu1 %vm9015_vm0, %v9014_v36  ;;  %v8812_v1 = vld [vmem:[#allocation10 + $0x160] sm:$0xff]  }
 0x8d3   :  { %8121 = vmatprep.subr.bf16.mxu1 %v9014_v36 }
 0x8d6   :  { %8122 = vmatpush3.bf16.msra.mxu1 %v8785_v39  ;;  %v8813_v39 = vld [vmem:[#allocation10 + $0x168] sm:$0xff]  }
 0x8d7   :  { %8123 = vmatprep.subr.bf16.mxu1 %v9014_v36 }
 0x8da   :  { %8124 = vmatpush3.bf16.msra.mxu1 %v8786_v44  ;;  %v8814_v44 = vld [vmem:[#allocation10 + $0x170] sm:$0xff]  }
 0x8db   :  { %8125 = vmatprep.subr.bf16.mxu1 %v9014_v36 }
 0x8de   :  { %8126 = vmatpush3.bf16.msra.mxu1 %v8787_v37  ;;  %v8815_v37 = vld [vmem:[#allocation10 + $0x178] sm:$0xff]  }
 0x8df   :  { %8127 = vmatprep.subr.bf16.mxu1 %v9014_v36 }
 0x8e2   :  { %8128 = vmatpush3.bf16.msra.mxu1 %v8788_v43  ;;  %v5462_v43 = vpack.c.bf16 %v5456_v27, %v5456_v27 }
 0x8e3   :  { %8129 = vmatprep.subr.bf16.mxu1 %v9014_v36 }
 0x8e6   :  { %8130 = vmatpush3.bf16.msra.mxu1 %v8789_v11  ;;  %v8816_v11 = vld [vmem:[#allocation10 + $0x180] sm:$0xff]  }
 0x8e7   :  { %8131 = vmatprep.subr.bf16.mxu1 %v9014_v36 }
 0x8ea   :  { %8132 = vmatpush3.bf16.msra.mxu1 %v8790_v17  ;;  %v8817_v17 = vld [vmem:[#allocation10 + $0x188] sm:$0xff]  }
 0x8eb   :  { %8133 = vmatprep.subr.bf16.mxu1 %v9014_v36 }
 0x8ee   :  { %8134 = vmatpush3.bf16.msra.mxu1 %v8791_v18  ;;  %v8818_v18 = vld [vmem:[#allocation10 + $0x190] sm:$0xff]  }
 0x8ef   :  { %8139 = vmatprep.subr.bf16.mxu1 %v9014_v36 }
 0x9a4   :  { %v5000_v35 = vpop.f32.mrb[188].mxu1 }
 0x9a5   :  { %v5006_v12 = vpack.c.bf16 %v5000_v35, %v5000_v35  ;;  %v8117_v7 = vpop.f32.mrb[189].mxu1  ;;  %v8819_v35 = vld [vmem:[#allocation10 + $0x198] sm:$0xff]  }
 0x9a6   :  { %v5003_v59 = vpop.f32.mrb[190].mxu1  ;;  %v8821_v7 = vld [vmem:[#allocation10 + $0x1a8] sm:$0xff]  }
 0x9a7   :  { %8136 = vmatmul.mubr.bf16.vlgmr.msra.gmra.mrb[184].mxu1 %v5006_v12  ;;  %v8118_v0 = vpop.f32.mrb[191].mxu1  ;;  %v8820_v12 = vld [vmem:[#allocation10 + $0x1a0] sm:$0xff]   ;;  %v8822_v59 = vld [vmem:[#allocation10 + $0x1b0] sm:$0xff]  }
 0x9a8   :  { %8140 = vmatpush3.bf16.msra.mxu1 %v10207_v8  ;;  %8141 = vmatprep.mubr.msk.bf16.mxu1 %vm9015_vm0, %v9014_v36  ;;  %v8823_v0 = vld [vmem:[#allocation10 + $0x1b8] sm:$0xff]  }
 0x9a9   :  { %8145 = vmatprep.subr.bf16.mxu1 %v9014_v36 }
 0x9af   :  { %8142 = vmatmul.mubr.msk.bf16.vlgmr.msra.gmra.mrb[192].mxu1 %vm4661_vm7, %v6694_v25  ;;  %v5614_v25 = vpack.c.bf16 %v10329_v54, %v10329_v54 }
 0x9b0   :  { %8146 = vmatpush3.bf16.msra.mxu1 %v8792_v57  ;;  %8161 = vmatprep.mubr.msk.bf16.mxu1 %vm9015_vm0, %v9014_v36  ;;  %v8824_v57 = vld [vmem:[#allocation10 + $0x1c0] sm:$0xff]  }
 0x9b1   :  { %8147 = vmatprep.subr.bf16.mxu1 %v9014_v36 }
 0x9b4   :  { %8148 = vmatpush3.bf16.msra.mxu1 %v8793_v38  ;;  %v8825_v38 = vld [vmem:[#allocation10 + $0x1c8] sm:$0xff]  }
 0x9b5   :  { %8149 = vmatprep.subr.bf16.mxu1 %v9014_v36 }
 0x9b8   :  { %8150 = vmatpush3.bf16.msra.mxu1 %v8794_v9  ;;  %v8826_v9 = vld [vmem:[#allocation10 + $0x1d0] sm:$0xff]  }
 0x9b9   :  { %8151 = vmatprep.subr.bf16.mxu1 %v9014_v36 }
 0x9bc   :  { %8152 = vmatpush3.bf16.msra.mxu1 %v8795_v41  ;;  %v8827_v41 = vld [vmem:[#allocation10 + $0x1d8] sm:$0xff]  }
 0x9bd   :  { %8153 = vmatprep.subr.bf16.mxu1 %v9014_v36 }
 0x9c0   :  { %8154 = vmatpush3.bf16.msra.mxu1 %v8796_v26  ;;  %v8828_v26 = vld [vmem:[#allocation10 + $0x1e0] sm:$0xff]  }
 0x9c1   :  { %8155 = vmatprep.subr.bf16.mxu1 %v9014_v36 }
 0x9c4   :  { %8156 = vmatpush3.bf16.msra.mxu1 %v8797_v16  ;;  %v8829_v16 = vld [vmem:[#allocation10 + $0x1e8] sm:$0xff]  }
 0x9c5   :  { %8157 = vmatprep.subr.bf16.mxu1 %v9014_v36 }
 0x9c8   :  { %8158 = vmatpush3.bf16.msra.mxu1 %v8798_v15  ;;  %v8830_v15 = vld [vmem:[#allocation10 + $0x1f0] sm:$0xff]  }
 0x9c9   :  { %8159 = vmatprep.subr.bf16.mxu1 %v9014_v36 }
 0x9cc   :  { %8160 = vmatpush3.bf16.msra.mxu1 %v8799_v20  ;;  %v8831_v20 = vld [vmem:[#allocation10 + $0x1f8] sm:$0xff]  }
 0x9cd   :  { %8165 = vmatprep.subr.bf16.mxu1 %v9014_v36 }
 0xa82   :  { %v5152_v13 = vpop.f32.mrb[192].mxu1 }
 0xa83   :  { %v5158_v32 = vpack.c.bf16 %v5152_v13, %v5152_v13  ;;  %v8143_v63 = vpop.f32.mrb[193].mxu1  ;;  %v8832_v13 = vld [vmem:[#allocation10 + $0x200] sm:$0xff]  }
 0xa84   :  { %v5155_v14 = vpop.f32.mrb[194].mxu1  ;;  %v8834_v63 = vld [vmem:[#allocation10 + $0x210] sm:$0xff]  }
 0xa85   :  { %8162 = vmatmul.mubr.bf16.vlgmr.msra.gmra.mrb[184].mxu1 %v5158_v32  ;;  %v8144_v19 = vpop.f32.mrb[195].mxu1  ;;  %v8833_v32 = vld [vmem:[#allocation10 + $0x208] sm:$0xff]   ;;  %v8835_v14 = vld [vmem:[#allocation10 + $0x218] sm:$0xff]  }
 0xa86   :  { %8166 = vmatpush3.bf16.msra.mxu1 %v10207_v8  ;;  %8167 = vmatprep.mubr.msk.bf16.mxu1 %vm9015_vm0, %v9014_v36  ;;  %v8802_v8 = vld [vmem:[#allocation10 + $0x110] sm:$0xff]   ;;  %v8836_v19 = vld [vmem:[#allocation10 + $0x220] sm:$0xff]  }
 0xa87   :  { %8171 = vmatprep.subr.bf16.mxu1 %v9014_v36 }
 0xa8d   :  { %8168 = vmatmul.mubr.msk.bf16.vlgmr.msra.gmra.mrb[196].mxu1 %vm4661_vm7, %v6704_v34  ;;  %v8837_v34 = vld [vmem:[#allocation10 + $0x228] sm:$0xff]  }
 0xa8e   :  { %8172 = vmatpush3.bf16.msra.mxu1 %v8800_v28  ;;  %8187 = vmatprep.mubr.msk.bf16.mxu1 %vm9015_vm0, %v9014_v36  ;;  %v8838_v28 = vld [vmem:[#allocation10 + $0x230] sm:$0xff]  }
 0xa8f   :  { %8173 = vmatprep.subr.bf16.mxu1 %v9014_v36 }
 0xa92   :  { %8174 = vmatpush3.bf16.msra.mxu1 %v8801_v33  ;;  %v8839_v33 = vld [vmem:[#allocation10 + $0x238] sm:$0xff]  }
 0xa93   :  { %8175 = vmatprep.subr.bf16.mxu1 %v9014_v36 }
 0xa96   :  { %8176 = vmatpush3.bf16.msra.mxu1 %v8802_v8  ;;  %v5918_v8 = vpack.c.bf16 %v10333_v52, %v10333_v52 }
 0xa97   :  { %8177 = vmatprep.subr.bf16.mxu1 %v9014_v36 }
 0xa9a   :  { %8178 = vmatpush3.bf16.msra.mxu1 %v8803_v49 }
 0xa9b   :  { %8179 = vmatprep.subr.bf16.mxu1 %v9014_v36 }
 0xa9e   :  { %8180 = vmatpush3.bf16.msra.mxu1 %v8804_v42 }
 0xa9f   :  { %8181 = vmatprep.subr.bf16.mxu1 %v9014_v36 }
 0xaa2   :  { %8182 = vmatpush3.bf16.msra.mxu1 %v8805_v48 }
 0xaa3   :  { %8183 = vmatprep.subr.bf16.mxu1 %v9014_v36 }
 0xaa6   :  { %8184 = vmatpush3.bf16.msra.mxu1 %v8806_v10 }
 0xaa7   :  { %8185 = vmatprep.subr.bf16.mxu1 %v9014_v36 }
 0xaaa   :  { %8186 = vmatpush3.bf16.msra.mxu1 %v8807_v3 }
 0xaab   :  { %8197 = vmatprep.subr.bf16.mxu1 %v9014_v36 }
 0xb60   :  { %v5304_v60 = vpop.f32.mrb[196].mxu1 }
 0xb61   :  { %v5310_v62 = vpack.c.bf16 %v5304_v60, %v5304_v60  ;;  %v8169_v31 = vpop.f32.mrb[197].mxu1 }
 0xb62   :  { %v5307_v40 = vpop.f32.mrb[198].mxu1  ;;  %v6044_v31 = vld [vmem:[%s10492_s11 + $0x3] sm:$0x1] }
 0xb63   :  { %8188 = vmatmul.mubr.bf16.vlgmr.msra.gmra.mrb[184].mxu1 %v5310_v62  ;;  %v8170_v22 = vpop.f32.mrb[199].mxu1 }
 0xb64   :  { %8198 = vmatpush3.bf16.msra.mxu1 %v8808_v53  ;;  %8213 = vmatprep.mubr.msk.bf16.mxu1 %vm9015_vm0, %v9014_v36 }
 0xb65   :  { %8199 = vmatprep.subr.bf16.mxu1 %v9014_v36 }
 0xb68   :  { %8200 = vmatpush3.bf16.msra.mxu1 %v8809_v24 }
 0xb69   :  { %8201 = vmatprep.subr.bf16.mxu1 %v9014_v36 }
 0xb6c   :  { %8202 = vmatpush3.bf16.msra.mxu1 %v8810_v21 }
 0xb6d   :  { %8203 = vmatprep.subr.bf16.mxu1 %v9014_v36 }
 0xb70   :  { %8204 = vmatpush3.bf16.msra.mxu1 %v8811_v23  ;;  %v6754_v23 = vld [vmem:[%s10493_s12 + $0x3] ss:$0 sm:$0xff] }
 0xb71   :  { %8205 = vmatprep.subr.bf16.mxu1 %v9014_v36 }
 0xb74   :  { %8206 = vmatpush3.bf16.msra.mxu1 %v8812_v1 }
 0xb75   :  { %8207 = vmatprep.subr.bf16.mxu1 %v9014_v36 }
 0xb78   :  { %8208 = vmatpush3.bf16.msra.mxu1 %v8813_v39 }
 0xb79   :  { %8209 = vmatprep.subr.bf16.mxu1 %v9014_v36 }
 0xb7c   :  { %8210 = vmatpush3.bf16.msra.mxu1 %v8814_v44 }
 0xb7d   :  { %8211 = vmatprep.subr.bf16.mxu1 %v9014_v36 }
 0xb80   :  { %8212 = vmatpush3.bf16.msra.mxu1 %v8815_v37 }
 0xb81   :  { %8223 = vmatprep.subr.bf16.mxu1 %v9014_v36 }
 0xb83   :  { %8214 = vmatmul.mubr.bf16.vlgmr.msra.gmra.mrb[184].mxu1 %v5462_v43 }
 0xb84   :  { %8224 = vmatpush3.bf16.msra.mxu1 %v8816_v11  ;;  %8239 = vmatprep.mubr.msk.bf16.mxu1 %vm9015_vm0, %v9014_v36 }
 0xb85   :  { %8225 = vmatprep.subr.bf16.mxu1 %v9014_v36 }
 0xb88   :  { %8226 = vmatpush3.bf16.msra.mxu1 %v8817_v17  ;;  %v6064_v17 = vld [vmem:[%s10489_s8] sm:$0x1] }
 0xb89   :  { %8227 = vmatprep.subr.bf16.mxu1 %v9014_v36 }
 0xb8c   :  { %8228 = vmatpush3.bf16.msra.mxu1 %v8818_v18  ;;  %v8840_v18 = vld [vmem:[%s10490_s9 + $0x40] sm:$0xff]  }
 0xb8d   :  { %8229 = vmatprep.subr.bf16.mxu1 %v9014_v36 }
 0xb90   :  { %8230 = vmatpush3.bf16.msra.mxu1 %v8819_v35  ;;  %v8841_v35 = vld [vmem:[%s10490_s9 + $0x48] sm:$0xff]  }
 0xb91   :  { %8231 = vmatprep.subr.bf16.mxu1 %v9014_v36 }
 0xb94   :  { %8232 = vmatpush3.bf16.msra.mxu1 %v8820_v12  ;;  %v8842_v12 = vld [vmem:[%s10490_s9 + $0x50] sm:$0xff]  }
 0xb95   :  { %8233 = vmatprep.subr.bf16.mxu1 %v9014_v36 }
 0xb98   :  { %8234 = vmatpush3.bf16.msra.mxu1 %v8821_v7  ;;  %v8843_v7 = vld [vmem:[%s10490_s9 + $0x58] sm:$0xff]  }
 0xb99   :  { %8235 = vmatprep.subr.bf16.mxu1 %v9014_v36 }
 0xb9c   :  { %8236 = vmatpush3.bf16.msra.mxu1 %v8822_v59  ;;  %v8844_v59 = vld [vmem:[%s10490_s9 + $0x60] sm:$0xff]  }
 0xb9d   :  { %8237 = vmatprep.subr.bf16.mxu1 %v9014_v36 }
 0xba0   :  { %8238 = vmatpush3.bf16.msra.mxu1 %v8823_v0  ;;  %v8845_v0 = vld [vmem:[%s10490_s9 + $0x68] sm:$0xff]  }
 0xba1   :  { %8249 = vmatprep.subr.bf16.mxu1 %v9014_v36 }
 0xba3   :  { %8240 = vmatmul.mubr.bf16.vlgmr.msra.gmra.mrb[184].mxu1 %v5614_v25  ;;  %v8846_v25 = vld [vmem:[%s10490_s9 + $0x70] sm:$0xff]  }
 0xba4   :  { %8250 = vmatpush3.bf16.msra.mxu1 %v8824_v57  ;;  %8265 = vmatprep.mubr.msk.bf16.mxu1 %vm9015_vm0, %v9014_v36  ;;  %v8847_v57 = vld [vmem:[%s10490_s9 + $0x78] sm:$0xff]  }
 0xba5   :  { %8251 = vmatprep.subr.bf16.mxu1 %v9014_v36 }
 0xba8   :  { %8252 = vmatpush3.bf16.msra.mxu1 %v8825_v38 }
 0xba9   :  { %8253 = vmatprep.subr.bf16.mxu1 %v9014_v36 }
 0xbac   :  { %8254 = vmatpush3.bf16.msra.mxu1 %v8826_v9 }
 0xbad   :  { %8255 = vmatprep.subr.bf16.mxu1 %v9014_v36 }
 0xbb0   :  { %8256 = vmatpush3.bf16.msra.mxu1 %v8827_v41 }
 0xbb1   :  { %8257 = vmatprep.subr.bf16.mxu1 %v9014_v36 }
 0xbb4   :  { %8258 = vmatpush3.bf16.msra.mxu1 %v8828_v26 }
 0xbb5   :  { %8259 = vmatprep.subr.bf16.mxu1 %v9014_v36 }
 0xbb8   :  { %8260 = vmatpush3.bf16.msra.mxu1 %v8829_v16 }
 0xbb9   :  { %8261 = vmatprep.subr.bf16.mxu1 %v9014_v36 }
 0xbbc   :  { %8262 = vmatpush3.bf16.msra.mxu1 %v8830_v15  ;;  %v8848_v15 = vld [vmem:[%s10490_s9] sm:$0xff]  }
 0xbbd   :  { %8263 = vmatprep.subr.bf16.mxu1 %v9014_v36 }
 0xbc0   :  { %8264 = vmatpush3.bf16.msra.mxu1 %v8831_v20 }
 0xbc1   :  { %8275 = vmatprep.subr.bf16.mxu1 %v9014_v36 }
 0xbc3   :  { %8266 = vmatmul.mubr.bf16.vlgmr.msra.gmra.mrb[184].mxu1 %v5766_v56 }
 0xbc4   :  { %8276 = vmatpush3.bf16.msra.mxu1 %v8832_v13  ;;  %8291 = vmatprep.mubr.msk.bf16.mxu1 %vm9015_vm0, %v9014_v36 }
 0xbc5   :  { %8277 = vmatprep.subr.bf16.mxu1 %v9014_v36 }
 0xbc8   :  { %8278 = vmatpush3.bf16.msra.mxu1 %v8833_v32 }
 0xbc9   :  { %8279 = vmatprep.subr.bf16.mxu1 %v9014_v36 }
 0xbcc   :  { %8280 = vmatpush3.bf16.msra.mxu1 %v8834_v63  ;;  %v8849_v63 = vld [vmem:[%s10490_s9 + $0x8] sm:$0xff]  }
 0xbcd   :  { %8281 = vmatprep.subr.bf16.mxu1 %v9014_v36 }
 0xbd0   :  { %8282 = vmatpush3.bf16.msra.mxu1 %v8835_v14  ;;  %v8850_v14 = vld [vmem:[%s10490_s9 + $0x10] sm:$0xff]  }
 0xbd1   :  { %8283 = vmatprep.subr.bf16.mxu1 %v9014_v36 }
 0xbd4   :  { %8284 = vmatpush3.bf16.msra.mxu1 %v8836_v19  ;;  %v8851_v19 = vld [vmem:[%s10490_s9 + $0x18] sm:$0xff]  }
 0xbd5   :  { %8285 = vmatprep.subr.bf16.mxu1 %v9014_v36 }
 0xbd8   :  { %8286 = vmatpush3.bf16.msra.mxu1 %v8837_v34  ;;  %v8852_v34 = vld [vmem:[%s10490_s9 + $0x20] sm:$0xff]  }
 0xbd9   :  { %8287 = vmatprep.subr.bf16.mxu1 %v9014_v36 }
 0xbdc   :  { %8288 = vmatpush3.bf16.msra.mxu1 %v8838_v28  ;;  %v8853_v28 = vld [vmem:[%s10490_s9 + $0x28] sm:$0xff]  }
 0xbdd   :  { %8289 = vmatprep.subr.bf16.mxu1 %v9014_v36 }
 0xbe0   :  { %8290 = vmatpush3.bf16.msra.mxu1 %v8839_v33  ;;  %v8854_v33 = vld [vmem:[%s10490_s9 + $0x30] sm:$0xff]  }
 0xbe3   :  { %8292 = vmatmul.mubr.bf16.vlgmr.msra.gmra.mrb[184].mxu1 %v5918_v8  ;;  %v8855_v8 = vld [vmem:[%s10490_s9 + $0x38] sm:$0xff]  }
 0xcb6   :  { %v6018_v49 = vpop.f32.mrb[184].mxu1 }
 0xcb7   :  { %v6025_v42 = vsel %vm10509_vm8, %v6018_v49, 0.0  ;;  %v6032_v48 = vmul.f32 %v6018_v49, %v6018_v49  ;;  %v8293_v10 = vpop.f32.mrb[185].mxu1 }
 0xcb8   :  { %v6026_v3 = vrot.slane %v6025_v42, 4  ;;  %v6021_v27 = vpop.f32.mrb[186].mxu1 }
 0xcb9   :  { %v6033_v4 = vsel %vm10510_vm12, %v6032_v48, 0.0  ;;  %v8294_v30 = vpop.f32.mrb[187].mxu1 }
 0xcba   :  { %v6027_v29 = vadd.f32 %v6026_v3, %v6025_v42  ;;  %v6034_v54 = vrot.slane %v6033_v4, 4 }
 0xcbc   :  { %v6028_v2 = vrot.slane %v6027_v29, 2  ;;  %v6035_v6 = vadd.f32 %v6034_v54, %v6033_v4  ;;  %v6790_v4 = vld [vmem:[%s10491_s10] ss:$0 sm:$0xff] }
 0xcbe   :  { %v6029_v45 = vadd.f32 %v6028_v2, %v6027_v29  ;;  %v6036_v46 = vrot.slane %v6035_v6, 2 }
 0xcc0   :  { %v6030_v47 = vrot.slane %v6029_v45, 1  ;;  %v6037_v50 = vadd.f32 %v6036_v46, %v6035_v6 }
 0xcc2   :  { %v6031_v51 = vadd.f32 %v6030_v47, %v6029_v45  ;;  %v6038_v52 = vrot.slane %v6037_v50, 1 }
 0xcc4   :  { %v6039_v55 = vadd.f32 %v6038_v52, %v6037_v50  ;;  %v6040_v58 = vmul.f32 0.25, %v6031_v51 }
 0xcc6   :  { %v6041_v60 = vmul.f32 0.25, %v6039_v55  ;;  %v6042_v53 = vmul.f32 %v6040_v58, %v6040_v58  ;;  %v6046_v24 = vsub.f32 %v6018_v49, %v6040_v58 }
 0xcc8   :  { %v6043_v61 = vsub.f32 %v6041_v60, %v6042_v53 }
 0xcca   :  { %v6047_v62 = vadd.f32 1e-05, %v6043_v61 }
 0xccc   :  { %8862 = vrsqrt.f32 %v6047_v62 }
 0xcd6   :  { %v8863_v40 = vpop.eup %8862 }
 0xcd7   :  { %v6049_v22 = vmul.f32 %v8863_v40, %v6044_v31 }
 0xcd9   :  { %v6053_v21 = vrot.slane %v6049_v22, %v9458_v5  ;;  %v6756_v5 = vld [vmem:[%s10489_s8 + $0x1] sm:$0x1]  ;;  %s9016_s8 = smov [#allocation11]  }
 0xcda   :  { %s6384_s7 = sshll.u32 %s9016_s8, 4  ;;  %s6385_s7 = int_to_ptr.vmem [resolvable:$true] %s6384_s7 }
 0xcdb   :  { %v6054_v1 = vmul.f32 %v6053_v21, %v6046_v24  ;;  %s8974_s9 = scalar_lea.vmem %s6385_s7, 32  ;;  %p8979_p13 = scmp.lt.s32.totalorder %s6385_s7, %s6385_s7 }
 0xcdc   :  { %p8975_p12 = scmp.ne.s32.totalorder %s6385_s7, %s8974_s9  ;;  %p8980_p0 = scmp.lt.s32.totalorder %s8974_s9, %s8974_s9 }
 0xcdd   :  { %v6059_v39 = vadd.f32 %v6754_v23, %v6054_v1 }
 0xcde   :  { %p8981_p1 = por %p8980_p0, %p8979_p13 }
 0xcdf   :  { %vm6060_vm9 = vcmp.gt.f32.partialorder %v6059_v39, 0.0  ;;  %v6061_v44 = vmul.f32 0.01, %v6059_v39 }
 0xce0   :  { %p8982_p2 = pnand %p8981_p1, %p8975_p12 }
 0xce1   :  { %v6062_v37 = vsel %vm6060_vm9, %v6059_v39, %v6061_v44 }
 0xce2   :  { %v6063_v43 = vpack.c.bf16 %v6062_v37, %v6062_v37 }
 0xce4   :  { %v6071_v11 = vsel %vm6069_vm13, %v6063_v43, 0 }
 0xce5   :  { %8296 = vmatpush3.bf16.msra.mxu0 %v6071_v11 }
 0xce6   :  { %8301 = vmatprep.subr.bf16.mxu0 %v9014_v36 }
 0xce8   :  { %8298 = vmatmul.mubr.msk.bf16.vlgmr.msra.gmra.mrb[64].mxu0 %vm6065_vm14, %v6064_v17 }
 0xce9   :  { %8302 = vmatpush3.bf16.msra.mxu0 %v6071_v11  ;;  %8303 = vmatprep.mubr.msk.bf16.mxu0 %vm9015_vm0, %v9014_v36 }
 0xcea   :  { %8307 = vmatprep.subr.bf16.mxu0 %v9014_v36 }
 0xcf0   :  { %8304 = vmatmul.mubr.msk.bf16.vlgmr.msra.gmra.mrb[68].mxu0 %vm6065_vm14, %v6756_v5 }
 0xcf1   :  { %8308 = vmatpush3.bf16.msra.mxu0 %v8840_v18  ;;  %8323 = vmatprep.mubr.msk.bf16.mxu0 %vm9015_vm0, %v9014_v36 }
 0xcf2   :  { %8309 = vmatprep.subr.bf16.mxu0 %v9014_v36 }
 0xcf5   :  { %8310 = vmatpush3.bf16.msra.mxu0 %v8841_v35 }
 0xcf6   :  { %8311 = vmatprep.subr.bf16.mxu0 %v9014_v36 }
 0xcf9   :  { %8312 = vmatpush3.bf16.msra.mxu0 %v8842_v12 }
 0xcfa   :  { %8313 = vmatprep.subr.bf16.mxu0 %v9014_v36 }
 0xcfd   :  { %8314 = vmatpush3.bf16.msra.mxu0 %v8843_v7 }
 0xcfe   :  { %8315 = vmatprep.subr.bf16.mxu0 %v9014_v36 }
 0xd01   :  { %8316 = vmatpush3.bf16.msra.mxu0 %v8844_v59 }
 0xd02   :  { %8317 = vmatprep.subr.bf16.mxu0 %v9014_v36 }
 0xd05   :  { %8318 = vmatpush3.bf16.msra.mxu0 %v8845_v0 }
 0xd06   :  { %8319 = vmatprep.subr.bf16.mxu0 %v9014_v36 }
 0xd09   :  { %8320 = vmatpush3.bf16.msra.mxu0 %v8846_v25 }
 0xd0a   :  { %8321 = vmatprep.subr.bf16.mxu0 %v9014_v36 }
 0xd0d   :  { %8322 = vmatpush3.bf16.msra.mxu0 %v8847_v57 }
 0xd0e   :  { %8327 = vmatprep.subr.bf16.mxu0 %v9014_v36 }
 0xdbb   :  { %v6107_v38 = vpop.f32.mrb[64].mxu0 }
 0xdbc   :  { %v8299_v9 = vpop.f32.mrb[65].mxu0  ;;  %v6113_v49 = vpack.c.bf16 %v6107_v38, %v6107_v38 }
 0xdbd   :  { %v6110_v41 = vpop.f32.mrb[66].mxu0 }
 0xdbe   :  { %v8300_v26 = vpop.f32.mrb[67].mxu0 }
 0xdc3   :  { %v6169_v16 = vpop.f32.mrb[68].mxu0 }
 0xdc4   :  { %v6175_v20 = vpack.c.bf16 %v6169_v16, %v6169_v16  ;;  %v8305_v56 = vpop.f32.mrb[69].mxu0 }
 0xdc5   :  { %v6172_v13 = vpop.f32.mrb[70].mxu0 }
 0xdc6   :  { %8324 = vmatmul.mubr.bf16.vlgmr.msra.gmra.mrb[72].mxu0 %v6175_v20  ;;  %v8306_v32 = vpop.f32.mrb[71].mxu0 }
 0xdc7   :  { %8328 = vmatpush3.bf16.msra.mxu0 %v8848_v15  ;;  %8343 = vmatprep.mubr.msk.bf16.mxu0 %vm9015_vm0, %v9014_v36 }
 0xdc8   :  { %8329 = vmatprep.subr.bf16.mxu0 %v9014_v36 }
 0xdcb   :  { %8330 = vmatpush3.bf16.msra.mxu0 %v8849_v63 }
 0xdcc   :  { %8331 = vmatprep.subr.bf16.mxu0 %v9014_v36 }
 0xdcf   :  { %8332 = vmatpush3.bf16.msra.mxu0 %v8850_v14 }
 0xdd0   :  { %8333 = vmatprep.subr.bf16.mxu0 %v9014_v36 }
 0xdd3   :  { %8334 = vmatpush3.bf16.msra.mxu0 %v8851_v19 }
 0xdd4   :  { %8335 = vmatprep.subr.bf16.mxu0 %v9014_v36 }
 0xdd7   :  { %8336 = vmatpush3.bf16.msra.mxu0 %v8852_v34 }
 0xdd8   :  { %8337 = vmatprep.subr.bf16.mxu0 %v9014_v36 }
 0xddb   :  { %8338 = vmatpush3.bf16.msra.mxu0 %v8853_v28 }
 0xddc   :  { %8339 = vmatprep.subr.bf16.mxu0 %v9014_v36 }
 0xddf   :  { %8340 = vmatpush3.bf16.msra.mxu0 %v8854_v33 }
 0xde0   :  { %8341 = vmatprep.subr.bf16.mxu0 %v9014_v36 }
 0xde3   :  { %8342 = vmatpush3.bf16.msra.mxu0 %v8855_v8 }
 0xde6   :  { %8344 = vmatmul.mubr.bf16.vlgmr.msra.gmra.mrb[76].mxu0 %v6113_v49 }
 0xe99   :  { %v6275_v42 = vpop.f32.mrb[72].mxu0 }
 0xe9a   :  { %v8325_v48 = vpop.f32.mrb[73].mxu0 }
 0xe9b   :  { %v6278_v10 = vpop.f32.mrb[74].mxu0 }
 0xe9c   :  { %v8326_v3 = vpop.f32.mrb[75].mxu0 }
 0xeb9   :  { %v6363_v27 = vpop.f32.mrb[76].mxu0 }
 0xeba   :  { %v6364_v30 = vadd.f32 %v6363_v27, %v6275_v42  ;;  %v8345_v29 = vpop.f32.mrb[77].mxu0 }
 0xebb   :  { %v6366_v54 = vpop.f32.mrb[78].mxu0 }
 0xebc   :  { %v6376_v2 = vadd.f32 %v6790_v4, %v6364_v30  ;;  %v8346_v6 = vpop.f32.mrb[79].mxu0 }
 0xebe   :  { %6377 = vst [vmem:[#allocation11] sm:$0x3] %v6376_v2 }
 0xebf   :  { %8985 = shalt.err (!%p8982_p2)
}
 0xec0   :  { %s8986_s10 = scalar_lea.hbm %s10494_s13, 32 }
 0xec1   :  { %p8987_p3 = scmp.ne.s32.totalorder %s10494_s13, %s8986_s10  ;;  %p8990_p4 = scmp.lt.u32.totalorder %s8986_s10, %s10494_s13 }
 0xec3   :  { %p8992_p5 = pnand %p8990_p4, %p8987_p3 }
 0xec5   :  { %8995 = shalt.err (!%p8992_p5)
}
 0xec6   :  { %6387 = dma.vmem_to_hbm [thread:$0]  %s6385_s7, 32, %s10494_s13, [#allocation4]  }
 0xec7   :  { %9002 = dma.done.wait [#allocation4], 32  }
 0xec8   :  { %9003 = vsyncadd [#allocation4], 4294967264 }
 0xec9   :  { %6391 = vsyncpa [#allocation3], 1 }
 0xeca   :  { %6392 = vsyncpa [#allocation6], 1 }
 0xecb   :  { %6393 = vsyncpa [#allocation9], 1 }
 0xecc   :  { %6394 = vsyncpa [#allocation4], 1 }

</bundles_post_ra>
